<compile_context>
chip_gen: v6e
topology: v6e:2x2x1
jax: 0.10.0
libtpu: 0.0.40
codegen_flags: <defaults>
</compile_context>

<pallas_src>
import numpy as np
import jax
import jax.numpy as jnp
from jax import lax
from jax.experimental import pallas as pl
from jax.experimental.pallas import tpu as pltpu

NEG_SLOPE = 0.2
REVIN_EPS = 1e-5
_MASK_NEG = -1e30

# 3x3 tap offsets (di over nodes, dj over time), row-major.
_TAPS_3X3 = tuple((a - 1, c - 1) for a in range(3) for c in range(3))
_K00 = _TAPS_3X3.index((0, 0))


def _lrelu(x, slope=NEG_SLOPE):
    return jnp.where(x >= 0, x, slope * x)


# ----------------------------------------------------------------------------
# Fused per-layer kernel (one grid step == one batch element):
#   start 1x1 conv -> [GCN] -> joint attention (T/S/ST, shuffle folded)
#   -> joint conv (taps, shuffle folded) -> residual adds, all in VMEM.
# ----------------------------------------------------------------------------
def _make_layer_kernel(n, t, c_out, heads, graph):
    nt = n * t
    f32 = jnp.float32
    bf16 = jnp.bfloat16

    def kernel(*refs):
        it = iter(refs)
        x_ref = next(it)
        if graph:
            x0_ref = next(it)
            madj_ref = next(it)
        bias_t_ref = next(it)
        bias_s_ref = next(it)
        ncol_ref = next(it)
        tcol_ref = next(it)
        sw_ref = next(it)
        sb_ref = next(it)
        qw_ref = next(it); kw_ref = next(it); vw_ref = next(it)
        qb_ref = next(it); kb_ref = next(it); vb_ref = next(it)
        pw_ref = next(it); pb_ref = next(it)
        mid_ref = next(it)
        cw_ref = next(it); cb_ref = next(it)
        if graph:
            gw_ref = next(it); gb_ref = next(it)
        out_ref = next(it)

        x2 = x_ref[0]                                   # (nt, c_in) f32
        ncol = ncol_ref[...]                            # (nt, 1) int32 node index
        tcol = tcol_ref[...]                            # (nt, 1) int32 time index

        # Hoisted conv boundary masks (0/1 f32, one per tap), computed once per
        # grid step and shared by the ST / S / T conv branches.
        tap_mask = {}
        for (di, dj) in _TAPS_3X3:
            if di == 0 and dj == 0:
                tap_mask[(di, dj)] = None
            else:
                ok = jnp.logical_and(
                    jnp.logical_and(ncol + di >= 0, ncol + di < n),
                    jnp.logical_and(tcol + dj >= 0, tcol + dj < t))
                tap_mask[(di, dj)] = ok.astype(f32)

        # start 1x1 conv + leaky relu (bf16 MXU feed, f32 accumulate)
        y = _lrelu(jnp.dot(x2.astype(bf16), sw_ref[...],
                           preferred_element_type=f32) + sb_ref[...])
        y_bf = y.astype(bf16)

        # GCN (Graph-WaveNet, support=[adj], order=2) on the RevIN'd input.
        # TODO(synk): GCN dropout is a no-op at inference.
        if graph:
            madj = madj_ref[...]                         # (nt, nt) bf16
            x0b = x0_ref[0].astype(bf16)
            h1 = jnp.dot(madj, x0b, preferred_element_type=f32)
            h2 = jnp.dot(madj, h1.astype(bf16), preferred_element_type=f32)
            gout = (jnp.dot(x0b, gw_ref[0], preferred_element_type=f32)
                    + jnp.dot(h1.astype(bf16), gw_ref[1], preferred_element_type=f32)
                    + jnp.dot(h2.astype(bf16), gw_ref[2], preferred_element_type=f32)
                    + gb_ref[...])

        # Joint attention: id passthrough (scattered) + 3 branches x heads.
        # Input slices live in the zero-padded rows of qw/kw/vw; the channel
        # shuffle lives in the scattered columns of pw/pb/mid => branch outputs
        # are simply summed.  Scale 1/sqrt(dh) is already folded into qw/qb.
        att = jnp.dot(y_bf, mid_ref[...], preferred_element_type=f32)
        branch_bias = (bias_t_ref[...], bias_s_ref[...], None)   # T, S, ST
        for br in range(3):
            att = att + pb_ref[br]
            for h in range(heads):
                q = jnp.dot(y_bf, qw_ref[br, h], preferred_element_type=f32) + qb_ref[br, h]
                k = jnp.dot(y_bf, kw_ref[br, h], preferred_element_type=f32) + kb_ref[br, h]
                v = jnp.dot(y_bf, vw_ref[br, h], preferred_element_type=f32) + vb_ref[br, h]
                s = lax.dot_general(q.astype(bf16), k.astype(bf16),
                                    (((1,), (1,)), ((), ())),
                                    preferred_element_type=f32)   # (nt, nt)
                if branch_bias[br] is not None:
                    s = s + branch_bias[br]
                m = jnp.max(s, axis=-1, keepdims=True)
                p = jnp.exp(s - m)
                p = p / jnp.sum(p, axis=-1, keepdims=True)        # exact softmax
                o = jnp.dot(p.astype(bf16), v.astype(bf16),
                            preferred_element_type=f32)           # (nt, dh)
                att = att + jnp.dot(o.astype(bf16), pw_ref[br, h],
                                    preferred_element_type=f32)
        att = _lrelu(att)

        # Joint conv: 9 taps, each = sublane roll (XLU) + boundary mask + one
        # combined (c_out, c_out) matmul (ST/S/T branches, id passthrough and
        # the second channel shuffle all folded into the tap weight).
        conv = jnp.dot(att.astype(bf16), cw_ref[_K00],
                       preferred_element_type=f32)                # (0, 0) tap
        for k_idx, (di, dj) in enumerate(_TAPS_3X3):
            if di == 0 and dj == 0:
                continue
            shift = (-(di * t + dj)) % nt                          # y[r] = att[r + di*t + dj]
            rolled = pltpu.roll(att, shift, axis=0)
            slab = (rolled * tap_mask[(di, dj)]).astype(bf16)
            conv = conv + jnp.dot(slab, cw_ref[k_idx], preferred_element_type=f32)
        conv = _lrelu(conv + cb_ref[...])

        if graph:
            out_ref[0] = conv + gout + y
        else:
            out_ref[0] = y + conv

    return kernel


# ----------------------------------------------------------------------------
# Fused end kernel: 3x3 conv + RevIN denorm (one grid step == one batch elem)
# ----------------------------------------------------------------------------
def _make_end_kernel(n, t, revin):
    nt = n * t
    f32 = jnp.float32
    bf16 = jnp.bfloat16

    def kernel(*refs):
        it = iter(refs)
        x_ref = next(it)
        ncol_ref = next(it); tcol_ref = next(it)
        ew_ref = next(it); eb_ref = next(it)
        if revin:
            rw_ref = next(it); rb_ref = next(it)
            mean_ref = next(it); std_ref = next(it)
        out_ref = next(it)

        x2 = x_ref[0]
        ncol = ncol_ref[...]
        tcol = tcol_ref[...]

        # TODO(synk): model-level dropout before end_conv is a no-op at inference.
        acc = jnp.dot(x2.astype(bf16), ew_ref[_K00], preferred_element_type=f32)
        for k_idx, (di, dj) in enumerate(_TAPS_3X3):
            if di == 0 and dj == 0:
                continue
            ok = jnp.logical_and(
                jnp.logical_and(ncol + di >= 0, ncol + di < n),
                jnp.logical_and(tcol + dj >= 0, tcol + dj < t)).astype(f32)
            rolled = pltpu.roll(x2, (-(di * t + dj)) % nt, axis=0)
            acc = acc + jnp.dot((rolled * ok).astype(bf16), ew_ref[k_idx],
                                preferred_element_type=f32)
        y = acc + eb_ref[...]
        if revin:
            y = (y - rb_ref[...]) / (rw_ref[...] + REVIN_EPS * REVIN_EPS)
            y = y * std_ref[0] + mean_ref[0]
        out_ref[0] = y

    return kernel


# ----------------------------------------------------------------------------
# Host-side weight preparation (shuffle / slices / scale folded into weights)
# ----------------------------------------------------------------------------
def _dst_perm(c, groups):
    """Post-shuffle destination column of pre-shuffle column i (ShuffleNet)."""
    cpg = c // groups
    i = np.arange(c)
    return (i % cpg) * groups + (i // cpg)


def _conv_tap_weights_np(w):
    """(Cout, Cin, kh, kw) torch conv weight -> (kh*kw, Cin, Cout) tap matrices."""
    w = np.asarray(w, np.float32)
    cout, cin, kh, kw = w.shape
    return np.transpose(w, (2, 3, 1, 0)).reshape(kh * kw, cin, cout)


def _prep_attention_weights(ja, c_out, pc, idc, heads, dst):
    dh = pc // heads
    scale = dh ** -0.5
    in_start = {"ST": idc, "S": idc + pc, "T": idc + 2 * pc}   # split of y
    out_start = {"T": idc, "S": idc + pc, "ST": idc + 2 * pc}  # pre-shuffle cat order
    order = ("T", "S", "ST")
    qw = np.zeros((3, heads, c_out, dh), np.float32)
    kw = np.zeros_like(qw)
    vw = np.zeros_like(qw)
    qb = np.zeros((3, heads, 1, dh), np.float32)
    kb = np.zeros_like(qb)
    vb = np.zeros_like(qb)
    pw = np.zeros((3, heads, dh, c_out), np.float32)
    pb = np.zeros((3, 1, c_out), np.float32)
    for bi, name in enumerate(order):
        blk = ja[name]
        W = np.asarray(blk["qkv_w"], np.float32)       # (pc, 3*pc)
        B = np.asarray(blk["qkv_b"], np.float32)       # (3*pc,)
        PW = np.asarray(blk["proj_w"], np.float32)     # (pc, pc)
        PB = np.asarray(blk["proj_b"], np.float32)     # (pc,)
        ins = in_start[name]
        dst_cols = dst[out_start[name]:out_start[name] + pc]
        pb[bi, 0, dst_cols] = PB
        for h in range(heads):
            qw[bi, h, ins:ins + pc, :] = W[:, h * dh:(h + 1) * dh] * scale
            kw[bi, h, ins:ins + pc, :] = W[:, pc + h * dh:pc + (h + 1) * dh]
            vw[bi, h, ins:ins + pc, :] = W[:, 2 * pc + h * dh:2 * pc + (h + 1) * dh]
            qb[bi, h, 0, :] = B[h * dh:(h + 1) * dh] * scale
            kb[bi, h, 0, :] = B[pc + h * dh:pc + (h + 1) * dh]
            vb[bi, h, 0, :] = B[2 * pc + h * dh:2 * pc + (h + 1) * dh]
            tmp = np.zeros((dh, c_out), np.float32)
            tmp[:, dst_cols] = PW[h * dh:(h + 1) * dh, :]
            pw[bi, h] = tmp
    mid = np.zeros((c_out, c_out), np.float32)         # identity-branch passthrough
    for i in range(idc):
        mid[i, dst[i]] = 1.0
    bf = jnp.bfloat16
    return (jnp.asarray(qw, bf), jnp.asarray(kw, bf), jnp.asarray(vw, bf),
            jnp.asarray(qb), jnp.asarray(kb), jnp.asarray(vb),
            jnp.asarray(pw, bf), jnp.asarray(pb), jnp.asarray(mid, bf))


def _prep_conv_weights(jc, c_out, pc, idc, dst):
    tap_index = {tap: k for k, tap in enumerate(_TAPS_3X3)}
    in_st, in_s, in_t = idc, idc + pc, idc + 2 * pc            # split of att
    dst_st = dst[idc:idc + pc]                                  # cat order: id, ST, S, T
    dst_s = dst[idc + pc:idc + 2 * pc]
    dst_t = dst[idc + 2 * pc:idc + 3 * pc]
    W = np.zeros((9, c_out, c_out), np.float32)
    bias = np.zeros((1, c_out), np.float32)

    def scatter(tap_k, in_s0, dst_cols, mat):                   # mat: (pc, pc)
        tmp = np.zeros((pc, c_out), np.float32)
        tmp[:, dst_cols] = mat
        W[tap_k, in_s0:in_s0 + pc, :] += tmp

    st_taps = _conv_tap_weights_np(jc["ST_w"])                  # (9, pc, pc)
    for k, tap in enumerate(_TAPS_3X3):
        scatter(k, in_st, dst_st, st_taps[k])
    s_taps = _conv_tap_weights_np(jc["S_w"])                    # (3, pc, pc): (-1,0),(0,0),(1,0)
    for k, di in enumerate((-1, 0, 1)):
        scatter(tap_index[(di, 0)], in_s, dst_s, s_taps[k])
    t_taps = _conv_tap_weights_np(jc["T_w"])                    # (3, pc, pc): (0,-1),(0,0),(0,1)
    for k, dj in enumerate((-1, 0, 1)):
        scatter(tap_index[(0, dj)], in_t, dst_t, t_taps[k])
    for i in range(idc):                                        # identity passthrough
        W[_K00, i, dst[i]] += 1.0
    bias[0, dst_st] = np.asarray(jc["ST_b"], np.float32)
    bias[0, dst_s] = np.asarray(jc["S_b"], np.float32)
    bias[0, dst_t] = np.asarray(jc["T_b"], np.float32)
    return jnp.asarray(W, jnp.bfloat16), jnp.asarray(bias)


# ----------------------------------------------------------------------------
# Forward pass
# ----------------------------------------------------------------------------
def astcl_forward(inp, adj, params, *, depth, partial, heads, revin=True, graph=True):
    """inp: (b, n, l, num_features), adj: (n, n) -> (b, l)."""
    b, n, l, nf = inp.shape
    nt = n * l
    x = inp.astype(jnp.float32)

    mean = stdev = None
    if revin:
        mean = jnp.mean(x, axis=(1, 2), keepdims=True)
        stdev = jnp.sqrt(jnp.var(x, axis=(1, 2), keepdims=True) + REVIN_EPS)
        x = (x - mean) / stdev
        x = x * params["revin_w"] + params["revin_b"]

    # canonical layout: (b, n*l, C), rows (node, time) row-major, channels on lanes
    x_rows = x.reshape(b, nt, nf)
    x0_rows = x_rows

    node_idx = np.repeat(np.arange(n, dtype=np.int32), l)
    time_idx = np.tile(np.arange(l, dtype=np.int32), n)
    ncol = jnp.asarray(node_idx.reshape(nt, 1))
    tcol = jnp.asarray(time_idx.reshape(nt, 1))
    # additive attention bias masks (0 / -1e30): T = same node, S = same time
    bias_t = jnp.asarray(np.where(node_idx[:, None] == node_idx[None, :],
                                  0.0, _MASK_NEG), jnp.float32)
    bias_s = jnp.asarray(np.where(time_idx[:, None] == time_idx[None, :],
                                  0.0, _MASK_NEG), jnp.float32)

    madj = None
    if graph:
        madj = jnp.asarray(jnp.kron(adj.astype(jnp.float32).T,
                                    jnp.eye(l, dtype=jnp.float32)), jnp.bfloat16)

    def batch_spec(a):
        return pl.BlockSpec((1,) + a.shape[1:],
                            lambda bi: (bi,) + (0,) * (a.ndim - 1))

    def const_spec(a):
        nd = a.ndim
        return pl.BlockSpec(a.shape, lambda bi, _nd=nd: (0,) * _nd)

    cparams = pltpu.CompilerParams(dimension_semantics=("parallel",),
                                   vmem_limit_bytes=64 * 1024 * 1024)

    cur = x_rows
    for i in range(depth):
        sw_t = np.asarray(params["start_w"][i], np.float32)     # (c_out, c_in, 1, 1)
        c_out = sw_t.shape[0]
        pc = c_out // partial
        idc = c_out - 3 * pc
        dst = _dst_perm(c_out, partial)

        sw = jnp.asarray(sw_t[:, :, 0, 0].T, jnp.bfloat16)
        sb = jnp.asarray(np.asarray(params["start_b"][i], np.float32).reshape(1, c_out))
        (qw, kw, vw, qb, kb, vb, pw, pb, mid) = _prep_attention_weights(
            params["ja"][i], c_out, pc, idc, heads[i], dst)
        cw, cb = _prep_conv_weights(params["jc"][i], c_out, pc, idc, dst)

        arrays = [(cur, batch_spec(cur))]
        if graph:
            gp = params["gcn"][i]
            gw_full = np.asarray(gp["mlp_w"], np.float32)[:, :, 0, 0].T   # (3*c0, c_out)
            c0 = gw_full.shape[0] // 3
            gw = jnp.asarray(gw_full.reshape(3, c0, c_out), jnp.bfloat16)
            gb = jnp.asarray(np.asarray(gp["mlp_b"], np.float32).reshape(1, c_out))
            arrays += [(x0_rows, batch_spec(x0_rows)), (madj, const_spec(madj))]
        for a in (bias_t, bias_s, ncol, tcol, sw, sb,
                  qw, kw, vw, qb, kb, vb, pw, pb, mid, cw, cb):
            arrays.append((a, const_spec(a)))
        if graph:
            arrays += [(gw, const_spec(gw)), (gb, const_spec(gb))]

        kern = _make_layer_kernel(n, l, c_out, heads[i], graph)
        cur = pl.pallas_call(
            kern,
            grid=(b,),
            in_specs=[s for _, s in arrays],
            out_specs=pl.BlockSpec((1, nt, c_out), lambda bi: (bi, 0, 0)),
            out_shape=jax.ShapeDtypeStruct((b, nt, c_out), jnp.float32),
            compiler_params=cparams,
        )(*[a for a, _ in arrays])

    # end 3x3 conv (+ fused RevIN denorm)
    ew = jnp.asarray(_conv_tap_weights_np(params["end_w"]), jnp.bfloat16)   # (9, c_last, nf)
    eb = jnp.asarray(np.asarray(params["end_b"], np.float32).reshape(1, nf))
    arrays = [(cur, batch_spec(cur)), (ncol, const_spec(ncol)), (tcol, const_spec(tcol)),
              (ew, const_spec(ew)), (eb, const_spec(eb))]
    if revin:
        rw = params["revin_w"].reshape(1, nf).astype(jnp.float32)
        rb = params["revin_b"].reshape(1, nf).astype(jnp.float32)
        mean_b = mean.reshape(b, 1, nf)
        std_b = stdev.reshape(b, 1, nf)
        arrays += [(rw, const_spec(rw)), (rb, const_spec(rb)),
                   (mean_b, batch_spec(mean_b)), (std_b, batch_spec(std_b))]
    endk = _make_end_kernel(n, l, revin)
    y = pl.pallas_call(
        endk,
        grid=(b,),
        in_specs=[s for _, s in arrays],
        out_specs=pl.BlockSpec((1, nt, nf), lambda bi: (bi, 0, 0)),
        out_shape=jax.ShapeDtypeStruct((b, nt, nf), jnp.float32),
        compiler_params=cparams,
    )(*[a for a, _ in arrays])

    out_p = y.reshape(b, n, l, nf)                 # (b, n, l, F) channel-last
    return jnp.squeeze(out_p[:, 0, :, 0])


# ----------------------------------------------------------------------------
# Deterministic parameter init (synthetic weights, torch layouts)
# ----------------------------------------------------------------------------
def _init_linear(key, fan_in, fan_out):
    kw, kb = jax.random.split(key)
    lim = (6.0 / (fan_in + fan_out)) ** 0.5
    w = jax.random.uniform(kw, (fan_in, fan_out), jnp.float32, -lim, lim)
    b = jax.random.uniform(kb, (fan_out,), jnp.float32, -0.1, 0.1)
    return w, b


def _init_conv(key, cout, cin, kh, kw):
    k1, k2 = jax.random.split(key)
    fan = cin * kh * kw + cout
    lim = (6.0 / fan) ** 0.5
    w = jax.random.uniform(k1, (cout, cin, kh, kw), jnp.float32, -lim, lim)
    b = jax.random.uniform(k2, (cout,), jnp.float32, -0.1, 0.1)
    return w, b


def _init_attn_block(key, dim):
    k1, k2 = jax.random.split(key)
    qkv_w, qkv_b = _init_linear(k1, dim, 3 * dim)
    proj_w, proj_b = _init_linear(k2, dim, dim)
    return {"qkv_w": qkv_w, "qkv_b": qkv_b, "proj_w": proj_w, "proj_b": proj_b}


def init_params(key, channels, heads, depth, partial, num_features):
    keys = jax.random.split(key, 4 * depth + 2)
    params = {
        "revin_w": jnp.ones((num_features,), jnp.float32),
        "revin_b": jnp.zeros((num_features,), jnp.float32),
        "start_w": [], "start_b": [], "ja": [], "jc": [], "gcn": [],
    }
    ki = 0
    for i in range(depth):
        c_in, c_out = channels[i], channels[i + 1]
        pc = c_out // partial
        sw, sb = _init_conv(keys[ki], c_out, c_in, 1, 1); ki += 1
        params["start_w"].append(sw); params["start_b"].append(sb)

        ka, kb_, kc = jax.random.split(keys[ki], 3); ki += 1
        params["ja"].append({"T": _init_attn_block(ka, pc),
                             "S": _init_attn_block(kb_, pc),
                             "ST": _init_attn_block(kc, pc)})

        kt, ks, kst = jax.random.split(keys[ki], 3); ki += 1
        tw, tb = _init_conv(kt, pc, pc, 1, 3)
        sw2, sb2 = _init_conv(ks, pc, pc, 3, 1)
        stw, stb = _init_conv(kst, pc, pc, 3, 3)
        params["jc"].append({"T_w": tw, "T_b": tb, "S_w": sw2, "S_b": sb2,
                             "ST_w": stw, "ST_b": stb})

        mw, mb = _init_conv(keys[ki], c_out, 3 * channels[0], 1, 1); ki += 1
        params["gcn"].append({"mlp_w": mw, "mlp_b": mb})

    ew, eb = _init_conv(keys[ki], num_features, channels[-1], 3, 3); ki += 1
    params["end_w"], params["end_b"] = ew, eb
    return params


# ----------------------------------------------------------------------------
if __name__ == "__main__":
    b, n, l = 2, 4, 8
    num_features = 8          # = channels[0]
    depth = 1
    channels = [8, 16]
    heads = [2]
    partial = 4               # pc = 16 // 4 = 4, idc = 4

    key = jax.random.PRNGKey(0)
    k_in, k_adj, k_par = jax.random.split(key, 3)
    inp = jax.random.normal(k_in, (b, n, l, num_features), dtype=jnp.float32)
    adj = jax.nn.softmax(jax.random.normal(k_adj, (n, n), dtype=jnp.float32), axis=-1)
    params = init_params(k_par, channels, heads, depth, partial, num_features)

    out = astcl_forward(inp, adj, params, depth=depth, partial=partial,
                        heads=heads, revin=True, graph=True)
    out = jax.block_until_ready(out)
    assert out.shape == (b, l), out.shape
    assert bool(jnp.all(jnp.isfinite(out)))
    print("KERNEL_OK")
</pallas_src>

<mosaic_0001>
module attributes {stable_mosaic.version = 11 : i64} {
  func.func @kernel(%arg0: i32, %arg1: memref<1x32x8xf32, #tpu.memory_space<vmem>>, %arg2: memref<1x32x8xf32, #tpu.memory_space<vmem>>, %arg3: memref<32x32xbf16, #tpu.memory_space<vmem>>, %arg4: memref<32x32xf32, #tpu.memory_space<vmem>>, %arg5: memref<32x32xf32, #tpu.memory_space<vmem>>, %arg6: memref<32x1xi32, #tpu.memory_space<vmem>>, %arg7: memref<32x1xi32, #tpu.memory_space<vmem>>, %arg8: memref<8x16xbf16, #tpu.memory_space<vmem>>, %arg9: memref<1x16xf32, #tpu.memory_space<vmem>>, %arg10: memref<3x2x16x2xbf16, #tpu.memory_space<vmem>>, %arg11: memref<3x2x16x2xbf16, #tpu.memory_space<vmem>>, %arg12: memref<3x2x16x2xbf16, #tpu.memory_space<vmem>>, %arg13: memref<3x2x1x2xf32, #tpu.memory_space<vmem>>, %arg14: memref<3x2x1x2xf32, #tpu.memory_space<vmem>>, %arg15: memref<3x2x1x2xf32, #tpu.memory_space<vmem>>, %arg16: memref<3x2x2x16xbf16, #tpu.memory_space<vmem>>, %arg17: memref<3x1x16xf32, #tpu.memory_space<vmem>>, %arg18: memref<16x16xbf16, #tpu.memory_space<vmem>>, %arg19: memref<9x16x16xbf16, #tpu.memory_space<vmem>>, %arg20: memref<1x16xf32, #tpu.memory_space<vmem>>, %arg21: memref<3x8x16xbf16, #tpu.memory_space<vmem>>, %arg22: memref<1x16xf32, #tpu.memory_space<vmem>>, %arg23: memref<1x32x16xf32, #tpu.memory_space<vmem>>) attributes {dimension_semantics = [#tpu.dimension_semantics<parallel>], iteration_bounds = array<i64: 2>, scalar_prefetch = 0 : i64, scratch_operands = 0 : i64, tpu.core_type = #tpu.core_type<tc>, window_params = [{transform_indices = @transform_0, window_bounds = array<i64: 1, 32, 8>}, {transform_indices = @transform_1, window_bounds = array<i64: 1, 32, 8>}, {pipeline_mode = #tpu.pipeline_mode<synchronous>, transform_indices = @transform_2, window_bounds = array<i64: 32, 32>}, {pipeline_mode = #tpu.pipeline_mode<synchronous>, transform_indices = @transform_3, window_bounds = array<i64: 32, 32>}, {pipeline_mode = #tpu.pipeline_mode<synchronous>, transform_indices = @transform_4, window_bounds = array<i64: 32, 32>}, {pipeline_mode = #tpu.pipeline_mode<synchronous>, transform_indices = @transform_5, window_bounds = array<i64: 32, 1>}, {pipeline_mode = #tpu.pipeline_mode<synchronous>, transform_indices = @transform_6, window_bounds = array<i64: 32, 1>}, {pipeline_mode = #tpu.pipeline_mode<synchronous>, transform_indices = @transform_7, window_bounds = array<i64: 8, 16>}, {pipeline_mode = #tpu.pipeline_mode<synchronous>, transform_indices = @transform_8, window_bounds = array<i64: 1, 16>}, {pipeline_mode = #tpu.pipeline_mode<synchronous>, transform_indices = @transform_9, window_bounds = array<i64: 3, 2, 16, 2>}, {pipeline_mode = #tpu.pipeline_mode<synchronous>, transform_indices = @transform_10, window_bounds = array<i64: 3, 2, 16, 2>}, {pipeline_mode = #tpu.pipeline_mode<synchronous>, transform_indices = @transform_11, window_bounds = array<i64: 3, 2, 16, 2>}, {pipeline_mode = #tpu.pipeline_mode<synchronous>, transform_indices = @transform_12, window_bounds = array<i64: 3, 2, 1, 2>}, {pipeline_mode = #tpu.pipeline_mode<synchronous>, transform_indices = @transform_13, window_bounds = array<i64: 3, 2, 1, 2>}, {pipeline_mode = #tpu.pipeline_mode<synchronous>, transform_indices = @transform_14, window_bounds = array<i64: 3, 2, 1, 2>}, {pipeline_mode = #tpu.pipeline_mode<synchronous>, transform_indices = @transform_15, window_bounds = array<i64: 3, 2, 2, 16>}, {pipeline_mode = #tpu.pipeline_mode<synchronous>, transform_indices = @transform_16, window_bounds = array<i64: 3, 1, 16>}, {pipeline_mode = #tpu.pipeline_mode<synchronous>, transform_indices = @transform_17, window_bounds = array<i64: 16, 16>}, {pipeline_mode = #tpu.pipeline_mode<synchronous>, transform_indices = @transform_18, window_bounds = array<i64: 9, 16, 16>}, {pipeline_mode = #tpu.pipeline_mode<synchronous>, transform_indices = @transform_19, window_bounds = array<i64: 1, 16>}, {pipeline_mode = #tpu.pipeline_mode<synchronous>, transform_indices = @transform_20, window_bounds = array<i64: 3, 8, 16>}, {pipeline_mode = #tpu.pipeline_mode<synchronous>, transform_indices = @transform_21, window_bounds = array<i64: 1, 16>}, {transform_indices = @transform_22, window_bounds = array<i64: 1, 32, 16>}]} {
    %c0 = arith.constant 0 : index
    %c0_0 = arith.constant 0 : index
    %c0_1 = arith.constant 0 : index
    %0 = vector.load %arg1[%c0, %c0_0, %c0_1] : memref<1x32x8xf32, #tpu.memory_space<vmem>>, vector<1x32x8xf32>
    %1 = vector.shape_cast %0 : vector<1x32x8xf32> to vector<32x8xf32>
    %c0_2 = arith.constant 0 : index
    %c0_3 = arith.constant 0 : index
    %2 = vector.load %arg6[%c0_2, %c0_3] : memref<32x1xi32, #tpu.memory_space<vmem>>, vector<32x1xi32>
    %c0_4 = arith.constant 0 : index
    %c0_5 = arith.constant 0 : index
    %3 = vector.load %arg7[%c0_4, %c0_5] : memref<32x1xi32, #tpu.memory_space<vmem>>, vector<32x1xi32>
    %c-1_i32 = arith.constant -1 : i32
    %4 = vector.broadcast %c-1_i32 : i32 to vector<32x1xi32>
    %5 = arith.addi %2, %4 : vector<32x1xi32>
    %c0_i32 = arith.constant 0 : i32
    %6 = vector.broadcast %c0_i32 : i32 to vector<32x1xi32>
    %7 = arith.cmpi sge, %5, %6 : vector<32x1xi32>
    %c-1_i32_6 = arith.constant -1 : i32
    %8 = vector.broadcast %c-1_i32_6 : i32 to vector<32x1xi32>
    %9 = arith.addi %2, %8 : vector<32x1xi32>
    %c4_i32 = arith.constant 4 : i32
    %10 = vector.broadcast %c4_i32 : i32 to vector<32x1xi32>
    %11 = arith.cmpi slt, %9, %10 : vector<32x1xi32>
    %12 = arith.andi %7, %11 : vector<32x1xi1>
    %c-1_i32_7 = arith.constant -1 : i32
    %13 = vector.broadcast %c-1_i32_7 : i32 to vector<32x1xi32>
    %14 = arith.addi %3, %13 : vector<32x1xi32>
    %c0_i32_8 = arith.constant 0 : i32
    %15 = vector.broadcast %c0_i32_8 : i32 to vector<32x1xi32>
    %16 = arith.cmpi sge, %14, %15 : vector<32x1xi32>
    %c-1_i32_9 = arith.constant -1 : i32
    %17 = vector.broadcast %c-1_i32_9 : i32 to vector<32x1xi32>
    %18 = arith.addi %3, %17 : vector<32x1xi32>
    %c8_i32 = arith.constant 8 : i32
    %19 = vector.broadcast %c8_i32 : i32 to vector<32x1xi32>
    %20 = arith.cmpi slt, %18, %19 : vector<32x1xi32>
    %21 = arith.andi %16, %20 : vector<32x1xi1>
    %22 = arith.andi %12, %21 : vector<32x1xi1>
    %23 = arith.extui %22 : vector<32x1xi1> to vector<32x1xi32>
    %24 = arith.sitofp %23 : vector<32x1xi32> to vector<32x1xf32>
    %c-1_i32_10 = arith.constant -1 : i32
    %25 = vector.broadcast %c-1_i32_10 : i32 to vector<32x1xi32>
    %26 = arith.addi %2, %25 : vector<32x1xi32>
    %c0_i32_11 = arith.constant 0 : i32
    %27 = vector.broadcast %c0_i32_11 : i32 to vector<32x1xi32>
    %28 = arith.cmpi sge, %26, %27 : vector<32x1xi32>
    %c-1_i32_12 = arith.constant -1 : i32
    %29 = vector.broadcast %c-1_i32_12 : i32 to vector<32x1xi32>
    %30 = arith.addi %2, %29 : vector<32x1xi32>
    %c4_i32_13 = arith.constant 4 : i32
    %31 = vector.broadcast %c4_i32_13 : i32 to vector<32x1xi32>
    %32 = arith.cmpi slt, %30, %31 : vector<32x1xi32>
    %33 = arith.andi %28, %32 : vector<32x1xi1>
    %c0_i32_14 = arith.constant 0 : i32
    %34 = vector.broadcast %c0_i32_14 : i32 to vector<32x1xi32>
    %35 = arith.addi %3, %34 : vector<32x1xi32>
    %c0_i32_15 = arith.constant 0 : i32
    %36 = vector.broadcast %c0_i32_15 : i32 to vector<32x1xi32>
    %37 = arith.cmpi sge, %35, %36 : vector<32x1xi32>
    %c0_i32_16 = arith.constant 0 : i32
    %38 = vector.broadcast %c0_i32_16 : i32 to vector<32x1xi32>
    %39 = arith.addi %3, %38 : vector<32x1xi32>
    %c8_i32_17 = arith.constant 8 : i32
    %40 = vector.broadcast %c8_i32_17 : i32 to vector<32x1xi32>
    %41 = arith.cmpi slt, %39, %40 : vector<32x1xi32>
    %42 = arith.andi %37, %41 : vector<32x1xi1>
    %43 = arith.andi %33, %42 : vector<32x1xi1>
    %44 = arith.extui %43 : vector<32x1xi1> to vector<32x1xi32>
    %45 = arith.sitofp %44 : vector<32x1xi32> to vector<32x1xf32>
    %c-1_i32_18 = arith.constant -1 : i32
    %46 = vector.broadcast %c-1_i32_18 : i32 to vector<32x1xi32>
    %47 = arith.addi %2, %46 : vector<32x1xi32>
    %c0_i32_19 = arith.constant 0 : i32
    %48 = vector.broadcast %c0_i32_19 : i32 to vector<32x1xi32>
    %49 = arith.cmpi sge, %47, %48 : vector<32x1xi32>
    %c-1_i32_20 = arith.constant -1 : i32
    %50 = vector.broadcast %c-1_i32_20 : i32 to vector<32x1xi32>
    %51 = arith.addi %2, %50 : vector<32x1xi32>
    %c4_i32_21 = arith.constant 4 : i32
    %52 = vector.broadcast %c4_i32_21 : i32 to vector<32x1xi32>
    %53 = arith.cmpi slt, %51, %52 : vector<32x1xi32>
    %54 = arith.andi %49, %53 : vector<32x1xi1>
    %c1_i32 = arith.constant 1 : i32
    %55 = vector.broadcast %c1_i32 : i32 to vector<32x1xi32>
    %56 = arith.addi %3, %55 : vector<32x1xi32>
    %c0_i32_22 = arith.constant 0 : i32
    %57 = vector.broadcast %c0_i32_22 : i32 to vector<32x1xi32>
    %58 = arith.cmpi sge, %56, %57 : vector<32x1xi32>
    %c1_i32_23 = arith.constant 1 : i32
    %59 = vector.broadcast %c1_i32_23 : i32 to vector<32x1xi32>
    %60 = arith.addi %3, %59 : vector<32x1xi32>
    %c8_i32_24 = arith.constant 8 : i32
    %61 = vector.broadcast %c8_i32_24 : i32 to vector<32x1xi32>
    %62 = arith.cmpi slt, %60, %61 : vector<32x1xi32>
    %63 = arith.andi %58, %62 : vector<32x1xi1>
    %64 = arith.andi %54, %63 : vector<32x1xi1>
    %65 = arith.extui %64 : vector<32x1xi1> to vector<32x1xi32>
    %66 = arith.sitofp %65 : vector<32x1xi32> to vector<32x1xf32>
    %c0_i32_25 = arith.constant 0 : i32
    %67 = vector.broadcast %c0_i32_25 : i32 to vector<32x1xi32>
    %68 = arith.addi %2, %67 : vector<32x1xi32>
    %c0_i32_26 = arith.constant 0 : i32
    %69 = vector.broadcast %c0_i32_26 : i32 to vector<32x1xi32>
    %70 = arith.cmpi sge, %68, %69 : vector<32x1xi32>
    %c0_i32_27 = arith.constant 0 : i32
    %71 = vector.broadcast %c0_i32_27 : i32 to vector<32x1xi32>
    %72 = arith.addi %2, %71 : vector<32x1xi32>
    %c4_i32_28 = arith.constant 4 : i32
    %73 = vector.broadcast %c4_i32_28 : i32 to vector<32x1xi32>
    %74 = arith.cmpi slt, %72, %73 : vector<32x1xi32>
    %75 = arith.andi %70, %74 : vector<32x1xi1>
    %c-1_i32_29 = arith.constant -1 : i32
    %76 = vector.broadcast %c-1_i32_29 : i32 to vector<32x1xi32>
    %77 = arith.addi %3, %76 : vector<32x1xi32>
    %c0_i32_30 = arith.constant 0 : i32
    %78 = vector.broadcast %c0_i32_30 : i32 to vector<32x1xi32>
    %79 = arith.cmpi sge, %77, %78 : vector<32x1xi32>
    %c-1_i32_31 = arith.constant -1 : i32
    %80 = vector.broadcast %c-1_i32_31 : i32 to vector<32x1xi32>
    %81 = arith.addi %3, %80 : vector<32x1xi32>
    %c8_i32_32 = arith.constant 8 : i32
    %82 = vector.broadcast %c8_i32_32 : i32 to vector<32x1xi32>
    %83 = arith.cmpi slt, %81, %82 : vector<32x1xi32>
    %84 = arith.andi %79, %83 : vector<32x1xi1>
    %85 = arith.andi %75, %84 : vector<32x1xi1>
    %86 = arith.extui %85 : vector<32x1xi1> to vector<32x1xi32>
    %87 = arith.sitofp %86 : vector<32x1xi32> to vector<32x1xf32>
    %c0_i32_33 = arith.constant 0 : i32
    %88 = vector.broadcast %c0_i32_33 : i32 to vector<32x1xi32>
    %89 = arith.addi %2, %88 : vector<32x1xi32>
    %c0_i32_34 = arith.constant 0 : i32
    %90 = vector.broadcast %c0_i32_34 : i32 to vector<32x1xi32>
    %91 = arith.cmpi sge, %89, %90 : vector<32x1xi32>
    %c0_i32_35 = arith.constant 0 : i32
    %92 = vector.broadcast %c0_i32_35 : i32 to vector<32x1xi32>
    %93 = arith.addi %2, %92 : vector<32x1xi32>
    %c4_i32_36 = arith.constant 4 : i32
    %94 = vector.broadcast %c4_i32_36 : i32 to vector<32x1xi32>
    %95 = arith.cmpi slt, %93, %94 : vector<32x1xi32>
    %96 = arith.andi %91, %95 : vector<32x1xi1>
    %c1_i32_37 = arith.constant 1 : i32
    %97 = vector.broadcast %c1_i32_37 : i32 to vector<32x1xi32>
    %98 = arith.addi %3, %97 : vector<32x1xi32>
    %c0_i32_38 = arith.constant 0 : i32
    %99 = vector.broadcast %c0_i32_38 : i32 to vector<32x1xi32>
    %100 = arith.cmpi sge, %98, %99 : vector<32x1xi32>
    %c1_i32_39 = arith.constant 1 : i32
    %101 = vector.broadcast %c1_i32_39 : i32 to vector<32x1xi32>
    %102 = arith.addi %3, %101 : vector<32x1xi32>
    %c8_i32_40 = arith.constant 8 : i32
    %103 = vector.broadcast %c8_i32_40 : i32 to vector<32x1xi32>
    %104 = arith.cmpi slt, %102, %103 : vector<32x1xi32>
    %105 = arith.andi %100, %104 : vector<32x1xi1>
    %106 = arith.andi %96, %105 : vector<32x1xi1>
    %107 = arith.extui %106 : vector<32x1xi1> to vector<32x1xi32>
    %108 = arith.sitofp %107 : vector<32x1xi32> to vector<32x1xf32>
    %c1_i32_41 = arith.constant 1 : i32
    %109 = vector.broadcast %c1_i32_41 : i32 to vector<32x1xi32>
    %110 = arith.addi %2, %109 : vector<32x1xi32>
    %c0_i32_42 = arith.constant 0 : i32
    %111 = vector.broadcast %c0_i32_42 : i32 to vector<32x1xi32>
    %112 = arith.cmpi sge, %110, %111 : vector<32x1xi32>
    %c1_i32_43 = arith.constant 1 : i32
    %113 = vector.broadcast %c1_i32_43 : i32 to vector<32x1xi32>
    %114 = arith.addi %2, %113 : vector<32x1xi32>
    %c4_i32_44 = arith.constant 4 : i32
    %115 = vector.broadcast %c4_i32_44 : i32 to vector<32x1xi32>
    %116 = arith.cmpi slt, %114, %115 : vector<32x1xi32>
    %117 = arith.andi %112, %116 : vector<32x1xi1>
    %c-1_i32_45 = arith.constant -1 : i32
    %118 = vector.broadcast %c-1_i32_45 : i32 to vector<32x1xi32>
    %119 = arith.addi %3, %118 : vector<32x1xi32>
    %c0_i32_46 = arith.constant 0 : i32
    %120 = vector.broadcast %c0_i32_46 : i32 to vector<32x1xi32>
    %121 = arith.cmpi sge, %119, %120 : vector<32x1xi32>
    %c-1_i32_47 = arith.constant -1 : i32
    %122 = vector.broadcast %c-1_i32_47 : i32 to vector<32x1xi32>
    %123 = arith.addi %3, %122 : vector<32x1xi32>
    %c8_i32_48 = arith.constant 8 : i32
    %124 = vector.broadcast %c8_i32_48 : i32 to vector<32x1xi32>
    %125 = arith.cmpi slt, %123, %124 : vector<32x1xi32>
    %126 = arith.andi %121, %125 : vector<32x1xi1>
    %127 = arith.andi %117, %126 : vector<32x1xi1>
    %128 = arith.extui %127 : vector<32x1xi1> to vector<32x1xi32>
    %129 = arith.sitofp %128 : vector<32x1xi32> to vector<32x1xf32>
    %c1_i32_49 = arith.constant 1 : i32
    %130 = vector.broadcast %c1_i32_49 : i32 to vector<32x1xi32>
    %131 = arith.addi %2, %130 : vector<32x1xi32>
    %c0_i32_50 = arith.constant 0 : i32
    %132 = vector.broadcast %c0_i32_50 : i32 to vector<32x1xi32>
    %133 = arith.cmpi sge, %131, %132 : vector<32x1xi32>
    %c1_i32_51 = arith.constant 1 : i32
    %134 = vector.broadcast %c1_i32_51 : i32 to vector<32x1xi32>
    %135 = arith.addi %2, %134 : vector<32x1xi32>
    %c4_i32_52 = arith.constant 4 : i32
    %136 = vector.broadcast %c4_i32_52 : i32 to vector<32x1xi32>
    %137 = arith.cmpi slt, %135, %136 : vector<32x1xi32>
    %138 = arith.andi %133, %137 : vector<32x1xi1>
    %c0_i32_53 = arith.constant 0 : i32
    %139 = vector.broadcast %c0_i32_53 : i32 to vector<32x1xi32>
    %140 = arith.addi %3, %139 : vector<32x1xi32>
    %c0_i32_54 = arith.constant 0 : i32
    %141 = vector.broadcast %c0_i32_54 : i32 to vector<32x1xi32>
    %142 = arith.cmpi sge, %140, %141 : vector<32x1xi32>
    %c0_i32_55 = arith.constant 0 : i32
    %143 = vector.broadcast %c0_i32_55 : i32 to vector<32x1xi32>
    %144 = arith.addi %3, %143 : vector<32x1xi32>
    %c8_i32_56 = arith.constant 8 : i32
    %145 = vector.broadcast %c8_i32_56 : i32 to vector<32x1xi32>
    %146 = arith.cmpi slt, %144, %145 : vector<32x1xi32>
    %147 = arith.andi %142, %146 : vector<32x1xi1>
    %148 = arith.andi %138, %147 : vector<32x1xi1>
    %149 = arith.extui %148 : vector<32x1xi1> to vector<32x1xi32>
    %150 = arith.sitofp %149 : vector<32x1xi32> to vector<32x1xf32>
    %c1_i32_57 = arith.constant 1 : i32
    %151 = vector.broadcast %c1_i32_57 : i32 to vector<32x1xi32>
    %152 = arith.addi %2, %151 : vector<32x1xi32>
    %c0_i32_58 = arith.constant 0 : i32
    %153 = vector.broadcast %c0_i32_58 : i32 to vector<32x1xi32>
    %154 = arith.cmpi sge, %152, %153 : vector<32x1xi32>
    %c1_i32_59 = arith.constant 1 : i32
    %155 = vector.broadcast %c1_i32_59 : i32 to vector<32x1xi32>
    %156 = arith.addi %2, %155 : vector<32x1xi32>
    %c4_i32_60 = arith.constant 4 : i32
    %157 = vector.broadcast %c4_i32_60 : i32 to vector<32x1xi32>
    %158 = arith.cmpi slt, %156, %157 : vector<32x1xi32>
    %159 = arith.andi %154, %158 : vector<32x1xi1>
    %c1_i32_61 = arith.constant 1 : i32
    %160 = vector.broadcast %c1_i32_61 : i32 to vector<32x1xi32>
    %161 = arith.addi %3, %160 : vector<32x1xi32>
    %c0_i32_62 = arith.constant 0 : i32
    %162 = vector.broadcast %c0_i32_62 : i32 to vector<32x1xi32>
    %163 = arith.cmpi sge, %161, %162 : vector<32x1xi32>
    %c1_i32_63 = arith.constant 1 : i32
    %164 = vector.broadcast %c1_i32_63 : i32 to vector<32x1xi32>
    %165 = arith.addi %3, %164 : vector<32x1xi32>
    %c8_i32_64 = arith.constant 8 : i32
    %166 = vector.broadcast %c8_i32_64 : i32 to vector<32x1xi32>
    %167 = arith.cmpi slt, %165, %166 : vector<32x1xi32>
    %168 = arith.andi %163, %167 : vector<32x1xi1>
    %169 = arith.andi %159, %168 : vector<32x1xi1>
    %170 = arith.extui %169 : vector<32x1xi1> to vector<32x1xi32>
    %171 = arith.sitofp %170 : vector<32x1xi32> to vector<32x1xf32>
    %172 = arith.truncf %1 : vector<32x8xf32> to vector<32x8xbf16>
    %c0_65 = arith.constant 0 : index
    %c0_66 = arith.constant 0 : index
    %173 = vector.load %arg8[%c0_65, %c0_66] : memref<8x16xbf16, #tpu.memory_space<vmem>>, vector<8x16xbf16>
    %cst = arith.constant dense<0.000000e+00> : vector<32x16xf32>
    %174 = tpu.matmul %172, %173, %cst {dimension_numbers = #tpu.dot_dimension_numbers<[1], [0], [0], [1], [0, 0, 1, 1], [], []>} : vector<32x8xbf16>, vector<8x16xbf16>, vector<32x16xf32> -> vector<32x16xf32>
    %c0_67 = arith.constant 0 : index
    %c0_68 = arith.constant 0 : index
    %175 = vector.load %arg9[%c0_67, %c0_68] : memref<1x16xf32, #tpu.memory_space<vmem>>, vector<1x16xf32>
    %176 = vector.broadcast %175 : vector<1x16xf32> to vector<32x16xf32>
    %177 = arith.addf %174, %176 : vector<32x16xf32>
    %cst_69 = arith.constant 0.000000e+00 : f32
    %178 = vector.broadcast %cst_69 : f32 to vector<32x16xf32>
    %179 = arith.cmpf oge, %177, %178 : vector<32x16xf32>
    %cst_70 = arith.constant 2.000000e-01 : f32
    %180 = vector.broadcast %cst_70 : f32 to vector<32x16xf32>
    %181 = arith.mulf %180, %177 : vector<32x16xf32>
    %182 = arith.select %179, %177, %181 : vector<32x16xi1>, vector<32x16xf32>
    %183 = arith.truncf %182 : vector<32x16xf32> to vector<32x16xbf16>
    %c0_71 = arith.constant 0 : index
    %c0_72 = arith.constant 0 : index
    %184 = vector.load %arg3[%c0_71, %c0_72] : memref<32x32xbf16, #tpu.memory_space<vmem>>, vector<32x32xbf16>
    %c0_73 = arith.constant 0 : index
    %c0_74 = arith.constant 0 : index
    %c0_75 = arith.constant 0 : index
    %185 = vector.load %arg2[%c0_73, %c0_74, %c0_75] : memref<1x32x8xf32, #tpu.memory_space<vmem>>, vector<1x32x8xf32>
    %186 = vector.shape_cast %185 : vector<1x32x8xf32> to vector<32x8xf32>
    %187 = arith.truncf %186 : vector<32x8xf32> to vector<32x8xbf16>
    %cst_76 = arith.constant dense<0.000000e+00> : vector<32x8xf32>
    %188 = tpu.matmul %184, %187, %cst_76 {dimension_numbers = #tpu.dot_dimension_numbers<[1], [0], [0], [1], [0, 0, 1, 1], [], []>} : vector<32x32xbf16>, vector<32x8xbf16>, vector<32x8xf32> -> vector<32x8xf32>
    %189 = arith.truncf %188 : vector<32x8xf32> to vector<32x8xbf16>
    %cst_77 = arith.constant dense<0.000000e+00> : vector<32x8xf32>
    %190 = tpu.matmul %184, %189, %cst_77 {dimension_numbers = #tpu.dot_dimension_numbers<[1], [0], [0], [1], [0, 0, 1, 1], [], []>} : vector<32x32xbf16>, vector<32x8xbf16>, vector<32x8xf32> -> vector<32x8xf32>
    %c0_78 = arith.constant 0 : index
    %c0_79 = arith.constant 0 : index
    %c0_80 = arith.constant 0 : index
    %191 = vector.load %arg21[%c0_78, %c0_79, %c0_80] : memref<3x8x16xbf16, #tpu.memory_space<vmem>>, vector<1x8x16xbf16>
    %192 = vector.shape_cast %191 : vector<1x8x16xbf16> to vector<8x16xbf16>
    %cst_81 = arith.constant dense<0.000000e+00> : vector<32x16xf32>
    %193 = tpu.matmul %187, %192, %cst_81 {dimension_numbers = #tpu.dot_dimension_numbers<[1], [0], [0], [1], [0, 0, 1, 1], [], []>} : vector<32x8xbf16>, vector<8x16xbf16>, vector<32x16xf32> -> vector<32x16xf32>
    %194 = arith.truncf %188 : vector<32x8xf32> to vector<32x8xbf16>
    %c1 = arith.constant 1 : index
    %c0_82 = arith.constant 0 : index
    %c0_83 = arith.constant 0 : index
    %195 = vector.load %arg21[%c1, %c0_82, %c0_83] : memref<3x8x16xbf16, #tpu.memory_space<vmem>>, vector<1x8x16xbf16>
    %196 = vector.shape_cast %195 : vector<1x8x16xbf16> to vector<8x16xbf16>
    %cst_84 = arith.constant dense<0.000000e+00> : vector<32x16xf32>
    %197 = tpu.matmul %194, %196, %cst_84 {dimension_numbers = #tpu.dot_dimension_numbers<[1], [0], [0], [1], [0, 0, 1, 1], [], []>} : vector<32x8xbf16>, vector<8x16xbf16>, vector<32x16xf32> -> vector<32x16xf32>
    %198 = arith.addf %193, %197 : vector<32x16xf32>
    %199 = arith.truncf %190 : vector<32x8xf32> to vector<32x8xbf16>
    %c2 = arith.constant 2 : index
    %c0_85 = arith.constant 0 : index
    %c0_86 = arith.constant 0 : index
    %200 = vector.load %arg21[%c2, %c0_85, %c0_86] : memref<3x8x16xbf16, #tpu.memory_space<vmem>>, vector<1x8x16xbf16>
    %201 = vector.shape_cast %200 : vector<1x8x16xbf16> to vector<8x16xbf16>
    %cst_87 = arith.constant dense<0.000000e+00> : vector<32x16xf32>
    %202 = tpu.matmul %199, %201, %cst_87 {dimension_numbers = #tpu.dot_dimension_numbers<[1], [0], [0], [1], [0, 0, 1, 1], [], []>} : vector<32x8xbf16>, vector<8x16xbf16>, vector<32x16xf32> -> vector<32x16xf32>
    %203 = arith.addf %198, %202 : vector<32x16xf32>
    %c0_88 = arith.constant 0 : index
    %c0_89 = arith.constant 0 : index
    %204 = vector.load %arg22[%c0_88, %c0_89] : memref<1x16xf32, #tpu.memory_space<vmem>>, vector<1x16xf32>
    %205 = vector.broadcast %204 : vector<1x16xf32> to vector<32x16xf32>
    %206 = arith.addf %203, %205 : vector<32x16xf32>
    %c0_90 = arith.constant 0 : index
    %c0_91 = arith.constant 0 : index
    %207 = vector.load %arg18[%c0_90, %c0_91] : memref<16x16xbf16, #tpu.memory_space<vmem>>, vector<16x16xbf16>
    %cst_92 = arith.constant dense<0.000000e+00> : vector<32x16xf32>
    %208 = tpu.matmul %183, %207, %cst_92 {dimension_numbers = #tpu.dot_dimension_numbers<[1], [0], [0], [1], [0, 0, 1, 1], [], []>} : vector<32x16xbf16>, vector<16x16xbf16>, vector<32x16xf32> -> vector<32x16xf32>
    %c0_93 = arith.constant 0 : index
    %c0_94 = arith.constant 0 : index
    %209 = vector.load %arg4[%c0_93, %c0_94] : memref<32x32xf32, #tpu.memory_space<vmem>>, vector<32x32xf32>
    %c0_95 = arith.constant 0 : index
    %c0_96 = arith.constant 0 : index
    %210 = vector.load %arg5[%c0_95, %c0_96] : memref<32x32xf32, #tpu.memory_space<vmem>>, vector<32x32xf32>
    %c0_97 = arith.constant 0 : index
    %c0_98 = arith.constant 0 : index
    %c0_99 = arith.constant 0 : index
    %211 = vector.load %arg17[%c0_97, %c0_98, %c0_99] : memref<3x1x16xf32, #tpu.memory_space<vmem>>, vector<1x1x16xf32>
    %212 = vector.shape_cast %211 : vector<1x1x16xf32> to vector<1x16xf32>
    %213 = vector.broadcast %212 : vector<1x16xf32> to vector<32x16xf32>
    %214 = arith.addf %208, %213 : vector<32x16xf32>
    %c0_100 = arith.constant 0 : index
    %c0_101 = arith.constant 0 : index
    %c0_102 = arith.constant 0 : index
    %c0_103 = arith.constant 0 : index
    %215 = vector.load %arg10[%c0_100, %c0_101, %c0_102, %c0_103] : memref<3x2x16x2xbf16, #tpu.memory_space<vmem>>, vector<1x1x16x2xbf16>
    %216 = vector.shape_cast %215 : vector<1x1x16x2xbf16> to vector<16x2xbf16>
    %cst_104 = arith.constant dense<0.000000e+00> : vector<32x2xf32>
    %217 = tpu.matmul %183, %216, %cst_104 {dimension_numbers = #tpu.dot_dimension_numbers<[1], [0], [0], [1], [0, 0, 1, 1], [], []>} : vector<32x16xbf16>, vector<16x2xbf16>, vector<32x2xf32> -> vector<32x2xf32>
    %c0_105 = arith.constant 0 : index
    %c0_106 = arith.constant 0 : index
    %c0_107 = arith.constant 0 : index
    %c0_108 = arith.constant 0 : index
    %218 = vector.load %arg13[%c0_105, %c0_106, %c0_107, %c0_108] : memref<3x2x1x2xf32, #tpu.memory_space<vmem>>, vector<1x1x1x2xf32>
    %219 = vector.shape_cast %218 : vector<1x1x1x2xf32> to vector<1x2xf32>
    %220 = vector.broadcast %219 : vector<1x2xf32> to vector<32x2xf32>
    %221 = arith.addf %217, %220 : vector<32x2xf32>
    %c0_109 = arith.constant 0 : index
    %c0_110 = arith.constant 0 : index
    %c0_111 = arith.constant 0 : index
    %c0_112 = arith.constant 0 : index
    %222 = vector.load %arg11[%c0_109, %c0_110, %c0_111, %c0_112] : memref<3x2x16x2xbf16, #tpu.memory_space<vmem>>, vector<1x1x16x2xbf16>
    %223 = vector.shape_cast %222 : vector<1x1x16x2xbf16> to vector<16x2xbf16>
    %cst_113 = arith.constant dense<0.000000e+00> : vector<32x2xf32>
    %224 = tpu.matmul %183, %223, %cst_113 {dimension_numbers = #tpu.dot_dimension_numbers<[1], [0], [0], [1], [0, 0, 1, 1], [], []>} : vector<32x16xbf16>, vector<16x2xbf16>, vector<32x2xf32> -> vector<32x2xf32>
    %c0_114 = arith.constant 0 : index
    %c0_115 = arith.constant 0 : index
    %c0_116 = arith.constant 0 : index
    %c0_117 = arith.constant 0 : index
    %225 = vector.load %arg14[%c0_114, %c0_115, %c0_116, %c0_117] : memref<3x2x1x2xf32, #tpu.memory_space<vmem>>, vector<1x1x1x2xf32>
    %226 = vector.shape_cast %225 : vector<1x1x1x2xf32> to vector<1x2xf32>
    %227 = vector.broadcast %226 : vector<1x2xf32> to vector<32x2xf32>
    %228 = arith.addf %224, %227 : vector<32x2xf32>
    %c0_118 = arith.constant 0 : index
    %c0_119 = arith.constant 0 : index
    %c0_120 = arith.constant 0 : index
    %c0_121 = arith.constant 0 : index
    %229 = vector.load %arg12[%c0_118, %c0_119, %c0_120, %c0_121] : memref<3x2x16x2xbf16, #tpu.memory_space<vmem>>, vector<1x1x16x2xbf16>
    %230 = vector.shape_cast %229 : vector<1x1x16x2xbf16> to vector<16x2xbf16>
    %cst_122 = arith.constant dense<0.000000e+00> : vector<32x2xf32>
    %231 = tpu.matmul %183, %230, %cst_122 {dimension_numbers = #tpu.dot_dimension_numbers<[1], [0], [0], [1], [0, 0, 1, 1], [], []>} : vector<32x16xbf16>, vector<16x2xbf16>, vector<32x2xf32> -> vector<32x2xf32>
    %c0_123 = arith.constant 0 : index
    %c0_124 = arith.constant 0 : index
    %c0_125 = arith.constant 0 : index
    %c0_126 = arith.constant 0 : index
    %232 = vector.load %arg15[%c0_123, %c0_124, %c0_125, %c0_126] : memref<3x2x1x2xf32, #tpu.memory_space<vmem>>, vector<1x1x1x2xf32>
    %233 = vector.shape_cast %232 : vector<1x1x1x2xf32> to vector<1x2xf32>
    %234 = vector.broadcast %233 : vector<1x2xf32> to vector<32x2xf32>
    %235 = arith.addf %231, %234 : vector<32x2xf32>
    %236 = arith.truncf %221 : vector<32x2xf32> to vector<32x2xbf16>
    %237 = arith.truncf %228 : vector<32x2xf32> to vector<32x2xbf16>
    %cst_127 = arith.constant dense<0.000000e+00> : vector<32x32xf32>
    %238 = tpu.matmul %236, %237, %cst_127 {dimension_numbers = #tpu.dot_dimension_numbers<[1], [1], [0], [0], [0, 0, 1, 0], [], []>} : vector<32x2xbf16>, vector<32x2xbf16>, vector<32x32xf32> -> vector<32x32xf32>
    %239 = arith.addf %238, %209 : vector<32x32xf32>
    %cst_128 = arith.constant dense<0xFF800000> : vector<32xf32>
    %240 = vector.multi_reduction <maximumf>, %239, %cst_128 [1] : vector<32x32xf32> to vector<32xf32>
    %241 = vector.shape_cast %240 : vector<32xf32> to vector<32x1xf32>
    %242 = vector.broadcast %241 : vector<32x1xf32> to vector<32x32xf32>
    %243 = arith.subf %239, %242 : vector<32x32xf32>
    %244 = math.exp %243 : vector<32x32xf32>
    %cst_129 = arith.constant dense<0.000000e+00> : vector<32xf32>
    %245 = vector.multi_reduction <add>, %244, %cst_129 [1] : vector<32x32xf32> to vector<32xf32>
    %246 = vector.shape_cast %245 : vector<32xf32> to vector<32x1xf32>
    %247 = vector.broadcast %246 : vector<32x1xf32> to vector<32x32xf32>
    %248 = arith.divf %244, %247 : vector<32x32xf32>
    %249 = arith.truncf %248 : vector<32x32xf32> to vector<32x32xbf16>
    %250 = arith.truncf %235 : vector<32x2xf32> to vector<32x2xbf16>
    %cst_130 = arith.constant dense<0.000000e+00> : vector<32x2xf32>
    %251 = tpu.matmul %249, %250, %cst_130 {dimension_numbers = #tpu.dot_dimension_numbers<[1], [0], [0], [1], [0, 0, 1, 1], [], []>} : vector<32x32xbf16>, vector<32x2xbf16>, vector<32x2xf32> -> vector<32x2xf32>
    %252 = arith.truncf %251 : vector<32x2xf32> to vector<32x2xbf16>
    %c0_131 = arith.constant 0 : index
    %c0_132 = arith.constant 0 : index
    %c0_133 = arith.constant 0 : index
    %c0_134 = arith.constant 0 : index
    %253 = vector.load %arg16[%c0_131, %c0_132, %c0_133, %c0_134] : memref<3x2x2x16xbf16, #tpu.memory_space<vmem>>, vector<1x1x2x16xbf16>
    %254 = vector.shape_cast %253 : vector<1x1x2x16xbf16> to vector<2x16xbf16>
    %cst_135 = arith.constant dense<0.000000e+00> : vector<32x16xf32>
    %255 = tpu.matmul %252, %254, %cst_135 {dimension_numbers = #tpu.dot_dimension_numbers<[1], [0], [0], [1], [0, 0, 1, 1], [], []>} : vector<32x2xbf16>, vector<2x16xbf16>, vector<32x16xf32> -> vector<32x16xf32>
    %256 = arith.addf %214, %255 : vector<32x16xf32>
    %c0_136 = arith.constant 0 : index
    %c1_137 = arith.constant 1 : index
    %c0_138 = arith.constant 0 : index
    %c0_139 = arith.constant 0 : index
    %257 = vector.load %arg10[%c0_136, %c1_137, %c0_138, %c0_139] : memref<3x2x16x2xbf16, #tpu.memory_space<vmem>>, vector<1x1x16x2xbf16>
    %258 = vector.shape_cast %257 : vector<1x1x16x2xbf16> to vector<16x2xbf16>
    %cst_140 = arith.constant dense<0.000000e+00> : vector<32x2xf32>
    %259 = tpu.matmul %183, %258, %cst_140 {dimension_numbers = #tpu.dot_dimension_numbers<[1], [0], [0], [1], [0, 0, 1, 1], [], []>} : vector<32x16xbf16>, vector<16x2xbf16>, vector<32x2xf32> -> vector<32x2xf32>
    %c0_141 = arith.constant 0 : index
    %c1_142 = arith.constant 1 : index
    %c0_143 = arith.constant 0 : index
    %c0_144 = arith.constant 0 : index
    %260 = vector.load %arg13[%c0_141, %c1_142, %c0_143, %c0_144] : memref<3x2x1x2xf32, #tpu.memory_space<vmem>>, vector<1x1x1x2xf32>
    %261 = vector.shape_cast %260 : vector<1x1x1x2xf32> to vector<1x2xf32>
    %262 = vector.broadcast %261 : vector<1x2xf32> to vector<32x2xf32>
    %263 = arith.addf %259, %262 : vector<32x2xf32>
    %c0_145 = arith.constant 0 : index
    %c1_146 = arith.constant 1 : index
    %c0_147 = arith.constant 0 : index
    %c0_148 = arith.constant 0 : index
    %264 = vector.load %arg11[%c0_145, %c1_146, %c0_147, %c0_148] : memref<3x2x16x2xbf16, #tpu.memory_space<vmem>>, vector<1x1x16x2xbf16>
    %265 = vector.shape_cast %264 : vector<1x1x16x2xbf16> to vector<16x2xbf16>
    %cst_149 = arith.constant dense<0.000000e+00> : vector<32x2xf32>
    %266 = tpu.matmul %183, %265, %cst_149 {dimension_numbers = #tpu.dot_dimension_numbers<[1], [0], [0], [1], [0, 0, 1, 1], [], []>} : vector<32x16xbf16>, vector<16x2xbf16>, vector<32x2xf32> -> vector<32x2xf32>
    %c0_150 = arith.constant 0 : index
    %c1_151 = arith.constant 1 : index
    %c0_152 = arith.constant 0 : index
    %c0_153 = arith.constant 0 : index
    %267 = vector.load %arg14[%c0_150, %c1_151, %c0_152, %c0_153] : memref<3x2x1x2xf32, #tpu.memory_space<vmem>>, vector<1x1x1x2xf32>
    %268 = vector.shape_cast %267 : vector<1x1x1x2xf32> to vector<1x2xf32>
    %269 = vector.broadcast %268 : vector<1x2xf32> to vector<32x2xf32>
    %270 = arith.addf %266, %269 : vector<32x2xf32>
    %c0_154 = arith.constant 0 : index
    %c1_155 = arith.constant 1 : index
    %c0_156 = arith.constant 0 : index
    %c0_157 = arith.constant 0 : index
    %271 = vector.load %arg12[%c0_154, %c1_155, %c0_156, %c0_157] : memref<3x2x16x2xbf16, #tpu.memory_space<vmem>>, vector<1x1x16x2xbf16>
    %272 = vector.shape_cast %271 : vector<1x1x16x2xbf16> to vector<16x2xbf16>
    %cst_158 = arith.constant dense<0.000000e+00> : vector<32x2xf32>
    %273 = tpu.matmul %183, %272, %cst_158 {dimension_numbers = #tpu.dot_dimension_numbers<[1], [0], [0], [1], [0, 0, 1, 1], [], []>} : vector<32x16xbf16>, vector<16x2xbf16>, vector<32x2xf32> -> vector<32x2xf32>
    %c0_159 = arith.constant 0 : index
    %c1_160 = arith.constant 1 : index
    %c0_161 = arith.constant 0 : index
    %c0_162 = arith.constant 0 : index
    %274 = vector.load %arg15[%c0_159, %c1_160, %c0_161, %c0_162] : memref<3x2x1x2xf32, #tpu.memory_space<vmem>>, vector<1x1x1x2xf32>
    %275 = vector.shape_cast %274 : vector<1x1x1x2xf32> to vector<1x2xf32>
    %276 = vector.broadcast %275 : vector<1x2xf32> to vector<32x2xf32>
    %277 = arith.addf %273, %276 : vector<32x2xf32>
    %278 = arith.truncf %263 : vector<32x2xf32> to vector<32x2xbf16>
    %279 = arith.truncf %270 : vector<32x2xf32> to vector<32x2xbf16>
    %cst_163 = arith.constant dense<0.000000e+00> : vector<32x32xf32>
    %280 = tpu.matmul %278, %279, %cst_163 {dimension_numbers = #tpu.dot_dimension_numbers<[1], [1], [0], [0], [0, 0, 1, 0], [], []>} : vector<32x2xbf16>, vector<32x2xbf16>, vector<32x32xf32> -> vector<32x32xf32>
    %281 = arith.addf %280, %209 : vector<32x32xf32>
    %cst_164 = arith.constant dense<0xFF800000> : vector<32xf32>
    %282 = vector.multi_reduction <maximumf>, %281, %cst_164 [1] : vector<32x32xf32> to vector<32xf32>
    %283 = vector.shape_cast %282 : vector<32xf32> to vector<32x1xf32>
    %284 = vector.broadcast %283 : vector<32x1xf32> to vector<32x32xf32>
    %285 = arith.subf %281, %284 : vector<32x32xf32>
    %286 = math.exp %285 : vector<32x32xf32>
    %cst_165 = arith.constant dense<0.000000e+00> : vector<32xf32>
    %287 = vector.multi_reduction <add>, %286, %cst_165 [1] : vector<32x32xf32> to vector<32xf32>
    %288 = vector.shape_cast %287 : vector<32xf32> to vector<32x1xf32>
    %289 = vector.broadcast %288 : vector<32x1xf32> to vector<32x32xf32>
    %290 = arith.divf %286, %289 : vector<32x32xf32>
    %291 = arith.truncf %290 : vector<32x32xf32> to vector<32x32xbf16>
    %292 = arith.truncf %277 : vector<32x2xf32> to vector<32x2xbf16>
    %cst_166 = arith.constant dense<0.000000e+00> : vector<32x2xf32>
    %293 = tpu.matmul %291, %292, %cst_166 {dimension_numbers = #tpu.dot_dimension_numbers<[1], [0], [0], [1], [0, 0, 1, 1], [], []>} : vector<32x32xbf16>, vector<32x2xbf16>, vector<32x2xf32> -> vector<32x2xf32>
    %294 = arith.truncf %293 : vector<32x2xf32> to vector<32x2xbf16>
    %c0_167 = arith.constant 0 : index
    %c1_168 = arith.constant 1 : index
    %c0_169 = arith.constant 0 : index
    %c0_170 = arith.constant 0 : index
    %295 = vector.load %arg16[%c0_167, %c1_168, %c0_169, %c0_170] : memref<3x2x2x16xbf16, #tpu.memory_space<vmem>>, vector<1x1x2x16xbf16>
    %296 = vector.shape_cast %295 : vector<1x1x2x16xbf16> to vector<2x16xbf16>
    %cst_171 = arith.constant dense<0.000000e+00> : vector<32x16xf32>
    %297 = tpu.matmul %294, %296, %cst_171 {dimension_numbers = #tpu.dot_dimension_numbers<[1], [0], [0], [1], [0, 0, 1, 1], [], []>} : vector<32x2xbf16>, vector<2x16xbf16>, vector<32x16xf32> -> vector<32x16xf32>
    %298 = arith.addf %256, %297 : vector<32x16xf32>
    %c1_172 = arith.constant 1 : index
    %c0_173 = arith.constant 0 : index
    %c0_174 = arith.constant 0 : index
    %299 = vector.load %arg17[%c1_172, %c0_173, %c0_174] : memref<3x1x16xf32, #tpu.memory_space<vmem>>, vector<1x1x16xf32>
    %300 = vector.shape_cast %299 : vector<1x1x16xf32> to vector<1x16xf32>
    %301 = vector.broadcast %300 : vector<1x16xf32> to vector<32x16xf32>
    %302 = arith.addf %298, %301 : vector<32x16xf32>
    %c1_175 = arith.constant 1 : index
    %c0_176 = arith.constant 0 : index
    %c0_177 = arith.constant 0 : index
    %c0_178 = arith.constant 0 : index
    %303 = vector.load %arg10[%c1_175, %c0_176, %c0_177, %c0_178] : memref<3x2x16x2xbf16, #tpu.memory_space<vmem>>, vector<1x1x16x2xbf16>
    %304 = vector.shape_cast %303 : vector<1x1x16x2xbf16> to vector<16x2xbf16>
    %cst_179 = arith.constant dense<0.000000e+00> : vector<32x2xf32>
    %305 = tpu.matmul %183, %304, %cst_179 {dimension_numbers = #tpu.dot_dimension_numbers<[1], [0], [0], [1], [0, 0, 1, 1], [], []>} : vector<32x16xbf16>, vector<16x2xbf16>, vector<32x2xf32> -> vector<32x2xf32>
    %c1_180 = arith.constant 1 : index
    %c0_181 = arith.constant 0 : index
    %c0_182 = arith.constant 0 : index
    %c0_183 = arith.constant 0 : index
    %306 = vector.load %arg13[%c1_180, %c0_181, %c0_182, %c0_183] : memref<3x2x1x2xf32, #tpu.memory_space<vmem>>, vector<1x1x1x2xf32>
    %307 = vector.shape_cast %306 : vector<1x1x1x2xf32> to vector<1x2xf32>
    %308 = vector.broadcast %307 : vector<1x2xf32> to vector<32x2xf32>
    %309 = arith.addf %305, %308 : vector<32x2xf32>
    %c1_184 = arith.constant 1 : index
    %c0_185 = arith.constant 0 : index
    %c0_186 = arith.constant 0 : index
    %c0_187 = arith.constant 0 : index
    %310 = vector.load %arg11[%c1_184, %c0_185, %c0_186, %c0_187] : memref<3x2x16x2xbf16, #tpu.memory_space<vmem>>, vector<1x1x16x2xbf16>
    %311 = vector.shape_cast %310 : vector<1x1x16x2xbf16> to vector<16x2xbf16>
    %cst_188 = arith.constant dense<0.000000e+00> : vector<32x2xf32>
    %312 = tpu.matmul %183, %311, %cst_188 {dimension_numbers = #tpu.dot_dimension_numbers<[1], [0], [0], [1], [0, 0, 1, 1], [], []>} : vector<32x16xbf16>, vector<16x2xbf16>, vector<32x2xf32> -> vector<32x2xf32>
    %c1_189 = arith.constant 1 : index
    %c0_190 = arith.constant 0 : index
    %c0_191 = arith.constant 0 : index
    %c0_192 = arith.constant 0 : index
    %313 = vector.load %arg14[%c1_189, %c0_190, %c0_191, %c0_192] : memref<3x2x1x2xf32, #tpu.memory_space<vmem>>, vector<1x1x1x2xf32>
    %314 = vector.shape_cast %313 : vector<1x1x1x2xf32> to vector<1x2xf32>
    %315 = vector.broadcast %314 : vector<1x2xf32> to vector<32x2xf32>
    %316 = arith.addf %312, %315 : vector<32x2xf32>
    %c1_193 = arith.constant 1 : index
    %c0_194 = arith.constant 0 : index
    %c0_195 = arith.constant 0 : index
    %c0_196 = arith.constant 0 : index
    %317 = vector.load %arg12[%c1_193, %c0_194, %c0_195, %c0_196] : memref<3x2x16x2xbf16, #tpu.memory_space<vmem>>, vector<1x1x16x2xbf16>
    %318 = vector.shape_cast %317 : vector<1x1x16x2xbf16> to vector<16x2xbf16>
    %cst_197 = arith.constant dense<0.000000e+00> : vector<32x2xf32>
    %319 = tpu.matmul %183, %318, %cst_197 {dimension_numbers = #tpu.dot_dimension_numbers<[1], [0], [0], [1], [0, 0, 1, 1], [], []>} : vector<32x16xbf16>, vector<16x2xbf16>, vector<32x2xf32> -> vector<32x2xf32>
    %c1_198 = arith.constant 1 : index
    %c0_199 = arith.constant 0 : index
    %c0_200 = arith.constant 0 : index
    %c0_201 = arith.constant 0 : index
    %320 = vector.load %arg15[%c1_198, %c0_199, %c0_200, %c0_201] : memref<3x2x1x2xf32, #tpu.memory_space<vmem>>, vector<1x1x1x2xf32>
    %321 = vector.shape_cast %320 : vector<1x1x1x2xf32> to vector<1x2xf32>
    %322 = vector.broadcast %321 : vector<1x2xf32> to vector<32x2xf32>
    %323 = arith.addf %319, %322 : vector<32x2xf32>
    %324 = arith.truncf %309 : vector<32x2xf32> to vector<32x2xbf16>
    %325 = arith.truncf %316 : vector<32x2xf32> to vector<32x2xbf16>
    %cst_202 = arith.constant dense<0.000000e+00> : vector<32x32xf32>
    %326 = tpu.matmul %324, %325, %cst_202 {dimension_numbers = #tpu.dot_dimension_numbers<[1], [1], [0], [0], [0, 0, 1, 0], [], []>} : vector<32x2xbf16>, vector<32x2xbf16>, vector<32x32xf32> -> vector<32x32xf32>
    %327 = arith.addf %326, %210 : vector<32x32xf32>
    %cst_203 = arith.constant dense<0xFF800000> : vector<32xf32>
    %328 = vector.multi_reduction <maximumf>, %327, %cst_203 [1] : vector<32x32xf32> to vector<32xf32>
    %329 = vector.shape_cast %328 : vector<32xf32> to vector<32x1xf32>
    %330 = vector.broadcast %329 : vector<32x1xf32> to vector<32x32xf32>
    %331 = arith.subf %327, %330 : vector<32x32xf32>
    %332 = math.exp %331 : vector<32x32xf32>
    %cst_204 = arith.constant dense<0.000000e+00> : vector<32xf32>
    %333 = vector.multi_reduction <add>, %332, %cst_204 [1] : vector<32x32xf32> to vector<32xf32>
    %334 = vector.shape_cast %333 : vector<32xf32> to vector<32x1xf32>
    %335 = vector.broadcast %334 : vector<32x1xf32> to vector<32x32xf32>
    %336 = arith.divf %332, %335 : vector<32x32xf32>
    %337 = arith.truncf %336 : vector<32x32xf32> to vector<32x32xbf16>
    %338 = arith.truncf %323 : vector<32x2xf32> to vector<32x2xbf16>
    %cst_205 = arith.constant dense<0.000000e+00> : vector<32x2xf32>
    %339 = tpu.matmul %337, %338, %cst_205 {dimension_numbers = #tpu.dot_dimension_numbers<[1], [0], [0], [1], [0, 0, 1, 1], [], []>} : vector<32x32xbf16>, vector<32x2xbf16>, vector<32x2xf32> -> vector<32x2xf32>
    %340 = arith.truncf %339 : vector<32x2xf32> to vector<32x2xbf16>
    %c1_206 = arith.constant 1 : index
    %c0_207 = arith.constant 0 : index
    %c0_208 = arith.constant 0 : index
    %c0_209 = arith.constant 0 : index
    %341 = vector.load %arg16[%c1_206, %c0_207, %c0_208, %c0_209] : memref<3x2x2x16xbf16, #tpu.memory_space<vmem>>, vector<1x1x2x16xbf16>
    %342 = vector.shape_cast %341 : vector<1x1x2x16xbf16> to vector<2x16xbf16>
    %cst_210 = arith.constant dense<0.000000e+00> : vector<32x16xf32>
    %343 = tpu.matmul %340, %342, %cst_210 {dimension_numbers = #tpu.dot_dimension_numbers<[1], [0], [0], [1], [0, 0, 1, 1], [], []>} : vector<32x2xbf16>, vector<2x16xbf16>, vector<32x16xf32> -> vector<32x16xf32>
    %344 = arith.addf %302, %343 : vector<32x16xf32>
    %c1_211 = arith.constant 1 : index
    %c1_212 = arith.constant 1 : index
    %c0_213 = arith.constant 0 : index
    %c0_214 = arith.constant 0 : index
    %345 = vector.load %arg10[%c1_211, %c1_212, %c0_213, %c0_214] : memref<3x2x16x2xbf16, #tpu.memory_space<vmem>>, vector<1x1x16x2xbf16>
    %346 = vector.shape_cast %345 : vector<1x1x16x2xbf16> to vector<16x2xbf16>
    %cst_215 = arith.constant dense<0.000000e+00> : vector<32x2xf32>
    %347 = tpu.matmul %183, %346, %cst_215 {dimension_numbers = #tpu.dot_dimension_numbers<[1], [0], [0], [1], [0, 0, 1, 1], [], []>} : vector<32x16xbf16>, vector<16x2xbf16>, vector<32x2xf32> -> vector<32x2xf32>
    %c1_216 = arith.constant 1 : index
    %c1_217 = arith.constant 1 : index
    %c0_218 = arith.constant 0 : index
    %c0_219 = arith.constant 0 : index
    %348 = vector.load %arg13[%c1_216, %c1_217, %c0_218, %c0_219] : memref<3x2x1x2xf32, #tpu.memory_space<vmem>>, vector<1x1x1x2xf32>
    %349 = vector.shape_cast %348 : vector<1x1x1x2xf32> to vector<1x2xf32>
    %350 = vector.broadcast %349 : vector<1x2xf32> to vector<32x2xf32>
    %351 = arith.addf %347, %350 : vector<32x2xf32>
    %c1_220 = arith.constant 1 : index
    %c1_221 = arith.constant 1 : index
    %c0_222 = arith.constant 0 : index
    %c0_223 = arith.constant 0 : index
    %352 = vector.load %arg11[%c1_220, %c1_221, %c0_222, %c0_223] : memref<3x2x16x2xbf16, #tpu.memory_space<vmem>>, vector<1x1x16x2xbf16>
    %353 = vector.shape_cast %352 : vector<1x1x16x2xbf16> to vector<16x2xbf16>
    %cst_224 = arith.constant dense<0.000000e+00> : vector<32x2xf32>
    %354 = tpu.matmul %183, %353, %cst_224 {dimension_numbers = #tpu.dot_dimension_numbers<[1], [0], [0], [1], [0, 0, 1, 1], [], []>} : vector<32x16xbf16>, vector<16x2xbf16>, vector<32x2xf32> -> vector<32x2xf32>
    %c1_225 = arith.constant 1 : index
    %c1_226 = arith.constant 1 : index
    %c0_227 = arith.constant 0 : index
    %c0_228 = arith.constant 0 : index
    %355 = vector.load %arg14[%c1_225, %c1_226, %c0_227, %c0_228] : memref<3x2x1x2xf32, #tpu.memory_space<vmem>>, vector<1x1x1x2xf32>
    %356 = vector.shape_cast %355 : vector<1x1x1x2xf32> to vector<1x2xf32>
    %357 = vector.broadcast %356 : vector<1x2xf32> to vector<32x2xf32>
    %358 = arith.addf %354, %357 : vector<32x2xf32>
    %c1_229 = arith.constant 1 : index
    %c1_230 = arith.constant 1 : index
    %c0_231 = arith.constant 0 : index
    %c0_232 = arith.constant 0 : index
    %359 = vector.load %arg12[%c1_229, %c1_230, %c0_231, %c0_232] : memref<3x2x16x2xbf16, #tpu.memory_space<vmem>>, vector<1x1x16x2xbf16>
    %360 = vector.shape_cast %359 : vector<1x1x16x2xbf16> to vector<16x2xbf16>
    %cst_233 = arith.constant dense<0.000000e+00> : vector<32x2xf32>
    %361 = tpu.matmul %183, %360, %cst_233 {dimension_numbers = #tpu.dot_dimension_numbers<[1], [0], [0], [1], [0, 0, 1, 1], [], []>} : vector<32x16xbf16>, vector<16x2xbf16>, vector<32x2xf32> -> vector<32x2xf32>
    %c1_234 = arith.constant 1 : index
    %c1_235 = arith.constant 1 : index
    %c0_236 = arith.constant 0 : index
    %c0_237 = arith.constant 0 : index
    %362 = vector.load %arg15[%c1_234, %c1_235, %c0_236, %c0_237] : memref<3x2x1x2xf32, #tpu.memory_space<vmem>>, vector<1x1x1x2xf32>
    %363 = vector.shape_cast %362 : vector<1x1x1x2xf32> to vector<1x2xf32>
    %364 = vector.broadcast %363 : vector<1x2xf32> to vector<32x2xf32>
    %365 = arith.addf %361, %364 : vector<32x2xf32>
    %366 = arith.truncf %351 : vector<32x2xf32> to vector<32x2xbf16>
    %367 = arith.truncf %358 : vector<32x2xf32> to vector<32x2xbf16>
    %cst_238 = arith.constant dense<0.000000e+00> : vector<32x32xf32>
    %368 = tpu.matmul %366, %367, %cst_238 {dimension_numbers = #tpu.dot_dimension_numbers<[1], [1], [0], [0], [0, 0, 1, 0], [], []>} : vector<32x2xbf16>, vector<32x2xbf16>, vector<32x32xf32> -> vector<32x32xf32>
    %369 = arith.addf %368, %210 : vector<32x32xf32>
    %cst_239 = arith.constant dense<0xFF800000> : vector<32xf32>
    %370 = vector.multi_reduction <maximumf>, %369, %cst_239 [1] : vector<32x32xf32> to vector<32xf32>
    %371 = vector.shape_cast %370 : vector<32xf32> to vector<32x1xf32>
    %372 = vector.broadcast %371 : vector<32x1xf32> to vector<32x32xf32>
    %373 = arith.subf %369, %372 : vector<32x32xf32>
    %374 = math.exp %373 : vector<32x32xf32>
    %cst_240 = arith.constant dense<0.000000e+00> : vector<32xf32>
    %375 = vector.multi_reduction <add>, %374, %cst_240 [1] : vector<32x32xf32> to vector<32xf32>
    %376 = vector.shape_cast %375 : vector<32xf32> to vector<32x1xf32>
    %377 = vector.broadcast %376 : vector<32x1xf32> to vector<32x32xf32>
    %378 = arith.divf %374, %377 : vector<32x32xf32>
    %379 = arith.truncf %378 : vector<32x32xf32> to vector<32x32xbf16>
    %380 = arith.truncf %365 : vector<32x2xf32> to vector<32x2xbf16>
    %cst_241 = arith.constant dense<0.000000e+00> : vector<32x2xf32>
    %381 = tpu.matmul %379, %380, %cst_241 {dimension_numbers = #tpu.dot_dimension_numbers<[1], [0], [0], [1], [0, 0, 1, 1], [], []>} : vector<32x32xbf16>, vector<32x2xbf16>, vector<32x2xf32> -> vector<32x2xf32>
    %382 = arith.truncf %381 : vector<32x2xf32> to vector<32x2xbf16>
    %c1_242 = arith.constant 1 : index
    %c1_243 = arith.constant 1 : index
    %c0_244 = arith.constant 0 : index
    %c0_245 = arith.constant 0 : index
    %383 = vector.load %arg16[%c1_242, %c1_243, %c0_244, %c0_245] : memref<3x2x2x16xbf16, #tpu.memory_space<vmem>>, vector<1x1x2x16xbf16>
    %384 = vector.shape_cast %383 : vector<1x1x2x16xbf16> to vector<2x16xbf16>
    %cst_246 = arith.constant dense<0.000000e+00> : vector<32x16xf32>
    %385 = tpu.matmul %382, %384, %cst_246 {dimension_numbers = #tpu.dot_dimension_numbers<[1], [0], [0], [1], [0, 0, 1, 1], [], []>} : vector<32x2xbf16>, vector<2x16xbf16>, vector<32x16xf32> -> vector<32x16xf32>
    %386 = arith.addf %344, %385 : vector<32x16xf32>
    %c2_247 = arith.constant 2 : index
    %c0_248 = arith.constant 0 : index
    %c0_249 = arith.constant 0 : index
    %387 = vector.load %arg17[%c2_247, %c0_248, %c0_249] : memref<3x1x16xf32, #tpu.memory_space<vmem>>, vector<1x1x16xf32>
    %388 = vector.shape_cast %387 : vector<1x1x16xf32> to vector<1x16xf32>
    %389 = vector.broadcast %388 : vector<1x16xf32> to vector<32x16xf32>
    %390 = arith.addf %386, %389 : vector<32x16xf32>
    %c2_250 = arith.constant 2 : index
    %c0_251 = arith.constant 0 : index
    %c0_252 = arith.constant 0 : index
    %c0_253 = arith.constant 0 : index
    %391 = vector.load %arg10[%c2_250, %c0_251, %c0_252, %c0_253] : memref<3x2x16x2xbf16, #tpu.memory_space<vmem>>, vector<1x1x16x2xbf16>
    %392 = vector.shape_cast %391 : vector<1x1x16x2xbf16> to vector<16x2xbf16>
    %cst_254 = arith.constant dense<0.000000e+00> : vector<32x2xf32>
    %393 = tpu.matmul %183, %392, %cst_254 {dimension_numbers = #tpu.dot_dimension_numbers<[1], [0], [0], [1], [0, 0, 1, 1], [], []>} : vector<32x16xbf16>, vector<16x2xbf16>, vector<32x2xf32> -> vector<32x2xf32>
    %c2_255 = arith.constant 2 : index
    %c0_256 = arith.constant 0 : index
    %c0_257 = arith.constant 0 : index
    %c0_258 = arith.constant 0 : index
    %394 = vector.load %arg13[%c2_255, %c0_256, %c0_257, %c0_258] : memref<3x2x1x2xf32, #tpu.memory_space<vmem>>, vector<1x1x1x2xf32>
    %395 = vector.shape_cast %394 : vector<1x1x1x2xf32> to vector<1x2xf32>
    %396 = vector.broadcast %395 : vector<1x2xf32> to vector<32x2xf32>
    %397 = arith.addf %393, %396 : vector<32x2xf32>
    %c2_259 = arith.constant 2 : index
    %c0_260 = arith.constant 0 : index
    %c0_261 = arith.constant 0 : index
    %c0_262 = arith.constant 0 : index
    %398 = vector.load %arg11[%c2_259, %c0_260, %c0_261, %c0_262] : memref<3x2x16x2xbf16, #tpu.memory_space<vmem>>, vector<1x1x16x2xbf16>
    %399 = vector.shape_cast %398 : vector<1x1x16x2xbf16> to vector<16x2xbf16>
    %cst_263 = arith.constant dense<0.000000e+00> : vector<32x2xf32>
    %400 = tpu.matmul %183, %399, %cst_263 {dimension_numbers = #tpu.dot_dimension_numbers<[1], [0], [0], [1], [0, 0, 1, 1], [], []>} : vector<32x16xbf16>, vector<16x2xbf16>, vector<32x2xf32> -> vector<32x2xf32>
    %c2_264 = arith.constant 2 : index
    %c0_265 = arith.constant 0 : index
    %c0_266 = arith.constant 0 : index
    %c0_267 = arith.constant 0 : index
    %401 = vector.load %arg14[%c2_264, %c0_265, %c0_266, %c0_267] : memref<3x2x1x2xf32, #tpu.memory_space<vmem>>, vector<1x1x1x2xf32>
    %402 = vector.shape_cast %401 : vector<1x1x1x2xf32> to vector<1x2xf32>
    %403 = vector.broadcast %402 : vector<1x2xf32> to vector<32x2xf32>
    %404 = arith.addf %400, %403 : vector<32x2xf32>
    %c2_268 = arith.constant 2 : index
    %c0_269 = arith.constant 0 : index
    %c0_270 = arith.constant 0 : index
    %c0_271 = arith.constant 0 : index
    %405 = vector.load %arg12[%c2_268, %c0_269, %c0_270, %c0_271] : memref<3x2x16x2xbf16, #tpu.memory_space<vmem>>, vector<1x1x16x2xbf16>
    %406 = vector.shape_cast %405 : vector<1x1x16x2xbf16> to vector<16x2xbf16>
    %cst_272 = arith.constant dense<0.000000e+00> : vector<32x2xf32>
    %407 = tpu.matmul %183, %406, %cst_272 {dimension_numbers = #tpu.dot_dimension_numbers<[1], [0], [0], [1], [0, 0, 1, 1], [], []>} : vector<32x16xbf16>, vector<16x2xbf16>, vector<32x2xf32> -> vector<32x2xf32>
    %c2_273 = arith.constant 2 : index
    %c0_274 = arith.constant 0 : index
    %c0_275 = arith.constant 0 : index
    %c0_276 = arith.constant 0 : index
    %408 = vector.load %arg15[%c2_273, %c0_274, %c0_275, %c0_276] : memref<3x2x1x2xf32, #tpu.memory_space<vmem>>, vector<1x1x1x2xf32>
    %409 = vector.shape_cast %408 : vector<1x1x1x2xf32> to vector<1x2xf32>
    %410 = vector.broadcast %409 : vector<1x2xf32> to vector<32x2xf32>
    %411 = arith.addf %407, %410 : vector<32x2xf32>
    %412 = arith.truncf %397 : vector<32x2xf32> to vector<32x2xbf16>
    %413 = arith.truncf %404 : vector<32x2xf32> to vector<32x2xbf16>
    %cst_277 = arith.constant dense<0.000000e+00> : vector<32x32xf32>
    %414 = tpu.matmul %412, %413, %cst_277 {dimension_numbers = #tpu.dot_dimension_numbers<[1], [1], [0], [0], [0, 0, 1, 0], [], []>} : vector<32x2xbf16>, vector<32x2xbf16>, vector<32x32xf32> -> vector<32x32xf32>
    %cst_278 = arith.constant dense<0xFF800000> : vector<32xf32>
    %415 = vector.multi_reduction <maximumf>, %414, %cst_278 [1] : vector<32x32xf32> to vector<32xf32>
    %416 = vector.shape_cast %415 : vector<32xf32> to vector<32x1xf32>
    %417 = vector.broadcast %416 : vector<32x1xf32> to vector<32x32xf32>
    %418 = arith.subf %414, %417 : vector<32x32xf32>
    %419 = math.exp %418 : vector<32x32xf32>
    %cst_279 = arith.constant dense<0.000000e+00> : vector<32xf32>
    %420 = vector.multi_reduction <add>, %419, %cst_279 [1] : vector<32x32xf32> to vector<32xf32>
    %421 = vector.shape_cast %420 : vector<32xf32> to vector<32x1xf32>
    %422 = vector.broadcast %421 : vector<32x1xf32> to vector<32x32xf32>
    %423 = arith.divf %419, %422 : vector<32x32xf32>
    %424 = arith.truncf %423 : vector<32x32xf32> to vector<32x32xbf16>
    %425 = arith.truncf %411 : vector<32x2xf32> to vector<32x2xbf16>
    %cst_280 = arith.constant dense<0.000000e+00> : vector<32x2xf32>
    %426 = tpu.matmul %424, %425, %cst_280 {dimension_numbers = #tpu.dot_dimension_numbers<[1], [0], [0], [1], [0, 0, 1, 1], [], []>} : vector<32x32xbf16>, vector<32x2xbf16>, vector<32x2xf32> -> vector<32x2xf32>
    %427 = arith.truncf %426 : vector<32x2xf32> to vector<32x2xbf16>
    %c2_281 = arith.constant 2 : index
    %c0_282 = arith.constant 0 : index
    %c0_283 = arith.constant 0 : index
    %c0_284 = arith.constant 0 : index
    %428 = vector.load %arg16[%c2_281, %c0_282, %c0_283, %c0_284] : memref<3x2x2x16xbf16, #tpu.memory_space<vmem>>, vector<1x1x2x16xbf16>
    %429 = vector.shape_cast %428 : vector<1x1x2x16xbf16> to vector<2x16xbf16>
    %cst_285 = arith.constant dense<0.000000e+00> : vector<32x16xf32>
    %430 = tpu.matmul %427, %429, %cst_285 {dimension_numbers = #tpu.dot_dimension_numbers<[1], [0], [0], [1], [0, 0, 1, 1], [], []>} : vector<32x2xbf16>, vector<2x16xbf16>, vector<32x16xf32> -> vector<32x16xf32>
    %431 = arith.addf %390, %430 : vector<32x16xf32>
    %c2_286 = arith.constant 2 : index
    %c1_287 = arith.constant 1 : index
    %c0_288 = arith.constant 0 : index
    %c0_289 = arith.constant 0 : index
    %432 = vector.load %arg10[%c2_286, %c1_287, %c0_288, %c0_289] : memref<3x2x16x2xbf16, #tpu.memory_space<vmem>>, vector<1x1x16x2xbf16>
    %433 = vector.shape_cast %432 : vector<1x1x16x2xbf16> to vector<16x2xbf16>
    %cst_290 = arith.constant dense<0.000000e+00> : vector<32x2xf32>
    %434 = tpu.matmul %183, %433, %cst_290 {dimension_numbers = #tpu.dot_dimension_numbers<[1], [0], [0], [1], [0, 0, 1, 1], [], []>} : vector<32x16xbf16>, vector<16x2xbf16>, vector<32x2xf32> -> vector<32x2xf32>
    %c2_291 = arith.constant 2 : index
    %c1_292 = arith.constant 1 : index
    %c0_293 = arith.constant 0 : index
    %c0_294 = arith.constant 0 : index
    %435 = vector.load %arg13[%c2_291, %c1_292, %c0_293, %c0_294] : memref<3x2x1x2xf32, #tpu.memory_space<vmem>>, vector<1x1x1x2xf32>
    %436 = vector.shape_cast %435 : vector<1x1x1x2xf32> to vector<1x2xf32>
    %437 = vector.broadcast %436 : vector<1x2xf32> to vector<32x2xf32>
    %438 = arith.addf %434, %437 : vector<32x2xf32>
    %c2_295 = arith.constant 2 : index
    %c1_296 = arith.constant 1 : index
    %c0_297 = arith.constant 0 : index
    %c0_298 = arith.constant 0 : index
    %439 = vector.load %arg11[%c2_295, %c1_296, %c0_297, %c0_298] : memref<3x2x16x2xbf16, #tpu.memory_space<vmem>>, vector<1x1x16x2xbf16>
    %440 = vector.shape_cast %439 : vector<1x1x16x2xbf16> to vector<16x2xbf16>
    %cst_299 = arith.constant dense<0.000000e+00> : vector<32x2xf32>
    %441 = tpu.matmul %183, %440, %cst_299 {dimension_numbers = #tpu.dot_dimension_numbers<[1], [0], [0], [1], [0, 0, 1, 1], [], []>} : vector<32x16xbf16>, vector<16x2xbf16>, vector<32x2xf32> -> vector<32x2xf32>
    %c2_300 = arith.constant 2 : index
    %c1_301 = arith.constant 1 : index
    %c0_302 = arith.constant 0 : index
    %c0_303 = arith.constant 0 : index
    %442 = vector.load %arg14[%c2_300, %c1_301, %c0_302, %c0_303] : memref<3x2x1x2xf32, #tpu.memory_space<vmem>>, vector<1x1x1x2xf32>
    %443 = vector.shape_cast %442 : vector<1x1x1x2xf32> to vector<1x2xf32>
    %444 = vector.broadcast %443 : vector<1x2xf32> to vector<32x2xf32>
    %445 = arith.addf %441, %444 : vector<32x2xf32>
    %c2_304 = arith.constant 2 : index
    %c1_305 = arith.constant 1 : index
    %c0_306 = arith.constant 0 : index
    %c0_307 = arith.constant 0 : index
    %446 = vector.load %arg12[%c2_304, %c1_305, %c0_306, %c0_307] : memref<3x2x16x2xbf16, #tpu.memory_space<vmem>>, vector<1x1x16x2xbf16>
    %447 = vector.shape_cast %446 : vector<1x1x16x2xbf16> to vector<16x2xbf16>
    %cst_308 = arith.constant dense<0.000000e+00> : vector<32x2xf32>
    %448 = tpu.matmul %183, %447, %cst_308 {dimension_numbers = #tpu.dot_dimension_numbers<[1], [0], [0], [1], [0, 0, 1, 1], [], []>} : vector<32x16xbf16>, vector<16x2xbf16>, vector<32x2xf32> -> vector<32x2xf32>
    %c2_309 = arith.constant 2 : index
    %c1_310 = arith.constant 1 : index
    %c0_311 = arith.constant 0 : index
    %c0_312 = arith.constant 0 : index
    %449 = vector.load %arg15[%c2_309, %c1_310, %c0_311, %c0_312] : memref<3x2x1x2xf32, #tpu.memory_space<vmem>>, vector<1x1x1x2xf32>
    %450 = vector.shape_cast %449 : vector<1x1x1x2xf32> to vector<1x2xf32>
    %451 = vector.broadcast %450 : vector<1x2xf32> to vector<32x2xf32>
    %452 = arith.addf %448, %451 : vector<32x2xf32>
    %453 = arith.truncf %438 : vector<32x2xf32> to vector<32x2xbf16>
    %454 = arith.truncf %445 : vector<32x2xf32> to vector<32x2xbf16>
    %cst_313 = arith.constant dense<0.000000e+00> : vector<32x32xf32>
    %455 = tpu.matmul %453, %454, %cst_313 {dimension_numbers = #tpu.dot_dimension_numbers<[1], [1], [0], [0], [0, 0, 1, 0], [], []>} : vector<32x2xbf16>, vector<32x2xbf16>, vector<32x32xf32> -> vector<32x32xf32>
    %cst_314 = arith.constant dense<0xFF800000> : vector<32xf32>
    %456 = vector.multi_reduction <maximumf>, %455, %cst_314 [1] : vector<32x32xf32> to vector<32xf32>
    %457 = vector.shape_cast %456 : vector<32xf32> to vector<32x1xf32>
    %458 = vector.broadcast %457 : vector<32x1xf32> to vector<32x32xf32>
    %459 = arith.subf %455, %458 : vector<32x32xf32>
    %460 = math.exp %459 : vector<32x32xf32>
    %cst_315 = arith.constant dense<0.000000e+00> : vector<32xf32>
    %461 = vector.multi_reduction <add>, %460, %cst_315 [1] : vector<32x32xf32> to vector<32xf32>
    %462 = vector.shape_cast %461 : vector<32xf32> to vector<32x1xf32>
    %463 = vector.broadcast %462 : vector<32x1xf32> to vector<32x32xf32>
    %464 = arith.divf %460, %463 : vector<32x32xf32>
    %465 = arith.truncf %464 : vector<32x32xf32> to vector<32x32xbf16>
    %466 = arith.truncf %452 : vector<32x2xf32> to vector<32x2xbf16>
    %cst_316 = arith.constant dense<0.000000e+00> : vector<32x2xf32>
    %467 = tpu.matmul %465, %466, %cst_316 {dimension_numbers = #tpu.dot_dimension_numbers<[1], [0], [0], [1], [0, 0, 1, 1], [], []>} : vector<32x32xbf16>, vector<32x2xbf16>, vector<32x2xf32> -> vector<32x2xf32>
    %468 = arith.truncf %467 : vector<32x2xf32> to vector<32x2xbf16>
    %c2_317 = arith.constant 2 : index
    %c1_318 = arith.constant 1 : index
    %c0_319 = arith.constant 0 : index
    %c0_320 = arith.constant 0 : index
    %469 = vector.load %arg16[%c2_317, %c1_318, %c0_319, %c0_320] : memref<3x2x2x16xbf16, #tpu.memory_space<vmem>>, vector<1x1x2x16xbf16>
    %470 = vector.shape_cast %469 : vector<1x1x2x16xbf16> to vector<2x16xbf16>
    %cst_321 = arith.constant dense<0.000000e+00> : vector<32x16xf32>
    %471 = tpu.matmul %468, %470, %cst_321 {dimension_numbers = #tpu.dot_dimension_numbers<[1], [0], [0], [1], [0, 0, 1, 1], [], []>} : vector<32x2xbf16>, vector<2x16xbf16>, vector<32x16xf32> -> vector<32x16xf32>
    %472 = arith.addf %431, %471 : vector<32x16xf32>
    %cst_322 = arith.constant 0.000000e+00 : f32
    %473 = vector.broadcast %cst_322 : f32 to vector<32x16xf32>
    %474 = arith.cmpf oge, %472, %473 : vector<32x16xf32>
    %cst_323 = arith.constant 2.000000e-01 : f32
    %475 = vector.broadcast %cst_323 : f32 to vector<32x16xf32>
    %476 = arith.mulf %475, %472 : vector<32x16xf32>
    %477 = arith.select %474, %472, %476 : vector<32x16xi1>, vector<32x16xf32>
    %478 = arith.truncf %477 : vector<32x16xf32> to vector<32x16xbf16>
    %c4 = arith.constant 4 : index
    %c0_324 = arith.constant 0 : index
    %c0_325 = arith.constant 0 : index
    %479 = vector.load %arg19[%c4, %c0_324, %c0_325] : memref<9x16x16xbf16, #tpu.memory_space<vmem>>, vector<1x16x16xbf16>
    %480 = vector.shape_cast %479 : vector<1x16x16xbf16> to vector<16x16xbf16>
    %cst_326 = arith.constant dense<0.000000e+00> : vector<32x16xf32>
    %481 = tpu.matmul %478, %480, %cst_326 {dimension_numbers = #tpu.dot_dimension_numbers<[1], [0], [0], [1], [0, 0, 1, 1], [], []>} : vector<32x16xbf16>, vector<16x16xbf16>, vector<32x16xf32> -> vector<32x16xf32>
    %c9_i32 = arith.constant 9 : i32
    %482 = tpu.dynamic_rotate %477 by %c9_i32 dim 0 : vector<32x16xf32>, i32 -> vector<32x16xf32>
    %483 = vector.broadcast %24 : vector<32x1xf32> to vector<32x16xf32>
    %484 = arith.mulf %482, %483 : vector<32x16xf32>
    %485 = arith.truncf %484 : vector<32x16xf32> to vector<32x16xbf16>
    %c0_327 = arith.constant 0 : index
    %c0_328 = arith.constant 0 : index
    %c0_329 = arith.constant 0 : index
    %486 = vector.load %arg19[%c0_327, %c0_328, %c0_329] : memref<9x16x16xbf16, #tpu.memory_space<vmem>>, vector<1x16x16xbf16>
    %487 = vector.shape_cast %486 : vector<1x16x16xbf16> to vector<16x16xbf16>
    %cst_330 = arith.constant dense<0.000000e+00> : vector<32x16xf32>
    %488 = tpu.matmul %485, %487, %cst_330 {dimension_numbers = #tpu.dot_dimension_numbers<[1], [0], [0], [1], [0, 0, 1, 1], [], []>} : vector<32x16xbf16>, vector<16x16xbf16>, vector<32x16xf32> -> vector<32x16xf32>
    %489 = arith.addf %481, %488 : vector<32x16xf32>
    %c8_i32_331 = arith.constant 8 : i32
    %490 = tpu.dynamic_rotate %477 by %c8_i32_331 dim 0 : vector<32x16xf32>, i32 -> vector<32x16xf32>
    %491 = vector.broadcast %45 : vector<32x1xf32> to vector<32x16xf32>
    %492 = arith.mulf %490, %491 : vector<32x16xf32>
    %493 = arith.truncf %492 : vector<32x16xf32> to vector<32x16xbf16>
    %c1_332 = arith.constant 1 : index
    %c0_333 = arith.constant 0 : index
    %c0_334 = arith.constant 0 : index
    %494 = vector.load %arg19[%c1_332, %c0_333, %c0_334] : memref<9x16x16xbf16, #tpu.memory_space<vmem>>, vector<1x16x16xbf16>
    %495 = vector.shape_cast %494 : vector<1x16x16xbf16> to vector<16x16xbf16>
    %cst_335 = arith.constant dense<0.000000e+00> : vector<32x16xf32>
    %496 = tpu.matmul %493, %495, %cst_335 {dimension_numbers = #tpu.dot_dimension_numbers<[1], [0], [0], [1], [0, 0, 1, 1], [], []>} : vector<32x16xbf16>, vector<16x16xbf16>, vector<32x16xf32> -> vector<32x16xf32>
    %497 = arith.addf %489, %496 : vector<32x16xf32>
    %c7_i32 = arith.constant 7 : i32
    %498 = tpu.dynamic_rotate %477 by %c7_i32 dim 0 : vector<32x16xf32>, i32 -> vector<32x16xf32>
    %499 = vector.broadcast %66 : vector<32x1xf32> to vector<32x16xf32>
    %500 = arith.mulf %498, %499 : vector<32x16xf32>
    %501 = arith.truncf %500 : vector<32x16xf32> to vector<32x16xbf16>
    %c2_336 = arith.constant 2 : index
    %c0_337 = arith.constant 0 : index
    %c0_338 = arith.constant 0 : index
    %502 = vector.load %arg19[%c2_336, %c0_337, %c0_338] : memref<9x16x16xbf16, #tpu.memory_space<vmem>>, vector<1x16x16xbf16>
    %503 = vector.shape_cast %502 : vector<1x16x16xbf16> to vector<16x16xbf16>
    %cst_339 = arith.constant dense<0.000000e+00> : vector<32x16xf32>
    %504 = tpu.matmul %501, %503, %cst_339 {dimension_numbers = #tpu.dot_dimension_numbers<[1], [0], [0], [1], [0, 0, 1, 1], [], []>} : vector<32x16xbf16>, vector<16x16xbf16>, vector<32x16xf32> -> vector<32x16xf32>
    %505 = arith.addf %497, %504 : vector<32x16xf32>
    %c1_i32_340 = arith.constant 1 : i32
    %506 = tpu.dynamic_rotate %477 by %c1_i32_340 dim 0 : vector<32x16xf32>, i32 -> vector<32x16xf32>
    %507 = vector.broadcast %87 : vector<32x1xf32> to vector<32x16xf32>
    %508 = arith.mulf %506, %507 : vector<32x16xf32>
    %509 = arith.truncf %508 : vector<32x16xf32> to vector<32x16xbf16>
    %c3 = arith.constant 3 : index
    %c0_341 = arith.constant 0 : index
    %c0_342 = arith.constant 0 : index
    %510 = vector.load %arg19[%c3, %c0_341, %c0_342] : memref<9x16x16xbf16, #tpu.memory_space<vmem>>, vector<1x16x16xbf16>
    %511 = vector.shape_cast %510 : vector<1x16x16xbf16> to vector<16x16xbf16>
    %cst_343 = arith.constant dense<0.000000e+00> : vector<32x16xf32>
    %512 = tpu.matmul %509, %511, %cst_343 {dimension_numbers = #tpu.dot_dimension_numbers<[1], [0], [0], [1], [0, 0, 1, 1], [], []>} : vector<32x16xbf16>, vector<16x16xbf16>, vector<32x16xf32> -> vector<32x16xf32>
    %513 = arith.addf %505, %512 : vector<32x16xf32>
    %c31_i32 = arith.constant 31 : i32
    %514 = tpu.dynamic_rotate %477 by %c31_i32 dim 0 : vector<32x16xf32>, i32 -> vector<32x16xf32>
    %515 = vector.broadcast %108 : vector<32x1xf32> to vector<32x16xf32>
    %516 = arith.mulf %514, %515 : vector<32x16xf32>
    %517 = arith.truncf %516 : vector<32x16xf32> to vector<32x16xbf16>
    %c5 = arith.constant 5 : index
    %c0_344 = arith.constant 0 : index
    %c0_345 = arith.constant 0 : index
    %518 = vector.load %arg19[%c5, %c0_344, %c0_345] : memref<9x16x16xbf16, #tpu.memory_space<vmem>>, vector<1x16x16xbf16>
    %519 = vector.shape_cast %518 : vector<1x16x16xbf16> to vector<16x16xbf16>
    %cst_346 = arith.constant dense<0.000000e+00> : vector<32x16xf32>
    %520 = tpu.matmul %517, %519, %cst_346 {dimension_numbers = #tpu.dot_dimension_numbers<[1], [0], [0], [1], [0, 0, 1, 1], [], []>} : vector<32x16xbf16>, vector<16x16xbf16>, vector<32x16xf32> -> vector<32x16xf32>
    %521 = arith.addf %513, %520 : vector<32x16xf32>
    %c25_i32 = arith.constant 25 : i32
    %522 = tpu.dynamic_rotate %477 by %c25_i32 dim 0 : vector<32x16xf32>, i32 -> vector<32x16xf32>
    %523 = vector.broadcast %129 : vector<32x1xf32> to vector<32x16xf32>
    %524 = arith.mulf %522, %523 : vector<32x16xf32>
    %525 = arith.truncf %524 : vector<32x16xf32> to vector<32x16xbf16>
    %c6 = arith.constant 6 : index
    %c0_347 = arith.constant 0 : index
    %c0_348 = arith.constant 0 : index
    %526 = vector.load %arg19[%c6, %c0_347, %c0_348] : memref<9x16x16xbf16, #tpu.memory_space<vmem>>, vector<1x16x16xbf16>
    %527 = vector.shape_cast %526 : vector<1x16x16xbf16> to vector<16x16xbf16>
    %cst_349 = arith.constant dense<0.000000e+00> : vector<32x16xf32>
    %528 = tpu.matmul %525, %527, %cst_349 {dimension_numbers = #tpu.dot_dimension_numbers<[1], [0], [0], [1], [0, 0, 1, 1], [], []>} : vector<32x16xbf16>, vector<16x16xbf16>, vector<32x16xf32> -> vector<32x16xf32>
    %529 = arith.addf %521, %528 : vector<32x16xf32>
    %c24_i32 = arith.constant 24 : i32
    %530 = tpu.dynamic_rotate %477 by %c24_i32 dim 0 : vector<32x16xf32>, i32 -> vector<32x16xf32>
    %531 = vector.broadcast %150 : vector<32x1xf32> to vector<32x16xf32>
    %532 = arith.mulf %530, %531 : vector<32x16xf32>
    %533 = arith.truncf %532 : vector<32x16xf32> to vector<32x16xbf16>
    %c7 = arith.constant 7 : index
    %c0_350 = arith.constant 0 : index
    %c0_351 = arith.constant 0 : index
    %534 = vector.load %arg19[%c7, %c0_350, %c0_351] : memref<9x16x16xbf16, #tpu.memory_space<vmem>>, vector<1x16x16xbf16>
    %535 = vector.shape_cast %534 : vector<1x16x16xbf16> to vector<16x16xbf16>
    %cst_352 = arith.constant dense<0.000000e+00> : vector<32x16xf32>
    %536 = tpu.matmul %533, %535, %cst_352 {dimension_numbers = #tpu.dot_dimension_numbers<[1], [0], [0], [1], [0, 0, 1, 1], [], []>} : vector<32x16xbf16>, vector<16x16xbf16>, vector<32x16xf32> -> vector<32x16xf32>
    %537 = arith.addf %529, %536 : vector<32x16xf32>
    %c23_i32 = arith.constant 23 : i32
    %538 = tpu.dynamic_rotate %477 by %c23_i32 dim 0 : vector<32x16xf32>, i32 -> vector<32x16xf32>
    %539 = vector.broadcast %171 : vector<32x1xf32> to vector<32x16xf32>
    %540 = arith.mulf %538, %539 : vector<32x16xf32>
    %541 = arith.truncf %540 : vector<32x16xf32> to vector<32x16xbf16>
    %c8 = arith.constant 8 : index
    %c0_353 = arith.constant 0 : index
    %c0_354 = arith.constant 0 : index
    %542 = vector.load %arg19[%c8, %c0_353, %c0_354] : memref<9x16x16xbf16, #tpu.memory_space<vmem>>, vector<1x16x16xbf16>
    %543 = vector.shape_cast %542 : vector<1x16x16xbf16> to vector<16x16xbf16>
    %cst_355 = arith.constant dense<0.000000e+00> : vector<32x16xf32>
    %544 = tpu.matmul %541, %543, %cst_355 {dimension_numbers = #tpu.dot_dimension_numbers<[1], [0], [0], [1], [0, 0, 1, 1], [], []>} : vector<32x16xbf16>, vector<16x16xbf16>, vector<32x16xf32> -> vector<32x16xf32>
    %545 = arith.addf %537, %544 : vector<32x16xf32>
    %c0_356 = arith.constant 0 : index
    %c0_357 = arith.constant 0 : index
    %546 = vector.load %arg20[%c0_356, %c0_357] : memref<1x16xf32, #tpu.memory_space<vmem>>, vector<1x16xf32>
    %547 = vector.broadcast %546 : vector<1x16xf32> to vector<32x16xf32>
    %548 = arith.addf %545, %547 : vector<32x16xf32>
    %cst_358 = arith.constant 0.000000e+00 : f32
    %549 = vector.broadcast %cst_358 : f32 to vector<32x16xf32>
    %550 = arith.cmpf oge, %548, %549 : vector<32x16xf32>
    %cst_359 = arith.constant 2.000000e-01 : f32
    %551 = vector.broadcast %cst_359 : f32 to vector<32x16xf32>
    %552 = arith.mulf %551, %548 : vector<32x16xf32>
    %553 = arith.select %550, %548, %552 : vector<32x16xi1>, vector<32x16xf32>
    %554 = arith.addf %553, %206 : vector<32x16xf32>
    %555 = arith.addf %554, %182 : vector<32x16xf32>
    %c0_360 = arith.constant 0 : index
    %c0_361 = arith.constant 0 : index
    %c0_362 = arith.constant 0 : index
    %556 = vector.load %arg23[%c0_360, %c0_361, %c0_362] : memref<1x32x16xf32, #tpu.memory_space<vmem>>, vector<1x32x16xf32>
    %557 = vector.shape_cast %556 : vector<1x32x16xf32> to vector<32x16xf32>
    %558 = vector.shape_cast %555 : vector<32x16xf32> to vector<1x32x16xf32>
    tpu.vector_store %arg23[%c0_360, %c0_361, %c0_362], %558 {strides = array<i32>} : memref<1x32x16xf32, #tpu.memory_space<vmem>>, vector<1x32x16xf32>,
    return
  }
  func.func @transform_0(%arg0: i32) -> (i32, i32, i32) {
    %c0_i32 = arith.constant 0 : i32
    %c0_i32_0 = arith.constant 0 : i32
    %c0_i32_1 = arith.constant 0 : i32
    return %arg0, %c0_i32, %c0_i32_0 : i32, i32, i32
  }
  func.func @transform_1(%arg0: i32) -> (i32, i32, i32) {
    %c0_i32 = arith.constant 0 : i32
    %c0_i32_0 = arith.constant 0 : i32
    %c0_i32_1 = arith.constant 0 : i32
    return %arg0, %c0_i32, %c0_i32_0 : i32, i32, i32
  }
  func.func @transform_2(%arg0: i32) -> (i32, i32) {
    %c0_i32 = arith.constant 0 : i32
    %c0_i32_0 = arith.constant 0 : i32
    %c0_i32_1 = arith.constant 0 : i32
    return %c0_i32, %c0_i32_0 : i32, i32
  }
  func.func @transform_3(%arg0: i32) -> (i32, i32) {
    %c0_i32 = arith.constant 0 : i32
    %c0_i32_0 = arith.constant 0 : i32
    %c0_i32_1 = arith.constant 0 : i32
    return %c0_i32, %c0_i32_0 : i32, i32
  }
  func.func @transform_4(%arg0: i32) -> (i32, i32) {
    %c0_i32 = arith.constant 0 : i32
    %c0_i32_0 = arith.constant 0 : i32
    %c0_i32_1 = arith.constant 0 : i32
    return %c0_i32, %c0_i32_0 : i32, i32
  }
  func.func @transform_5(%arg0: i32) -> (i32, i32) {
    %c0_i32 = arith.constant 0 : i32
    %c0_i32_0 = arith.constant 0 : i32
    %c0_i32_1 = arith.constant 0 : i32
    return %c0_i32, %c0_i32_0 : i32, i32
  }
  func.func @transform_6(%arg0: i32) -> (i32, i32) {
    %c0_i32 = arith.constant 0 : i32
    %c0_i32_0 = arith.constant 0 : i32
    %c0_i32_1 = arith.constant 0 : i32
    return %c0_i32, %c0_i32_0 : i32, i32
  }
  func.func @transform_7(%arg0: i32) -> (i32, i32) {
    %c0_i32 = arith.constant 0 : i32
    %c0_i32_0 = arith.constant 0 : i32
    %c0_i32_1 = arith.constant 0 : i32
    return %c0_i32, %c0_i32_0 : i32, i32
  }
  func.func @transform_8(%arg0: i32) -> (i32, i32) {
    %c0_i32 = arith.constant 0 : i32
    %c0_i32_0 = arith.constant 0 : i32
    %c0_i32_1 = arith.constant 0 : i32
    return %c0_i32, %c0_i32_0 : i32, i32
  }
  func.func @transform_9(%arg0: i32) -> (i32, i32, i32, i32) {
    %c0_i32 = arith.constant 0 : i32
    %c0_i32_0 = arith.constant 0 : i32
    %c0_i32_1 = arith.constant 0 : i32
    %c0_i32_2 = arith.constant 0 : i32
    %c0_i32_3 = arith.constant 0 : i32
    return %c0_i32, %c0_i32_0, %c0_i32_1, %c0_i32_2 : i32, i32, i32, i32
  }
  func.func @transform_10(%arg0: i32) -> (i32, i32, i32, i32) {
    %c0_i32 = arith.constant 0 : i32
    %c0_i32_0 = arith.constant 0 : i32
    %c0_i32_1 = arith.constant 0 : i32
    %c0_i32_2 = arith.constant 0 : i32
    %c0_i32_3 = arith.constant 0 : i32
    return %c0_i32, %c0_i32_0, %c0_i32_1, %c0_i32_2 : i32, i32, i32, i32
  }
  func.func @transform_11(%arg0: i32) -> (i32, i32, i32, i32) {
    %c0_i32 = arith.constant 0 : i32
    %c0_i32_0 = arith.constant 0 : i32
    %c0_i32_1 = arith.constant 0 : i32
    %c0_i32_2 = arith.constant 0 : i32
    %c0_i32_3 = arith.constant 0 : i32
    return %c0_i32, %c0_i32_0, %c0_i32_1, %c0_i32_2 : i32, i32, i32, i32
  }
  func.func @transform_12(%arg0: i32) -> (i32, i32, i32, i32) {
    %c0_i32 = arith.constant 0 : i32
    %c0_i32_0 = arith.constant 0 : i32
    %c0_i32_1 = arith.constant 0 : i32
    %c0_i32_2 = arith.constant 0 : i32
    %c0_i32_3 = arith.constant 0 : i32
    return %c0_i32, %c0_i32_0, %c0_i32_1, %c0_i32_2 : i32, i32, i32, i32
  }
  func.func @transform_13(%arg0: i32) -> (i32, i32, i32, i32) {
    %c0_i32 = arith.constant 0 : i32
    %c0_i32_0 = arith.constant 0 : i32
    %c0_i32_1 = arith.constant 0 : i32
    %c0_i32_2 = arith.constant 0 : i32
    %c0_i32_3 = arith.constant 0 : i32
    return %c0_i32, %c0_i32_0, %c0_i32_1, %c0_i32_2 : i32, i32, i32, i32
  }
  func.func @transform_14(%arg0: i32) -> (i32, i32, i32, i32) {
    %c0_i32 = arith.constant 0 : i32
    %c0_i32_0 = arith.constant 0 : i32
    %c0_i32_1 = arith.constant 0 : i32
    %c0_i32_2 = arith.constant 0 : i32
    %c0_i32_3 = arith.constant 0 : i32
    return %c0_i32, %c0_i32_0, %c0_i32_1, %c0_i32_2 : i32, i32, i32, i32
  }
  func.func @transform_15(%arg0: i32) -> (i32, i32, i32, i32) {
    %c0_i32 = arith.constant 0 : i32
    %c0_i32_0 = arith.constant 0 : i32
    %c0_i32_1 = arith.constant 0 : i32
    %c0_i32_2 = arith.constant 0 : i32
    %c0_i32_3 = arith.constant 0 : i32
    return %c0_i32, %c0_i32_0, %c0_i32_1, %c0_i32_2 : i32, i32, i32, i32
  }
  func.func @transform_16(%arg0: i32) -> (i32, i32, i32) {
    %c0_i32 = arith.constant 0 : i32
    %c0_i32_0 = arith.constant 0 : i32
    %c0_i32_1 = arith.constant 0 : i32
    %c0_i32_2 = arith.constant 0 : i32
    return %c0_i32, %c0_i32_0, %c0_i32_1 : i32, i32, i32
  }
  func.func @transform_17(%arg0: i32) -> (i32, i32) {
    %c0_i32 = arith.constant 0 : i32
    %c0_i32_0 = arith.constant 0 : i32
    %c0_i32_1 = arith.constant 0 : i32
    return %c0_i32, %c0_i32_0 : i32, i32
  }
  func.func @transform_18(%arg0: i32) -> (i32, i32, i32) {
    %c0_i32 = arith.constant 0 : i32
    %c0_i32_0 = arith.constant 0 : i32
    %c0_i32_1 = arith.constant 0 : i32
    %c0_i32_2 = arith.constant 0 : i32
    return %c0_i32, %c0_i32_0, %c0_i32_1 : i32, i32, i32
  }
  func.func @transform_19(%arg0: i32) -> (i32, i32) {
    %c0_i32 = arith.constant 0 : i32
    %c0_i32_0 = arith.constant 0 : i32
    %c0_i32_1 = arith.constant 0 : i32
    return %c0_i32, %c0_i32_0 : i32, i32
  }
  func.func @transform_20(%arg0: i32) -> (i32, i32, i32) {
    %c0_i32 = arith.constant 0 : i32
    %c0_i32_0 = arith.constant 0 : i32
    %c0_i32_1 = arith.constant 0 : i32
    %c0_i32_2 = arith.constant 0 : i32
    return %c0_i32, %c0_i32_0, %c0_i32_1 : i32, i32, i32
  }
  func.func @transform_21(%arg0: i32) -> (i32, i32) {
    %c0_i32 = arith.constant 0 : i32
    %c0_i32_0 = arith.constant 0 : i32
    %c0_i32_1 = arith.constant 0 : i32
    return %c0_i32, %c0_i32_0 : i32, i32
  }
  func.func @transform_22(%arg0: i32) -> (i32, i32, i32) {
    %c0_i32 = arith.constant 0 : i32
    %c0_i32_0 = arith.constant 0 : i32
    %c0_i32_1 = arith.constant 0 : i32
    return %arg0, %c0_i32, %c0_i32_0 : i32, i32, i32
  }
}

</mosaic_0001>

<bundles_post_ra>
// kernel: tpu_custom_call.1
= control target key start
LH: loop header
LB: loop body
LE: loop exit
PB: predicated region body
PF: predicated region fallthrough
CT: control target
= control target key end

     0   :  { %s7272_s0 = inlined_call_operand.vmem [shape: f32[2,32,8], index: 0, kind: input, shape index: {}]   ;;  %s7273_s1 = inlined_call_operand.vmem [shape: f32[2,32,8], index: 1, kind: input, shape index: {}]   ;;  %s7274_s2 = inlined_call_operand.vmem [shape: bf16[32,32], index: 2, kind: input, shape index: {}]   ;;  %s7275_s3 = inlined_call_operand.vmem [shape: f32[32,32], index: 3, kind: input, shape index: {}]   ;;  %s7276_s4 = inlined_call_operand.vmem [shape: f32[32,32], index: 4, kind: input, shape index: {}]   ;;  %s7277_s5 = inlined_call_operand.vmem [shape: s32[32,1], index: 5, kind: input, shape index: {}]   ;;  %s7278_s6 = inlined_call_operand.vmem [shape: s32[32,1], index: 6, kind: input, shape index: {}]   ;;  %s7279_s7 = inlined_call_operand.vmem [shape: bf16[8,16], index: 7, kind: input, shape index: {}]   ;;  %s7280_s8 = inlined_call_operand.vmem [shape: f32[1,16], index: 8, kind: input, shape index: {}]   ;;  %s7281_s9 = inlined_call_operand.vmem [shape: bf16[3,2,16,2], index: 9, kind: input, shape index: {}]   ;;  %s7282_s10 = inlined_call_operand.vmem [shape: bf16[3,2,16,2], index: 10, kind: input, shape index: {}]   ;;  %s7283_s11 = inlined_call_operand.vmem [shape: bf16[3,2,16,2], index: 11, kind: input, shape index: {}]   ;;  %s7284_s12 = inlined_call_operand.vmem [shape: f32[3,2,1,2], index: 12, kind: input, shape index: {}]   ;;  %s7285_s13 = inlined_call_operand.vmem [shape: f32[3,2,1,2], index: 13, kind: input, shape index: {}]   ;;  %s7286_s14 = inlined_call_operand.vmem [shape: f32[3,2,1,2], index: 14, kind: input, shape index: {}]   ;;  %s7287_s15 = inlined_call_operand.vmem [shape: bf16[3,2,2,16], index: 15, kind: input, shape index: {}]   ;;  %s7288_s16 = inlined_call_operand.vmem [shape: f32[3,1,16], index: 16, kind: input, shape index: {}]   ;;  %s7289_s17 = inlined_call_operand.vmem [shape: bf16[16,16], index: 17, kind: input, shape index: {}]   ;;  %s7290_s18 = inlined_call_operand.vmem [shape: bf16[9,16,16], index: 18, kind: input, shape index: {}]   ;;  %s7291_s19 = inlined_call_operand.vmem [shape: f32[1,16], index: 19, kind: input, shape index: {}]   ;;  %s7292_s20 = inlined_call_operand.vmem [shape: bf16[3,8,16], index: 20, kind: input, shape index: {}]   ;;  %s7293_s21 = inlined_call_operand.vmem [shape: f32[1,16], index: 21, kind: input, shape index: {}]   ;;  %s7294_s22 = inlined_call_operand.vmem [shape: f32[2,32,16], index: 22, kind: output, shape index: {}]  }
   0x1   :  { %7316 = sst [smem:[#allocation2_spill]] %s7272_s0 }
   0x2   :  { %7317 = sst [smem:[#allocation3_spill]] %s7273_s1 }
   0x3   :  { %7318 = sst [smem:[#allocation4_spill]] %s7274_s2 }
   0x4   :  { %7319 = sst [smem:[#allocation5_spill]] %s7275_s3  ;;  %s6096_s3 = smov 0  }
   0x5   :  { %7320 = sst [smem:[#allocation6_spill]] %s7276_s4 }
   0x6   :  { %7321 = sst [smem:[#allocation7_spill]] %s7277_s5 }
   0x7   :  { %7322 = sst [smem:[#allocation8_spill]] %s7278_s6 }
   0x8 LB: > { %s4945_s28 = sadd.s32 4294967295, %s5977_s3   ;;  %p4949_p0 = scmp.ge.s32.totalorder %s5977_s3, 1  ;;  %s5977_s3 = sphi %s6096_s3, %s32_s3  }
   0x9   : > { %p622_p1 = scmp.lt.s32.totalorder %s5977_s3, 3 }
   0xb   : > { %p623_p2 = pnand %p4949_p0, %p622_p1 }
   0xc   : > { %p689_p3 = scmp.lt.s32.totalorder (!%p623_p2), %s4945_s28, 1  ;;  %s7323_s4 = sld [smem:[#allocation4_spill]] (!%p623_p2) }
   0xd   : > { %626 = sbr.rel (%p623_p2) target bundleno = 6563 (0x19a3), region = 108  ;;  %s7324_s6 = sld [smem:[#allocation3_spill]] (!%p623_p2) }
   0xe   : > { %s7325_s27 = sld [smem:[#allocation2_spill]] (!%p623_p2) }
   0xf   : > { %s7328_s23 = sld [smem:[#allocation7_spill]] (!%p623_p2) }
  0x10   : > { %s7329_s2 = sld [smem:[#allocation8_spill]] (!%p623_p2) }
  0x12   : > { %v5845_v0 = vld [vmem:[%s7323_s4] sm:$0xff]   ;;  %vm1005_vm0 = vcmask 261120   ;;  %s7429_s28 = smov (!%p689_p3, %s4945_s28), 1  ;;  %vm918_vm1 = vcmask 1043456   ;;  %vm911_vm2 = vcmask 64512   ;;  %v5846_v15 = vld [vmem:[%s7323_s4 + $0x8] sm:$0xff]  }
  0x13   : > { %5401 = vmatprep.mubr.msk.bf16.mxu1 %vm1005_vm0, %v5845_v0  ;;  %v903_v1 = vld [vmem:[%s7279_s7] sm:$0xf]  ;;  %s6113_s1 = sshll.u32 %s7429_s28, 5  ;;  %v4997_v16 = vld [vmem:[%s7292_s20 + $0x4] sm:$0xf]  ;;  %vm7300_vm7 = vcmask 130048  }
  0x14   : > { %5731 = vmatprep.subr.msk.bf16.mxu0 %vm918_vm1, %v903_v1  ;;  %v920_v2 = vsel %vm918_vm1, %v903_v1, 0  ;;  %s698_s25 = scalar_lea.vmem %s7324_s6, %s6113_s1  ;;  %s693_s29 = scalar_lea.vmem %s7325_s27, %s6113_s1  ;;  %v1122_v17 = vsel %vm918_vm1, %v4997_v16, 0  ;;  %v4988_v26 = vld [vmem:[%s7280_s8] ss:$0 sm:$0xff]  ;;  %v5002_v47 = vld [vmem:[%s7292_s20 + $0x8] sm:$0xf] }
  0x15   : > { %5392 = vmatpush3.bf16.msra.mxu0 %v920_v2  ;;  %v991_v3 = vld [vmem:[%s698_s25 + $0x10] sm:$0xff]  ;;  %v992_v4 = vld [vmem:[%s698_s25 + $0x18] sm:$0xff]  ;;  %v989_v5 = vld [vmem:[%s698_s25] sm:$0xff]  ;;  %v1242_v48 = vsel %vm918_vm1, %v5002_v47, 0  ;;  %vm7301_vm8 = vcmask 15360   ;;  %s7326_s6 = sld [smem:[#allocation5_spill]]  ;;  %s703_s30 = scalar_lea.vmem %s7294_s22, %s6113_s1 }
  0x16   : > { %v6123_v6 = vpack.c.bf16 %v992_v4, %v991_v3  ;;  %v990_v7 = vld [vmem:[%s698_s25 + $0x8] sm:$0xff]  ;;  %v705_v8 = vld [vmem:[%s693_s29] sm:$0xff]  ;;  %v707_v12 = vld [vmem:[%s693_s29 + $0x10] sm:$0xff]  ;;  %vm1757_vm9 = vcmask 1040384   ;;  %s7327_s28 = sld [smem:[#allocation6_spill]] }
  0x17   : > { %v706_v9 = vld [vmem:[%s693_s29 + $0x8] sm:$0xff]  ;;  %v993_v10 = vpack.c.bf16 %v990_v7, %v989_v5  ;;  %v708_v13 = vld [vmem:[%s693_s29 + $0x18] sm:$0xff]  ;;  %v1112_v31 = vld [vmem:[%s7292_s20] sm:$0xf] }
  0x18   : > { %v901_v11 = vpack.c.bf16 %v706_v9, %v705_v8  ;;  %5397 = vmatprep.subr.bf16.mxu1 %v6123_v6  ;;  %v902_v14 = vpack.c.bf16 %v708_v13, %v707_v12  ;;  %v1180_v32 = vsel %vm918_vm1, %v1112_v31, 0  ;;  %v5847_v35 = vld [vmem:[%s7289_s17] sm:$0xff]  }
  0x19   : > { %5398 = vmatpush3.bf16.msra.mxu1 %v6123_v6  ;;  %v5848_v43 = vld [vmem:[%s7282_s10] sm:$0xff]  }
  0x1a   : > { %5393 = vmatprep.mubr.msk.bf16.mxu0 %vm911_vm2, %v901_v11  ;;  %5399 = vmatprep.subr.bf16.mxu1 %v993_v10  ;;  %v5849_v49 = vld [vmem:[%s7281_s9] sm:$0xff]  }
  0x1b   : > { %5394 = vmatmul.mubr.msk.bf16.vlgmr.msra.gmra.mxu0 %vm911_vm2, %v902_v14  ;;  %v5850_v59 = vld [vmem:[%s7283_s11] sm:$0xff]  }
  0x1c   : > { %5409 = vmatprep.mubr.msk.bf16.mxu0 %vm1005_vm0, %v5845_v0  ;;  %v5014_v8 = vld [vmem:[%s7285_s13] ss:$0 sm:$0xff] }
  0x1d   : > { %5400 = vmatpush3.bf16.msra.mxu1 %v993_v10 }
  0x1e   : > { %5732 = vmatprep.subr.msk.bf16.mxu1 %vm918_vm1, %v4997_v16 }
  0x20   : > { %5402 = vmatmul.mubr.msk.bf16.vlgmr.msra.gmra.mxu1 %vm1005_vm0, %v5846_v15 }
  0x21   : > { %5414 = vmatpush3.bf16.msra.mxu1 %v1122_v17 }
  0x22   : > { %5734 = vmatprep.subr.msk.bf16.mxu1 %vm918_vm1, %v5002_v47 }
  0xdb   : > { %v5395_v18 = vpop.f32.mrf.mxu0 }
  0xdc   : > { %v965_v36 = vadd.f32 %v5395_v18, %v4988_v26 }
  0xdd   : > { %v956_v19 = vpop.f32.mrf.mxu0 }
  0xde   : > { %v957_v29 = vadd.f32 %v4988_v26, %v956_v19  ;;  %v977_v40 = vmul.f32 0.2, %v965_v36  ;;  %vm973_vm5 = vcmp.ge.f32.partialorder %v965_v36, 0.0 }
  0xdf   : > { %v5396_v22 = vpop.f32.mrf.mxu0 }
  0xe0   : > { %v5403_v20 = vpop.f32.mrf.mxu1  ;;  %v975_v33 = vmul.f32 0.2, %v957_v29  ;;  %vm971_vm3 = vcmp.ge.f32.partialorder %v957_v29, 0.0  ;;  %v968_v37 = vadd.f32 %v5396_v22, %v4988_v26  ;;  %v6167_v44 = vsel %vm973_vm5, %v965_v36, %v977_v40 }
  0xe1   : > { %v959_v27 = vpop.f32.mrf.mxu0 }
  0xe2   : > { %v1046_v21 = vpop.f32.mrf.mxu1  ;;  %v960_v30 = vadd.f32 %v4988_v26, %v959_v27  ;;  %v6154_v38 = vsel %vm971_vm3, %v957_v29, %v975_v33  ;;  %v978_v41 = vmul.f32 0.2, %v968_v37  ;;  %vm974_vm6 = vcmp.ge.f32.partialorder %v968_v37, 0.0 }
  0xe4   : > { %v5404_v23 = vpop.f32.mrf.mxu1  ;;  %v976_v34 = vmul.f32 0.2, %v960_v30  ;;  %vm972_vm4 = vcmp.ge.f32.partialorder %v960_v30, 0.0  ;;  %v6169_v45 = vsel %vm974_vm6, %v968_v37, %v978_v41 }
  0xe5   : > { %v1062_v24 = vpack.c.bf16 %v5404_v23, %v5403_v20  ;;  %v6175_v46 = vpack.c.bf16 %v6169_v45, %v6167_v44  ;;  %v5851_v20 = vld [vmem:[%s7281_s9 + $0x8] sm:$0xff]  }
  0xe6   : > { %v1049_v25 = vpop.f32.mrf.mxu1  ;;  %v6156_v39 = vsel %vm972_vm4, %v960_v30, %v976_v34  ;;  %v5010_v34 = vld [vmem:[%s7284_s12] ss:$0 sm:$0xff] }
  0xe7   : > { %v1061_v28 = vpack.c.bf16 %v1049_v25, %v1046_v21  ;;  %5405 = vmatprep.subr.bf16.mxu0 %v1062_v24  ;;  %v6160_v42 = vpack.c.bf16 %v6156_v39, %v6154_v38 }
  0xe8   : > { %5406 = vmatpush3.bf16.msra.mxu0 %v1062_v24 }
  0xe9   : > { %5407 = vmatprep.subr.bf16.mxu0 %v1061_v28  ;;  %5415 = vmatprep.mubr.msk.bf16.mxu1 %vm911_vm2, %v1061_v28 }
  0xea   : > { %5416 = vmatmul.mubr.msk.bf16.vlgmr.msra.gmra.mxu1 %vm911_vm2, %v1062_v24 }
  0xeb   : > { %5426 = vmatpush3.bf16.msra.mxu1 %v1242_v48 }
  0xec   : > { %5408 = vmatpush3.bf16.msra.mxu0 %v1061_v28  ;;  %5437 = vmatprep.subr.bf16.mxu1 %v5849_v49 }
  0xed   : > { %5733 = vmatprep.subr.msk.bf16.mxu0 %vm918_vm1, %v1112_v31 }
  0xef   : > { %5410 = vmatmul.mubr.msk.bf16.vlgmr.msra.gmra.mxu0 %vm1005_vm0, %v5846_v15 }
  0xf0   : > { %5420 = vmatpush3.bf16.msra.mxu0 %v1180_v32  ;;  %5421 = vmatprep.mubr.msk.bf16.mxu0 %vm911_vm2, %v993_v10 }
  0xf1   : > { %5431 = vmatprep.subr.bf16.mxu0 %v5847_v35 }
  0xf7   : > { %5422 = vmatmul.mubr.msk.bf16.vlgmr.msra.gmra.mxu0 %vm911_vm2, %v6123_v6 }
  0xf8   : > { %5432 = vmatpush3.bf16.msra.mxu0 %v5847_v35  ;;  %5433 = vmatprep.mubr.msk.bf16.mxu0 %vm7300_vm7, %v6160_v42 }
  0xf9   : > { %5443 = vmatprep.subr.bf16.mxu0 %v5848_v43 }
  0xff   : > { %5434 = vmatmul.mubr.msk.bf16.vlgmr.msra.gmra.mxu0 %vm7300_vm7, %v6175_v46 }
 0x100   : > { %5444 = vmatpush3.bf16.msra.mxu0 %v5848_v43  ;;  %5445 = vmatprep.mubr.msk.bf16.mxu0 %vm7300_vm7, %v6160_v42 }
 0x107   : > { %5446 = vmatmul.mubr.msk.bf16.vlgmr.msra.gmra.mxu0 %vm7300_vm7, %v6175_v46 }
 0x1aa   : > { %v5417_v52 = vpop.f32.mrf.mxu1 }
 0x1ac   : > { %v1158_v56 = vpop.f32.mrf.mxu1 }
 0x1ae   : > { %v5418_v63 = vpop.f32.mrf.mxu1 }
 0x1af   : > { %v5411_v50 = vpop.f32.mrf.mxu0 }
 0x1b0   : > { %v1161_v21 = vpop.f32.mrf.mxu1 }
 0x1b1   : > { %v1097_v51 = vpop.f32.mrf.mxu0 }
 0x1b3   : > { %v5412_v53 = vpop.f32.mrf.mxu0 }
 0x1b4   : > { %v1232_v57 = vpack.c.bf16 %v5412_v53, %v5411_v50 }
 0x1b5   : > { %v1100_v54 = vpop.f32.mrf.mxu0 }
 0x1b6   : > { %v1231_v55 = vpack.c.bf16 %v1100_v54, %v1097_v51  ;;  %v5852_v51 = vld [vmem:[%s7283_s11 + $0x8] sm:$0xff]  }
 0x1b7   : > { %v5423_v58 = vpop.f32.mrf.mxu0 }
 0x1b8   : > { %v1225_v60 = vadd.f32 %v5423_v58, %v5417_v52  ;;  %5427 = vmatprep.mubr.msk.bf16.mxu1 %vm911_vm2, %v1231_v55 }
 0x1b9   : > { %v1216_v61 = vpop.f32.mrf.mxu0  ;;  %5428 = vmatmul.mubr.msk.bf16.vlgmr.msra.gmra.mxu1 %vm911_vm2, %v1232_v57 }
 0x1ba   : > { %v1217_v62 = vadd.f32 %v1216_v61, %v1158_v56  ;;  %5438 = vmatpush3.bf16.msra.mxu1 %v5849_v49  ;;  %5439 = vmatprep.mubr.msk.bf16.mxu1 %vm7300_vm7, %v6160_v42  ;;  %v5018_v49 = vld [vmem:[%s7286_s14] ss:$0 sm:$0xff] }
 0x1bb   : > { %v5424_v0 = vpop.f32.mrf.mxu0  ;;  %5449 = vmatprep.subr.bf16.mxu1 %v5850_v59 }
 0x1bc   : > { %v1228_v1 = vadd.f32 %v5424_v0, %v5418_v63 }
 0x1bd   : > { %v1219_v2 = vpop.f32.mrf.mxu0 }
 0x1be   : > { %v1220_v27 = vadd.f32 %v1219_v2, %v1161_v21 }
 0x1bf   : > { %v6198_v3 = vpop.f32.mrf.mxu0 }
 0x1c1   : > { %5440 = vmatmul.mubr.msk.bf16.vlgmr.msra.gmra.mxu1 %vm7300_vm7, %v6175_v46  ;;  %v6202_v4 = vpop.f32.mrf.mxu0 }
 0x1c2   : > { %5451 = vmatprep.mubr.msk.bf16.mxu1 %vm7300_vm7, %v6160_v42  ;;  %5450 = vmatpush3.bf16.msra.mxu1 %v5850_v59 }
 0x1c3   : > { %v6206_v5 = vpop.f32.mrf.mxu0 }
 0x1c5   : > { %v6208_v6 = vpop.f32.mrf.mxu0 }
 0x1c7   : > { %v5447_v7 = vpop.f32.mrf.mxu0 }
 0x1c8   : > { %v1509_v10 = vadd.f32 %v5447_v7, %v5014_v8 }
 0x1c9   : > { %5452 = vmatmul.mubr.msk.bf16.vlgmr.msra.gmra.mxu1 %vm7300_vm7, %v6175_v46  ;;  %v1500_v9 = vpop.f32.mrf.mxu0 }
 0x1ca   : > { %v1501_v12 = vadd.f32 %v5014_v8, %v1500_v9  ;;  %v6270_v9 = vld [vmem:[%s7326_s6 + $0x8] sm:$0xff] }
 0x1cb   : > { %v5448_v11 = vpop.f32.mrf.mxu0 }
 0x1cc   : > { %v1512_v13 = vadd.f32 %v5448_v11, %v5014_v8 }
 0x1cd   : > { %v1503_v14 = vpop.f32.mrf.mxu0 }
 0x1ce   : > { %v1582_v15 = vpack.c.bf16 %v1512_v13, %v1509_v10  ;;  %v1504_v16 = vadd.f32 %v5014_v8, %v1503_v14  ;;  %v5031_v13 = vld [vmem:[%s7284_s12 + $0x1] ss:$0 sm:$0xff] }
 0x1d0   : > { %5735 = vmatprep.subr.msk.bf16.mxu0 %vm7301_vm8, %v1582_v15  ;;  %v1594_v17 = vsel %vm7301_vm8, %v1582_v15, 0  ;;  %v1581_v18 = vpack.c.bf16 %v1504_v16, %v1501_v12 }
 0x1d1   : > { %5456 = vmatpush3.bf16.xpose.msra.mxu0 %v1594_v17 }
 0x1d2   : > { %5736 = vmatprep.subr.msk.bf16.mxu0 %vm7301_vm8, %v1581_v18  ;;  %v1591_v19 = vsel %vm7301_vm8, %v1581_v18, 0 }
 0x1d9   : > { %5458 = vmatpush3.bf16.xpose.msra.mxu0 %v1591_v19 }
 0x1da   : > { %5477 = vmatprep.subr.bf16.mxu0 %v5851_v20 }
 0x279   : > { %v5429_v22 = vpop.f32.mrf.mxu1 }
 0x27a   : > { %v6222_v23 = vadd.f32 %v5429_v22, %v1225_v60  ;;  %v6252_v60 = vld [vmem:[%s7326_s6 + $0x10] sm:$0xff] }
 0x27b   : > { %v1278_v24 = vpop.f32.mrf.mxu1 }
 0x27c   : > { %v6224_v25 = vadd.f32 %v1278_v24, %v1217_v62  ;;  %v6257_v62 = vld [vmem:[%s7326_s6] sm:$0xff] }
 0x27d   : > { %v5430_v26 = vpop.f32.mrf.mxu1 }
 0x27e   : > { %v6226_v28 = vadd.f32 %v5430_v26, %v1228_v1  ;;  %v6263_v1 = vld [vmem:[%s7326_s6 + $0x18] sm:$0xff] }
 0x27f   : > { %v1281_v29 = vpop.f32.mrf.mxu1 }
 0x280   : > { %v6228_v30 = vadd.f32 %v1281_v29, %v1220_v27 }
 0x281   : > { %v5441_v31 = vpop.f32.mrf.mxu1 }
 0x282   : > { %v1445_v41 = vadd.f32 %v5441_v31, %v5010_v34 }
 0x283   : > { %v1436_v32 = vpop.f32.mrf.mxu1 }
 0x284   : > { %v1437_v37 = vadd.f32 %v5010_v34, %v1436_v32  ;;  %v5045_v32 = vld [vmem:[%s7286_s14 + $0x1] ss:$0 sm:$0xff] }
 0x285   : > { %v5442_v33 = vpop.f32.mrf.mxu1 }
 0x286   : > { %v1448_v35 = vadd.f32 %v5442_v33, %v5010_v34 }
 0x287   : > { %v1439_v36 = vpop.f32.mrf.mxu1 }
 0x288   : > { %v1440_v40 = vadd.f32 %v5010_v34, %v1439_v36  ;;  %v1580_v48 = vpack.c.bf16 %v1448_v35, %v1445_v41 }
 0x289   : > { %v5453_v43 = vpop.f32.mrf.mxu1 }
 0x28a   : > { %v1579_v47 = vpack.c.bf16 %v1440_v40, %v1437_v37  ;;  %v1573_v53 = vadd.f32 %v5453_v43, %v5018_v49 }
 0x28b   : > { %v1564_v50 = vpop.f32.mrf.mxu1 }
 0x28c   : > { %5459 = vmatprep.mubr.msk.bf16.mxu0 %vm7301_vm8, %v1579_v47  ;;  %v1565_v56 = vadd.f32 %v5018_v49, %v1564_v50 }
 0x28d   : > { %v5454_v52 = vpop.f32.mrf.mxu1  ;;  %5460 = vmatmul.mubr.msk.bf16.vlgmr.msra.gmra.mxu0 %vm7301_vm8, %v1580_v48 }
 0x28e   : > { %v1576_v54 = vadd.f32 %v5454_v52, %v5018_v49  ;;  %5479 = vmatprep.mubr.msk.bf16.mxu0 %vm7300_vm7, %v6160_v42  ;;  %5478 = vmatpush3.bf16.msra.mxu0 %v5851_v20 }
 0x28f   : > { %v1567_v55 = vpop.f32.mrf.mxu1  ;;  %5489 = vmatprep.subr.bf16.mxu0 %v5852_v51 }
 0x290   : > { %v1692_v57 = vpack.c.bf16 %v1576_v54, %v1573_v53  ;;  %v1568_v58 = vadd.f32 %v5018_v49, %v1567_v55 }
 0x292   : > { %v1691_v59 = vpack.c.bf16 %v1568_v58, %v1565_v56  ;;  %5463 = vmatprep.subr.bf16.mxu1 %v1692_v57 }
 0x293   : > { %5464 = vmatpush3.bf16.msra.mxu1 %v1692_v57 }
 0x294   : > { %5465 = vmatprep.subr.bf16.mxu1 %v1691_v59 }
 0x295   : > { %5480 = vmatmul.mubr.msk.bf16.vlgmr.msra.gmra.mxu0 %vm7300_vm7, %v6175_v46 }
 0x296   : > { %5491 = vmatprep.mubr.msk.bf16.mxu0 %vm7300_vm7, %v6160_v42  ;;  %5490 = vmatpush3.bf16.msra.mxu0 %v5852_v51 }
 0x297   : > { %5466 = vmatpush3.bf16.msra.mxu1 %v1691_v59 }
 0x29d   : > { %5492 = vmatmul.mubr.msk.bf16.vlgmr.msra.gmra.mxu0 %vm7300_vm7, %v6175_v46 }
 0x34d   : > { %v5461_v61 = vpop.f32.mrf.mxu0 }
 0x34e   : > { %v1639_v63 = vadd.f32 %v5461_v61, %v6252_v60 }
 0x34f   : > { %v1630_v0 = vpop.f32.mrf.mxu0 }
 0x350   : > { %v1631_v2 = vadd.f32 %v1630_v0, %v6257_v62  ;;  %v1651_v7 = vsel %vm1005_vm0, %v1639_v63, -inf }
 0x351   : > { %1652 = vmax.xlane.f32.xlu1 %v1651_v7  ;;  %v5462_v8 = vpop.f32.mrf.mxu0 }
 0x352   : > { %v1642_v10 = vadd.f32 %v5462_v8, %v6263_v1  ;;  %v1645_v11 = vsel %vm1005_vm0, %v1631_v2, -inf }
 0x353   : > { %v1633_v12 = vpop.f32.mrf.mxu0  ;;  %1646 = vmax.xlane.f32.xlu0 %v1645_v11 }
 0x354   : > { %v1634_v14 = vadd.f32 %v1633_v12, %v6270_v9  ;;  %v1654_v15 = vsel %vm1005_vm0, %v1642_v10, -inf }
 0x355   : > { %1655 = vmax.xlane.f32.xlu1 %v1654_v15  ;;  %v5481_v16 = vpop.f32.mrf.mxu0 }
 0x356   : > { %v6279_v17 = vadd.f32 %v5481_v16, %v5031_v13  ;;  %v1648_v18 = vsel %vm1005_vm0, %v1634_v14, -inf }
 0x357   : > { %v1865_v19 = vpop.f32.mrf.mxu0  ;;  %1649 = vmax.xlane.f32.xlu0 %v1648_v18 }
 0x358   : > { %v6284_v24 = vadd.f32 %v5031_v13, %v1865_v19 }
 0x359   : > { %v5482_v20 = vpop.f32.mrf.mxu0 }
 0x35a   : > { %v6282_v21 = vadd.f32 %v5482_v20, %v5031_v13 }
 0x35b   : > { %v1868_v22 = vpop.f32.mrf.mxu0 }
 0x35c   : > { %v2013_v26 = vpack.c.bf16 %v6282_v21, %v6279_v17  ;;  %v6288_v27 = vadd.f32 %v5031_v13, %v1868_v22 }
 0x35d   : > { %v5493_v29 = vpop.f32.mrf.mxu0 }
 0x35e   : > { %v2012_v31 = vpack.c.bf16 %v6288_v27, %v6284_v24  ;;  %v2006_v35 = vadd.f32 %v5493_v29, %v5045_v32 }
 0x35f   : > { %v1997_v33 = vpop.f32.mrf.mxu0 }
 0x360   : > { %v1998_v40 = vadd.f32 %v5045_v32, %v1997_v33 }
 0x361   : > { %v5494_v34 = vpop.f32.mrf.mxu0 }
 0x362   : > { %v2009_v36 = vadd.f32 %v5494_v34, %v5045_v32 }
 0x363   : > { %v2000_v37 = vpop.f32.mrf.mxu0 }
 0x364   : > { %v2124_v41 = vpack.c.bf16 %v2009_v36, %v2006_v35  ;;  %v2001_v43 = vadd.f32 %v5045_v32, %v2000_v37  ;;  %v1750_v36 = vld [vmem:[%s7287_s15] sm:$0x1] }
 0x365   : > { %5737 = vmatprep.subr.msk.bf16.mxu1 %vm1757_vm9, %v1750_v36  ;;  %v1759_v37 = vsel %vm1757_vm9, %v1750_v36, 0 }
 0x366   : > { %v2123_v47 = vpack.c.bf16 %v2001_v43, %v1998_v40  ;;  %5503 = vmatprep.subr.bf16.mxu0 %v2124_v41  ;;  %v5853_v40 = vld [vmem:[%s7282_s10 + $0x8] sm:$0xff]  }
 0x367   : > { %5504 = vmatpush3.bf16.msra.mxu0 %v2124_v41 }
 0x368   : > { %5505 = vmatprep.subr.bf16.mxu0 %v2123_v47 }
 0x36b   : > { %5506 = vmatpush3.bf16.msra.mxu0 %v2123_v47 }
 0x3da   : > { %v1653_v48 = vpop.xlane.xlu1 %1652 }
 0x3db   : > { %v1659_v49 = vsub.f32 %v1639_v63, %v1653_v48 }
 0x3dc   : > { %v1647_v50 = vpop.xlane.xlu0 %1646 }
 0x3dd   : > { %v1657_v51 = vsub.f32 %v1631_v2, %v1647_v50  ;;  %v1665_v53 = vmul.f32 1.442695, %v1659_v49 }
 0x3de   : > { %v1656_v52 = vpop.xlane.xlu1 %1655 }
 0x3df   : > { %v1661_v54 = vmul.f32 1.442695, %v1657_v51  ;;  %v1660_v55 = vsub.f32 %v1642_v10, %v1656_v52  ;;  %v5006_v51 = vld [vmem:[%s7288_s16] ss:$0 sm:$0xff] }
 0x3e0   : > { %v1650_v56 = vpop.xlane.xlu0 %1649  ;;  %v1381_v52 = vadd.f32 %v6198_v3, %v5006_v51  ;;  %v1376_v24 = vadd.f32 %v5006_v51, %v6208_v6  ;;  %v5038_v3 = vld [vmem:[%s7285_s13 + $0x1] ss:$0 sm:$0xff] }
 0x3e1   : > { %5875 = vpow2.f32 %v1661_v54  ;;  %v1658_v57 = vsub.f32 %v1634_v14, %v1650_v56  ;;  %v1667_v58 = vmul.f32 1.442695, %v1660_v55  ;;  %v1373_v54 = vadd.f32 %v5006_v51, %v6202_v4 }
 0x3e2   : > { %5877 = vpow2.f32 %v1665_v53 }
 0x3e3   : > { %v1663_v59 = vmul.f32 1.442695, %v1658_v57  ;;  %v1384_v57 = vadd.f32 %v6206_v5, %v5006_v51 }
 0x3e5   : > { %5879 = vpow2.f32 %v1663_v59 }
 0x3e6   : > { %5881 = vpow2.f32 %v1667_v58 }
 0x3ee   : > { %v5876_v61 = vpop.eup %5875 }
 0x3ef   : > { %v1669_v0 = vsel %vm1005_vm0, %v5876_v61, 0.0  ;;  %v5878_v7 = vpop.eup %5877 }
 0x3f0   : > { %1670 = vadd.xlane.f32.xlu0 %v1669_v0  ;;  %v1675_v2 = vsel %vm1005_vm0, %v5878_v7, 0.0 }
 0x3f2   : > { %v5880_v63 = vpop.eup %5879 }
 0x3f3   : > { %v1672_v8 = vsel %vm1005_vm0, %v5880_v63, 0.0  ;;  %v5882_v11 = vpop.eup %5881 }
 0x3f4   : > { %1676 = vadd.xlane.f32.xlu0 %v1675_v2  ;;  %1673 = vadd.xlane.f32.xlu1 %v1672_v8  ;;  %v1678_v10 = vsel %vm1005_vm0, %v5882_v11, 0.0 }
 0x3f8   : > { %1679 = vadd.xlane.f32.xlu1 %v1678_v10 }
 0x479   : > { %v1671_v12 = vpop.xlane.xlu0 %1670 }
 0x47a   : > { %5883 = vrcp.f32 %v1671_v12 }
 0x47d   : > { %v1674_v13 = vpop.xlane.xlu1 %1673  ;;  %v1677_v14 = vpop.xlane.xlu0 %1676 }
 0x47e   : > { %5885 = vrcp.f32 %v1674_v13  ;;  %v5854_v13 = vld [vmem:[%s7281_s9 + $0x10] sm:$0xff]  }
 0x47f   : > { %5887 = vrcp.f32 %v1677_v14 }
 0x481   : > { %v1680_v15 = vpop.xlane.xlu1 %1679 }
 0x482   : > { %5889 = vrcp.f32 %v1680_v15  ;;  %v5855_v15 = vld [vmem:[%s7283_s11 + $0x10] sm:$0xff]  }
 0x487   : > { %v5884_v16 = vpop.eup %5883 }
 0x488   : > { %v1682_v19 = vmul.f32 %v5884_v16, %v5876_v61 }
 0x48b   : > { %v5886_v18 = vpop.eup %5885 }
 0x48c   : > { %v1684_v20 = vmul.f32 %v5886_v18, %v5880_v63  ;;  %v5888_v22 = vpop.eup %5887 }
 0x48d   : > { %v1686_v33 = vmul.f32 %v5888_v22, %v5878_v7  ;;  %v5061_v22 = vld [vmem:[%s7284_s12 + $0x2] ss:$0 sm:$0xff] }
 0x48e   : > { %v1689_v29 = vpack.c.bf16 %v1684_v20, %v1682_v19 }
 0x48f   : > { %v5890_v32 = vpop.eup %5889 }
 0x490   : > { %5467 = vmatprep.mubr.msk.bf16.mxu1 %vm1005_vm0, %v1689_v29  ;;  %v1688_v34 = vmul.f32 %v5890_v32, %v5882_v11 }
 0x492   : > { %v1690_v35 = vpack.c.bf16 %v1688_v34, %v1686_v33 }
 0x494   : > { %5468 = vmatmul.mubr.msk.bf16.vlgmr.msra.gmra.mxu1 %vm1005_vm0, %v1690_v35 }
 0x495   : > { %5472 = vmatpush3.bf16.msra.mxu1 %v1759_v37 }
 0x496   : > { %5483 = vmatprep.subr.bf16.mxu1 %v5853_v40 }
 0x554   : > { %v5469_v41 = vpop.f32.mrf.mxu1 }
 0x556   : > { %v1733_v43 = vpop.f32.mrf.mxu1 }
 0x558   : > { %v5470_v47 = vpop.f32.mrf.mxu1 }
 0x559   : > { %v1749_v50 = vpack.c.bf16 %v5470_v47, %v5469_v41 }
 0x55a   : > { %v1736_v48 = vpop.f32.mrf.mxu1 }
 0x55b   : > { %v1748_v49 = vpack.c.bf16 %v1736_v48, %v1733_v43 }
 0x55d   : > { %5473 = vmatprep.mubr.msk.bf16.mxu1 %vm7301_vm8, %v1748_v49  ;;  %v5075_v49 = vld [vmem:[%s7286_s14 + $0x2] ss:$0 sm:$0xff] }
 0x55e   : > { %5474 = vmatmul.mubr.msk.bf16.vlgmr.msra.gmra.mxu1 %vm7301_vm8, %v1749_v50 }
 0x55f   : > { %5484 = vmatpush3.bf16.msra.mxu1 %v5853_v40  ;;  %5485 = vmatprep.mubr.msk.bf16.mxu1 %vm7300_vm7, %v6160_v42 }
 0x566   : > { %5486 = vmatmul.mubr.msk.bf16.vlgmr.msra.gmra.mxu1 %vm7300_vm7, %v6175_v46 }
 0x567   : > { %5499 = vmatprep.mubr.msk.bf16.mxu1 %vm7301_vm8, %v2012_v31 }
 0x61e   : > { %v5475_v53 = vpop.f32.mrf.mxu1 }
 0x61f   : > { %v6324_v55 = vadd.f32 %v5475_v53, %v1381_v52 }
 0x620   : > { %v1795_v56 = vpop.f32.mrf.mxu1 }
 0x621   : > { %v6327_v58 = vadd.f32 %v1795_v56, %v1373_v54 }
 0x622   : > { %v5476_v59 = vpop.f32.mrf.mxu1 }
 0x623   : > { %v6330_v27 = vadd.f32 %v5476_v59, %v1384_v57 }
 0x624   : > { %v1798_v31 = vpop.f32.mrf.mxu1 }
 0x625   : > { %v6332_v61 = vadd.f32 %v1798_v31, %v1376_v24 }
 0x626   : > { %v5487_v0 = vpop.f32.mrf.mxu1 }
 0x627   : > { %v1940_v63 = vadd.f32 %v5487_v0, %v5038_v3 }
 0x628   : > { %v1931_v4 = vpop.f32.mrf.mxu1 }
 0x629   : > { %v1932_v8 = vadd.f32 %v5038_v3, %v1931_v4 }
 0x62a   : > { %v5488_v7 = vpop.f32.mrf.mxu1 }
 0x62b   : > { %v1943_v2 = vadd.f32 %v5488_v7, %v5038_v3 }
 0x62c   : > { %v1934_v5 = vpop.f32.mrf.mxu1 }
 0x62d   : > { %v2015_v11 = vpack.c.bf16 %v1943_v2, %v1940_v63  ;;  %v1935_v10 = vadd.f32 %v5038_v3, %v1934_v5 }
 0x62f   : > { %v2014_v12 = vpack.c.bf16 %v1935_v10, %v1932_v8  ;;  %5738 = vmatprep.subr.msk.bf16.mxu1 %vm7301_vm8, %v2015_v11  ;;  %v2026_v6 = vsel %vm7301_vm8, %v2015_v11, 0 }
 0x630   : > { %5496 = vmatpush3.bf16.xpose.msra.mxu1 %v2026_v6 }
 0x631   : > { %5739 = vmatprep.subr.msk.bf16.mxu1 %vm7301_vm8, %v2014_v12  ;;  %v2023_v14 = vsel %vm7301_vm8, %v2014_v12, 0 }
 0x638   : > { %5498 = vmatpush3.bf16.xpose.msra.mxu1 %v2023_v14 }
 0x639   : > { %5517 = vmatprep.subr.bf16.mxu1 %v5854_v13 }
 0x63f   : > { %5500 = vmatmul.mubr.msk.bf16.vlgmr.msra.gmra.mxu1 %vm7301_vm8, %v2013_v26 }
 0x640   : > { %5519 = vmatprep.mubr.msk.bf16.mxu1 %vm7300_vm7, %v6160_v42  ;;  %5518 = vmatpush3.bf16.msra.mxu1 %v5854_v13 }
 0x641   : > { %5529 = vmatprep.subr.bf16.mxu1 %v5855_v15 }
 0x647   : > { %5520 = vmatmul.mubr.msk.bf16.vlgmr.msra.gmra.mxu1 %vm7300_vm7, %v6175_v46 }
 0x648   : > { %5531 = vmatprep.mubr.msk.bf16.mxu1 %vm7300_vm7, %v6160_v42  ;;  %5530 = vmatpush3.bf16.msra.mxu1 %v5855_v15 }
 0x64f   : > { %5532 = vmatmul.mubr.msk.bf16.vlgmr.msra.gmra.mxu1 %vm7300_vm7, %v6175_v46 }
 0x6ff   : > { %v5501_v16 = vpop.f32.mrf.mxu1 }
 0x700   : > { %v2071_v26 = vadd.f32 %v5501_v16, %v6252_v60 }
 0x701   : > { %v2062_v18 = vpop.f32.mrf.mxu1 }
 0x702   : > { %v2063_v17 = vadd.f32 %v2062_v18, %v6257_v62  ;;  %v2083_v35 = vsel %vm1005_vm0, %v2071_v26, -inf }
 0x703   : > { %v5502_v21 = vpop.f32.mrf.mxu1 }
 0x704   : > { %v2077_v19 = vsel %vm1005_vm0, %v2063_v17, -inf  ;;  %v2074_v33 = vadd.f32 %v5502_v21, %v6263_v1 }
 0x705   : > { %v2065_v20 = vpop.f32.mrf.mxu1  ;;  %2078 = vmax.xlane.f32.xlu0 %v2077_v19 }
 0x706   : > { %v2066_v29 = vadd.f32 %v2065_v20, %v6270_v9  ;;  %v2086_v40 = vsel %vm1005_vm0, %v2074_v33, -inf }
 0x707   : > { %v5521_v32 = vpop.f32.mrf.mxu1 }
 0x708   : > { %v6367_v34 = vadd.f32 %v5521_v32, %v5061_v22  ;;  %v2080_v62 = vsel %vm1005_vm0, %v2066_v29, -inf }
 0x709   : > { %v2309_v60 = vpop.f32.mrf.mxu1  ;;  %2081 = vmax.xlane.f32.xlu1 %v2080_v62  ;;  %2084 = vmax.xlane.f32.xlu0 %v2083_v35 }
 0x70a   : > { %v6374_v9 = vadd.f32 %v5061_v22, %v2309_v60 }
 0x70b   : > { %v5522_v36 = vpop.f32.mrf.mxu1 }
 0x70c   : > { %v6371_v37 = vadd.f32 %v5522_v36, %v5061_v22 }
 0x70d   : > { %v2312_v41 = vpop.f32.mrf.mxu1  ;;  %2087 = vmax.xlane.f32.xlu1 %v2086_v40 }
 0x70e   : > { %v2457_v1 = vpack.c.bf16 %v6371_v37, %v6367_v34  ;;  %v6378_v43 = vadd.f32 %v5061_v22, %v2312_v41  ;;  %v6449_v34 = vld [vmem:[%s7327_s28] sm:$0xff]  ;;  %v6454_v37 = vld [vmem:[%s7327_s28 + $0x10] sm:$0xff] }
 0x70f   : > { %v5533_v47 = vpop.f32.mrf.mxu1 }
 0x710   : > { %v2456_v48 = vpack.c.bf16 %v6378_v43, %v6374_v9  ;;  %v2450_v52 = vadd.f32 %v5533_v47, %v5075_v49  ;;  %v5068_v9 = vld [vmem:[%s7285_s13 + $0x2] ss:$0 sm:$0xff] }
 0x711   : > { %v2441_v50 = vpop.f32.mrf.mxu1 }
 0x712   : > { %v2442_v56 = vadd.f32 %v5075_v49, %v2441_v50 }
 0x713   : > { %v5534_v51 = vpop.f32.mrf.mxu1 }
 0x714   : > { %v2453_v53 = vadd.f32 %v5534_v51, %v5075_v49  ;;  %v5856_v51 = vld [vmem:[%s7282_s10 + $0x10] sm:$0xff]  }
 0x715   : > { %v2444_v54 = vpop.f32.mrf.mxu1 }
 0x716   : > { %v2568_v57 = vpack.c.bf16 %v2453_v53, %v2450_v52  ;;  %v2445_v59 = vadd.f32 %v5075_v49, %v2444_v54  ;;  %v5053_v49 = vld [vmem:[%s7287_s15 + $0x1] sm:$0x1] }
 0x717   : > { %5740 = vmatprep.subr.msk.bf16.mxu0 %vm1757_vm9, %v5053_v49  ;;  %v2191_v50 = vsel %vm1757_vm9, %v5053_v49, 0 }
 0x718   : > { %v2567_v24 = vpack.c.bf16 %v2445_v59, %v2442_v56  ;;  %5543 = vmatprep.subr.bf16.mxu1 %v2568_v57 }
 0x719   : > { %5544 = vmatpush3.bf16.msra.mxu1 %v2568_v57 }
 0x71a   : > { %5545 = vmatprep.subr.bf16.mxu1 %v2567_v24 }
 0x71d   : > { %5546 = vmatpush3.bf16.msra.mxu1 %v2567_v24 }
 0x78e   : > { %v2079_v31 = vpop.xlane.xlu0 %2078 }
 0x78f   : > { %v2089_v0 = vsub.f32 %v2063_v17, %v2079_v31 }
 0x791   : > { %v2093_v3 = vmul.f32 1.442695, %v2089_v0 }
 0x792   : > { %v2082_v4 = vpop.xlane.xlu1 %2081  ;;  %v2085_v7 = vpop.xlane.xlu0 %2084 }
 0x793   : > { %5891 = vpow2.f32 %v2093_v3  ;;  %v2090_v63 = vsub.f32 %v2066_v29, %v2082_v4  ;;  %v2091_v2 = vsub.f32 %v2071_v26, %v2085_v7 }
 0x795   : > { %v2095_v5 = vmul.f32 1.442695, %v2090_v63  ;;  %v2097_v8 = vmul.f32 1.442695, %v2091_v2 }
 0x796   : > { %v2088_v11 = vpop.xlane.xlu1 %2087 }
 0x797   : > { %5893 = vpow2.f32 %v2095_v5  ;;  %v2092_v10 = vsub.f32 %v2074_v33, %v2088_v11 }
 0x798   : > { %5895 = vpow2.f32 %v2097_v8 }
 0x799   : > { %v2099_v12 = vmul.f32 1.442695, %v2092_v10 }
 0x79b   : > { %5897 = vpow2.f32 %v2099_v12 }
 0x7a0   : > { %v5892_v6 = vpop.eup %5891 }
 0x7a1   : > { %v2101_v13 = vsel %vm1005_vm0, %v5892_v6, 0.0 }
 0x7a2   : > { %2102 = vadd.xlane.f32.xlu0 %v2101_v13 }
 0x7a4   : > { %v5894_v14 = vpop.eup %5893 }
 0x7a5   : > { %v5896_v15 = vpop.eup %5895  ;;  %v2104_v16 = vsel %vm1005_vm0, %v5894_v14, 0.0 }
 0x7a6   : > { %2105 = vadd.xlane.f32.xlu1 %v2104_v16  ;;  %v2107_v18 = vsel %vm1005_vm0, %v5896_v15, 0.0 }
 0x7a7   : > { %2108 = vadd.xlane.f32.xlu0 %v2107_v18 }
 0x7a8   : > { %v5898_v17 = vpop.eup %5897 }
 0x7a9   : > { %v2110_v21 = vsel %vm1005_vm0, %v5898_v17, 0.0 }
 0x7aa   : > { %2111 = vadd.xlane.f32.xlu1 %v2110_v21 }
 0x82b   : > { %v2103_v26 = vpop.xlane.xlu0 %2102 }
 0x82c   : > { %5899 = vrcp.f32 %v2103_v26 }
 0x82f   : > { %v2106_v19 = vpop.xlane.xlu1 %2105 }
 0x830   : > { %5901 = vrcp.f32 %v2106_v19  ;;  %v2109_v20 = vpop.xlane.xlu0 %2108  ;;  %v6467_v19 = vld [vmem:[%s7327_s28 + $0x18] sm:$0xff] }
 0x831   : > { %5903 = vrcp.f32 %v2109_v20 }
 0x833   : > { %v2112_v22 = vpop.xlane.xlu1 %2111 }
 0x834   : > { %5905 = vrcp.f32 %v2112_v22  ;;  %v5089_v22 = vld [vmem:[%s7284_s12 + $0x3] ss:$0 sm:$0xff] }
 0x839   : > { %v5900_v29 = vpop.eup %5899 }
 0x83a   : > { %v2114_v33 = vmul.f32 %v5900_v29, %v5892_v6 }
 0x83d   : > { %v5902_v32 = vpop.eup %5901 }
 0x83e   : > { %v2116_v62 = vmul.f32 %v5902_v32, %v5894_v14  ;;  %v5904_v35 = vpop.eup %5903  ;;  %v5858_v14 = vld [vmem:[%s7283_s11 + $0x18] sm:$0xff]  }
 0x83f   : > { %v2118_v40 = vmul.f32 %v5904_v35, %v5896_v15 }
 0x840   : > { %v2121_v60 = vpack.c.bf16 %v2116_v62, %v2114_v33 }
 0x841   : > { %v5906_v36 = vpop.eup %5905 }
 0x842   : > { %5507 = vmatprep.mubr.msk.bf16.mxu0 %vm1005_vm0, %v2121_v60  ;;  %v2120_v41 = vmul.f32 %v5906_v36, %v5898_v17  ;;  %v6460_v17 = vld [vmem:[%s7327_s28 + $0x8] sm:$0xff] }
 0x844   : > { %v2122_v47 = vpack.c.bf16 %v2120_v41, %v2118_v40 }
 0x846   : > { %5508 = vmatmul.mubr.msk.bf16.vlgmr.msra.gmra.mxu0 %vm1005_vm0, %v2122_v47 }
 0x847   : > { %5512 = vmatpush3.bf16.msra.mxu0 %v2191_v50 }
 0x848   : > { %5523 = vmatprep.subr.bf16.mxu0 %v5856_v51 }
 0x906   : > { %v5509_v52 = vpop.f32.mrf.mxu0 }
 0x908   : > { %v2165_v53 = vpop.f32.mrf.mxu0 }
 0x90a   : > { %v5510_v54 = vpop.f32.mrf.mxu0 }
 0x90b   : > { %v2181_v59 = vpack.c.bf16 %v5510_v54, %v5509_v52 }
 0x90c   : > { %v2168_v56 = vpop.f32.mrf.mxu0 }
 0x90d   : > { %v2180_v57 = vpack.c.bf16 %v2168_v56, %v2165_v53  ;;  %v5103_v56 = vld [vmem:[%s7286_s14 + $0x3] ss:$0 sm:$0xff] }
 0x90f   : > { %5513 = vmatprep.mubr.msk.bf16.mxu0 %vm7301_vm8, %v2180_v57 }
 0x910   : > { %5514 = vmatmul.mubr.msk.bf16.vlgmr.msra.gmra.mxu0 %vm7301_vm8, %v2181_v59 }
 0x911   : > { %5524 = vmatpush3.bf16.msra.mxu0 %v5856_v51  ;;  %5525 = vmatprep.mubr.msk.bf16.mxu0 %vm7300_vm7, %v6160_v42 }
 0x918   : > { %5526 = vmatmul.mubr.msk.bf16.vlgmr.msra.gmra.mxu0 %vm7300_vm7, %v6175_v46 }
 0x919   : > { %5539 = vmatprep.mubr.msk.bf16.mxu0 %vm7301_vm8, %v2456_v48 }
 0x9d0   : > { %v5515_v24 = vpop.f32.mrf.mxu0 }
 0x9d1   : > { %v6410_v31 = vadd.f32 %v5515_v24, %v6324_v55 }
 0x9d2   : > { %v2227_v0 = vpop.f32.mrf.mxu0 }
 0x9d3   : > { %v6413_v3 = vadd.f32 %v2227_v0, %v6327_v58 }
 0x9d4   : > { %v5516_v4 = vpop.f32.mrf.mxu0 }
 0x9d5   : > { %v6416_v7 = vadd.f32 %v5516_v4, %v6330_v27 }
 0x9d6   : > { %v2230_v63 = vpop.f32.mrf.mxu0 }
 0x9d7   : > { %v6419_v2 = vadd.f32 %v2230_v63, %v6332_v61  ;;  %v5857_v61 = vld [vmem:[%s7281_s9 + $0x18] sm:$0xff]  }
 0x9d8   : > { %v5527_v5 = vpop.f32.mrf.mxu0 }
 0x9d9   : > { %v2384_v48 = vadd.f32 %v5527_v5, %v5068_v9 }
 0x9da   : > { %v2375_v43 = vpop.f32.mrf.mxu0 }
 0x9db   : > { %v2376_v58 = vadd.f32 %v5068_v9, %v2375_v43 }
 0x9dc   : > { %v5528_v55 = vpop.f32.mrf.mxu0 }
 0x9dd   : > { %v2387_v8 = vadd.f32 %v5528_v55, %v5068_v9 }
 0x9de   : > { %v2378_v11 = vpop.f32.mrf.mxu0 }
 0x9df   : > { %v2459_v10 = vpack.c.bf16 %v2387_v8, %v2384_v48  ;;  %v2379_v12 = vadd.f32 %v5068_v9, %v2378_v11 }
 0x9e1   : > { %v2458_v6 = vpack.c.bf16 %v2379_v12, %v2376_v58  ;;  %5741 = vmatprep.subr.msk.bf16.mxu0 %vm7301_vm8, %v2459_v10  ;;  %v2470_v27 = vsel %vm7301_vm8, %v2459_v10, 0 }
 0x9e2   : > { %5536 = vmatpush3.bf16.xpose.msra.mxu0 %v2470_v27 }
 0x9e3   : > { %5742 = vmatprep.subr.msk.bf16.mxu0 %vm7301_vm8, %v2458_v6  ;;  %v2467_v13 = vsel %vm7301_vm8, %v2458_v6, 0 }
 0x9ea   : > { %5538 = vmatpush3.bf16.xpose.msra.mxu0 %v2467_v13 }
 0x9eb   : > { %5557 = vmatprep.subr.bf16.mxu0 %v5857_v61 }
 0x9f1   : > { %5540 = vmatmul.mubr.msk.bf16.vlgmr.msra.gmra.mxu0 %vm7301_vm8, %v2457_v1 }
 0x9f2   : > { %5559 = vmatprep.mubr.msk.bf16.mxu0 %vm7300_vm7, %v6160_v42  ;;  %5558 = vmatpush3.bf16.msra.mxu0 %v5857_v61 }
 0x9f3   : > { %5569 = vmatprep.subr.bf16.mxu0 %v5858_v14 }
 0x9f9   : > { %5560 = vmatmul.mubr.msk.bf16.vlgmr.msra.gmra.mxu0 %vm7300_vm7, %v6175_v46 }
 0x9fa   : > { %5571 = vmatprep.mubr.msk.bf16.mxu0 %vm7300_vm7, %v6160_v42  ;;  %5570 = vmatpush3.bf16.msra.mxu0 %v5858_v14 }
 0xa01   : > { %5572 = vmatmul.mubr.msk.bf16.vlgmr.msra.gmra.mxu0 %vm7300_vm7, %v6175_v46 }
 0xab1   : > { %v5541_v15 = vpop.f32.mrf.mxu0 }
 0xab2   : > { %v2515_v21 = vadd.f32 %v5541_v15, %v6454_v37 }
 0xab3   : > { %v2506_v1 = vpop.f32.mrf.mxu0 }
 0xab4   : > { %v2507_v16 = vadd.f32 %v2506_v1, %v6449_v34  ;;  %v2527_v60 = vsel %vm1005_vm0, %v2515_v21, -inf }
 0xab5   : > { %v5542_v18 = vpop.f32.mrf.mxu0 }
 0xab6   : > { %v2521_v26 = vsel %vm1005_vm0, %v2507_v16, -inf  ;;  %v2518_v33 = vadd.f32 %v5542_v18, %v6467_v19 }
 0xab7   : > { %v2509_v20 = vpop.f32.mrf.mxu0  ;;  %2522 = vmax.xlane.f32.xlu0 %v2521_v26 }
 0xab8   : > { %v2510_v29 = vadd.f32 %v2509_v20, %v6460_v17  ;;  %v2530_v47 = vsel %vm1005_vm0, %v2518_v33, -inf }
 0xab9   : > { %v5561_v32 = vpop.f32.mrf.mxu0 }
 0xaba   : > { %v6474_v62 = vadd.f32 %v5561_v32, %v5089_v22  ;;  %v2524_v35 = vsel %vm1005_vm0, %v2510_v29, -inf }
 0xabb   : > { %v2741_v36 = vpop.f32.mrf.mxu0  ;;  %2525 = vmax.xlane.f32.xlu1 %v2524_v35  ;;  %2528 = vmax.xlane.f32.xlu0 %v2527_v60 }
 0xabc   : > { %v6481_v50 = vadd.f32 %v5089_v22, %v2741_v36 }
 0xabd   : > { %v5562_v40 = vpop.f32.mrf.mxu0 }
 0xabe   : > { %v6478_v41 = vadd.f32 %v5562_v40, %v5089_v22 }
 0xabf   : > { %v2744_v49 = vpop.f32.mrf.mxu0  ;;  %2531 = vmax.xlane.f32.xlu1 %v2530_v47 }
 0xac0   : > { %v2889_v51 = vpack.c.bf16 %v6478_v41, %v6474_v62  ;;  %v6485_v52 = vadd.f32 %v5089_v22, %v2744_v49 }
 0xac1   : > { %v5573_v53 = vpop.f32.mrf.mxu0 }
 0xac2   : > { %v2888_v54 = vpack.c.bf16 %v6485_v52, %v6481_v50  ;;  %v2882_v24 = vadd.f32 %v5573_v53, %v5103_v56 }
 0xac3   : > { %v2873_v57 = vpop.f32.mrf.mxu0 }
 0xac4   : > { %v2874_v63 = vadd.f32 %v5103_v56, %v2873_v57 }
 0xac5   : > { %v5574_v59 = vpop.f32.mrf.mxu0 }
 0xac6   : > { %v2885_v0 = vadd.f32 %v5574_v59, %v5103_v56 }
 0xac7   : > { %v2876_v4 = vpop.f32.mrf.mxu0 }
 0xac8   : > { %v3000_v5 = vpack.c.bf16 %v2885_v0, %v2882_v24  ;;  %v2877_v9 = vadd.f32 %v5103_v56, %v2876_v4  ;;  %v5083_v0 = vld [vmem:[%s7287_s15 + $0x2] sm:$0x1] }
 0xac9   : > { %5743 = vmatprep.subr.msk.bf16.mxu1 %vm1757_vm9, %v5083_v0  ;;  %v2635_v4 = vsel %vm1757_vm9, %v5083_v0, 0 }
 0xaca   : > { %v2999_v43 = vpack.c.bf16 %v2877_v9, %v2874_v63  ;;  %5583 = vmatprep.subr.bf16.mxu0 %v3000_v5  ;;  %v5859_v63 = vld [vmem:[%s7282_s10 + $0x18] sm:$0xff]  }
 0xacb   : > { %5584 = vmatpush3.bf16.msra.mxu0 %v3000_v5 }
 0xacc   : > { %5585 = vmatprep.subr.bf16.mxu0 %v2999_v43 }
 0xacf   : > { %5586 = vmatpush3.bf16.msra.mxu0 %v2999_v43 }
 0xb40   : > { %v2523_v55 = vpop.xlane.xlu0 %2522 }
 0xb41   : > { %v2533_v48 = vsub.f32 %v2507_v16, %v2523_v55 }
 0xb43   : > { %v2537_v8 = vmul.f32 1.442695, %v2533_v48 }
 0xb44   : > { %v2526_v11 = vpop.xlane.xlu1 %2525  ;;  %v2529_v58 = vpop.xlane.xlu0 %2528 }
 0xb45   : > { %5907 = vpow2.f32 %v2537_v8  ;;  %v2534_v10 = vsub.f32 %v2510_v29, %v2526_v11  ;;  %v2535_v12 = vsub.f32 %v2515_v21, %v2529_v58  ;;  %v5057_v11 = vld [vmem:[%s7288_s16 + $0x1] ss:$0 sm:$0xff] }
 0xb46   : > { %v2256_v58 = vadd.f32 %v5057_v11, %v6410_v31  ;;  %v2255_v52 = vadd.f32 %v5057_v11, %v6419_v2  ;;  %v5096_v31 = vld [vmem:[%s7285_s13 + $0x3] ss:$0 sm:$0xff] }
 0xb47   : > { %v2539_v6 = vmul.f32 1.442695, %v2534_v10  ;;  %v2541_v27 = vmul.f32 1.442695, %v2535_v12 }
 0xb48   : > { %v2532_v61 = vpop.xlane.xlu1 %2531 }
 0xb49   : > { %5909 = vpow2.f32 %v2539_v6  ;;  %v2536_v13 = vsub.f32 %v2518_v33, %v2532_v61  ;;  %v2254_v6 = vadd.f32 %v5057_v11, %v6413_v3 }
 0xb4a   : > { %5911 = vpow2.f32 %v2541_v27 }
 0xb4b   : > { %v2543_v14 = vmul.f32 1.442695, %v2536_v13  ;;  %v2257_v13 = vadd.f32 %v5057_v11, %v6416_v7 }
 0xb4d   : > { %5913 = vpow2.f32 %v2543_v14 }
 0xb52   : > { %v5908_v15 = vpop.eup %5907 }
 0xb53   : > { %v2545_v1 = vsel %vm1005_vm0, %v5908_v15, 0.0 }
 0xb54   : > { %2546 = vadd.xlane.f32.xlu0 %v2545_v1 }
 0xb56   : > { %v5910_v18 = vpop.eup %5909 }
 0xb57   : > { %v5912_v16 = vpop.eup %5911  ;;  %v2548_v26 = vsel %vm1005_vm0, %v5910_v18, 0.0 }
 0xb58   : > { %2549 = vadd.xlane.f32.xlu1 %v2548_v26  ;;  %v2551_v20 = vsel %vm1005_vm0, %v5912_v16, 0.0 }
 0xb59   : > { %2552 = vadd.xlane.f32.xlu0 %v2551_v20 }
 0xb5a   : > { %v5914_v21 = vpop.eup %5913 }
 0xb5b   : > { %v2554_v22 = vsel %vm1005_vm0, %v5914_v21, 0.0 }
 0xb5c   : > { %2555 = vadd.xlane.f32.xlu1 %v2554_v22 }
 0xbdd   : > { %v2547_v29 = vpop.xlane.xlu0 %2546 }
 0xbde   : > { %5915 = vrcp.f32 %v2547_v29 }
 0xbe1   : > { %v2550_v32 = vpop.xlane.xlu1 %2549 }
 0xbe2   : > { %5917 = vrcp.f32 %v2550_v32  ;;  %v2553_v33 = vpop.xlane.xlu0 %2552  ;;  %v5860_v32 = vld [vmem:[%s7281_s9 + $0x20] sm:$0xff]  }
 0xbe3   : > { %5919 = vrcp.f32 %v2553_v33 }
 0xbe5   : > { %v2556_v35 = vpop.xlane.xlu1 %2555 }
 0xbe6   : > { %5921 = vrcp.f32 %v2556_v35  ;;  %v5861_v35 = vld [vmem:[%s7283_s11 + $0x20] sm:$0xff]  }
 0xbeb   : > { %v5916_v60 = vpop.eup %5915 }
 0xbec   : > { %v2558_v40 = vmul.f32 %v5916_v60, %v5908_v15 }
 0xbef   : > { %v5918_v36 = vpop.eup %5917 }
 0xbf0   : > { %v2560_v47 = vmul.f32 %v5918_v36, %v5910_v18  ;;  %v5920_v49 = vpop.eup %5919 }
 0xbf1   : > { %v2562_v57 = vmul.f32 %v5920_v49, %v5912_v16  ;;  %v5119_v49 = vld [vmem:[%s7284_s12 + $0x4] ss:$0 sm:$0xff] }
 0xbf2   : > { %v2565_v53 = vpack.c.bf16 %v2560_v47, %v2558_v40 }
 0xbf3   : > { %v5922_v56 = vpop.eup %5921 }
 0xbf4   : > { %5547 = vmatprep.mubr.msk.bf16.mxu1 %vm1005_vm0, %v2565_v53  ;;  %v2564_v59 = vmul.f32 %v5922_v56, %v5914_v21 }
 0xbf6   : > { %v2566_v24 = vpack.c.bf16 %v2564_v59, %v2562_v57 }
 0xbf8   : > { %5548 = vmatmul.mubr.msk.bf16.vlgmr.msra.gmra.mxu1 %vm1005_vm0, %v2566_v24 }
 0xbf9   : > { %5552 = vmatpush3.bf16.msra.mxu1 %v2635_v4 }
 0xbfa   : > { %5563 = vmatprep.subr.bf16.mxu1 %v5859_v63 }
 0xcb8   : > { %v5549_v5 = vpop.f32.mrf.mxu1 }
 0xcba   : > { %v2609_v9 = vpop.f32.mrf.mxu1 }
 0xcbc   : > { %v5550_v43 = vpop.f32.mrf.mxu1 }
 0xcbd   : > { %v2625_v8 = vpack.c.bf16 %v5550_v43, %v5549_v5 }
 0xcbe   : > { %v2612_v55 = vpop.f32.mrf.mxu1 }
 0xcbf   : > { %v2624_v48 = vpack.c.bf16 %v2612_v55, %v2609_v9 }
 0xcc1   : > { %5553 = vmatprep.mubr.msk.bf16.mxu1 %vm7301_vm8, %v2624_v48  ;;  %v5133_v48 = vld [vmem:[%s7286_s14 + $0x4] ss:$0 sm:$0xff] }
 0xcc2   : > { %5554 = vmatmul.mubr.msk.bf16.vlgmr.msra.gmra.mxu1 %vm7301_vm8, %v2625_v8 }
 0xcc3   : > { %5564 = vmatpush3.bf16.msra.mxu1 %v5859_v63  ;;  %5565 = vmatprep.mubr.msk.bf16.mxu1 %vm7300_vm7, %v6160_v42 }
 0xcca   : > { %5566 = vmatmul.mubr.msk.bf16.vlgmr.msra.gmra.mxu1 %vm7300_vm7, %v6175_v46 }
 0xccb   : > { %5579 = vmatprep.mubr.msk.bf16.mxu1 %vm7301_vm8, %v2888_v54 }
 0xd82   : > { %v5555_v10 = vpop.f32.mrf.mxu1 }
 0xd83   : > { %v6520_v12 = vadd.f32 %v5555_v10, %v2256_v58 }
 0xd84   : > { %v2671_v27 = vpop.f32.mrf.mxu1 }
 0xd85   : > { %v6523_v61 = vadd.f32 %v2671_v27, %v2254_v6 }
 0xd86   : > { %v5556_v14 = vpop.f32.mrf.mxu1 }
 0xd87   : > { %v6526_v50 = vadd.f32 %v5556_v14, %v2257_v13 }
 0xd88   : > { %v2674_v54 = vpop.f32.mrf.mxu1 }
 0xd89   : > { %v6529_v15 = vadd.f32 %v2674_v54, %v2255_v52 }
 0xd8a   : > { %v5567_v1 = vpop.f32.mrf.mxu1 }
 0xd8b   : > { %v2816_v16 = vadd.f32 %v5567_v1, %v5096_v31 }
 0xd8c   : > { %v2807_v18 = vpop.f32.mrf.mxu1 }
 0xd8d   : > { %v2808_v21 = vadd.f32 %v5096_v31, %v2807_v18 }
 0xd8e   : > { %v5568_v3 = vpop.f32.mrf.mxu1 }
 0xd8f   : > { %v2819_v26 = vadd.f32 %v5568_v3, %v5096_v31 }
 0xd90   : > { %v2810_v20 = vpop.f32.mrf.mxu1 }
 0xd91   : > { %v2891_v7 = vpack.c.bf16 %v2819_v26, %v2816_v16  ;;  %v2811_v22 = vadd.f32 %v5096_v31, %v2810_v20 }
 0xd93   : > { %v2890_v29 = vpack.c.bf16 %v2811_v22, %v2808_v21  ;;  %5744 = vmatprep.subr.msk.bf16.mxu1 %vm7301_vm8, %v2891_v7  ;;  %v2902_v2 = vsel %vm7301_vm8, %v2891_v7, 0 }
 0xd94   : > { %5576 = vmatpush3.bf16.xpose.msra.mxu1 %v2902_v2 }
 0xd95   : > { %5745 = vmatprep.subr.msk.bf16.mxu1 %vm7301_vm8, %v2890_v29  ;;  %v2899_v33 = vsel %vm7301_vm8, %v2890_v29, 0 }
 0xd9c   : > { %5578 = vmatpush3.bf16.xpose.msra.mxu1 %v2899_v33 }
 0xd9d   : > { %5597 = vmatprep.subr.bf16.mxu1 %v5860_v32 }
 0xda3   : > { %5580 = vmatmul.mubr.msk.bf16.vlgmr.msra.gmra.mxu1 %vm7301_vm8, %v2889_v51 }
 0xda4   : > { %5599 = vmatprep.mubr.msk.bf16.mxu1 %vm7300_vm7, %v6160_v42  ;;  %5598 = vmatpush3.bf16.msra.mxu1 %v5860_v32 }
 0xda5   : > { %5609 = vmatprep.subr.bf16.mxu1 %v5861_v35 }
 0xdab   : > { %5600 = vmatmul.mubr.msk.bf16.vlgmr.msra.gmra.mxu1 %vm7300_vm7, %v6175_v46 }
 0xdac   : > { %5611 = vmatprep.mubr.msk.bf16.mxu1 %vm7300_vm7, %v6160_v42  ;;  %5610 = vmatpush3.bf16.msra.mxu1 %v5861_v35 }
 0xdb3   : > { %5612 = vmatmul.mubr.msk.bf16.vlgmr.msra.gmra.mxu1 %vm7300_vm7, %v6175_v46 }
 0xe63   : > { %v5581_v60 = vpop.f32.mrf.mxu1 }
 0xe64   : > { %v2947_v51 = vadd.f32 %v5581_v60, %v6454_v37 }
 0xe65   : > { %v2938_v36 = vpop.f32.mrf.mxu1 }
 0xe66   : > { %v2939_v62 = vadd.f32 %v2938_v36, %v6449_v34  ;;  %v2959_v24 = vsel %vm1005_vm0, %v2947_v51, -inf }
 0xe67   : > { %v5582_v41 = vpop.f32.mrf.mxu1 }
 0xe68   : > { %v2953_v40 = vsel %vm1005_vm0, %v2939_v62, -inf  ;;  %v2950_v57 = vadd.f32 %v5582_v41, %v6467_v19 }
 0xe69   : > { %v2941_v47 = vpop.f32.mrf.mxu1  ;;  %2954 = vmax.xlane.f32.xlu0 %v2953_v40 }
 0xe6a   : > { %v2942_v53 = vadd.f32 %v2941_v47, %v6460_v17  ;;  %v2962_v63 = vsel %vm1005_vm0, %v2950_v57, -inf }
 0xe6b   : > { %v5601_v56 = vpop.f32.mrf.mxu1 }
 0xe6c   : > { %v6564_v59 = vadd.f32 %v5601_v56, %v5119_v49  ;;  %v2956_v34 = vsel %vm1005_vm0, %v2942_v53, -inf }
 0xe6d   : > { %v3185_v37 = vpop.f32.mrf.mxu1  ;;  %2957 = vmax.xlane.f32.xlu1 %v2956_v34  ;;  %2960 = vmax.xlane.f32.xlu0 %v2959_v24 }
 0xe6e   : > { %v6571_v17 = vadd.f32 %v5119_v49, %v3185_v37 }
 0xe6f   : > { %v5602_v0 = vpop.f32.mrf.mxu1 }
 0xe70   : > { %v6568_v4 = vadd.f32 %v5602_v0, %v5119_v49 }
 0xe71   : > { %v3188_v5 = vpop.f32.mrf.mxu1  ;;  %2963 = vmax.xlane.f32.xlu1 %v2962_v63 }
 0xe72   : > { %v3333_v19 = vpack.c.bf16 %v6568_v4, %v6564_v59  ;;  %v6575_v9 = vadd.f32 %v5119_v49, %v3188_v5 }
 0xe73   : > { %v5613_v43 = vpop.f32.mrf.mxu1 }
 0xe74   : > { %v3332_v55 = vpack.c.bf16 %v6575_v9, %v6571_v17  ;;  %v3326_v58 = vadd.f32 %v5613_v43, %v5133_v48  ;;  %v5126_v17 = vld [vmem:[%s7285_s13 + $0x4] ss:$0 sm:$0xff] }
 0xe75   : > { %v3317_v8 = vpop.f32.mrf.mxu1 }
 0xe76   : > { %v3318_v27 = vadd.f32 %v5133_v48, %v3317_v8 }
 0xe77   : > { %v5614_v11 = vpop.f32.mrf.mxu1 }
 0xe78   : > { %v3329_v10 = vadd.f32 %v5614_v11, %v5133_v48  ;;  %v5862_v11 = vld [vmem:[%s7282_s10 + $0x20] sm:$0xff]  }
 0xe79   : > { %v3320_v6 = vpop.f32.mrf.mxu1 }
 0xe7a   : > { %v3444_v13 = vpack.c.bf16 %v3329_v10, %v3326_v58  ;;  %v3321_v14 = vadd.f32 %v5133_v48, %v3320_v6  ;;  %v5111_v48 = vld [vmem:[%s7287_s15 + $0x3] sm:$0x1] }
 0xe7b   : > { %5746 = vmatprep.subr.msk.bf16.mxu0 %vm1757_vm9, %v5111_v48  ;;  %v3067_v8 = vsel %vm1757_vm9, %v5111_v48, 0 }
 0xe7c   : > { %v3443_v52 = vpack.c.bf16 %v3321_v14, %v3318_v27  ;;  %5623 = vmatprep.subr.bf16.mxu1 %v3444_v13 }
 0xe7d   : > { %5624 = vmatpush3.bf16.msra.mxu1 %v3444_v13 }
 0xe7e   : > { %5625 = vmatprep.subr.bf16.mxu1 %v3443_v52 }
 0xe81   : > { %5626 = vmatpush3.bf16.msra.mxu1 %v3443_v52 }
 0xef2   : > { %v2955_v54 = vpop.xlane.xlu0 %2954 }
 0xef3   : > { %v2965_v1 = vsub.f32 %v2939_v62, %v2955_v54 }
 0xef5   : > { %v2969_v31 = vmul.f32 1.442695, %v2965_v1 }
 0xef6   : > { %v2958_v18 = vpop.xlane.xlu1 %2957  ;;  %v2961_v3 = vpop.xlane.xlu0 %2960 }
 0xef7   : > { %5923 = vpow2.f32 %v2969_v31  ;;  %v2966_v16 = vsub.f32 %v2942_v53, %v2958_v18  ;;  %v2967_v26 = vsub.f32 %v2947_v51, %v2961_v3 }
 0xef9   : > { %v2971_v20 = vmul.f32 1.442695, %v2966_v16  ;;  %v2973_v21 = vmul.f32 1.442695, %v2967_v26 }
 0xefa   : > { %v2964_v7 = vpop.xlane.xlu1 %2963 }
 0xefb   : > { %5925 = vpow2.f32 %v2971_v20  ;;  %v2968_v22 = vsub.f32 %v2950_v57, %v2964_v7 }
 0xefc   : > { %5927 = vpow2.f32 %v2973_v21 }
 0xefd   : > { %v2975_v29 = vmul.f32 1.442695, %v2968_v22 }
 0xeff   : > { %5929 = vpow2.f32 %v2975_v29 }
 0xf04   : > { %v5924_v2 = vpop.eup %5923 }
 0xf05   : > { %v2977_v32 = vsel %vm1005_vm0, %v5924_v2, 0.0 }
 0xf06   : > { %2978 = vadd.xlane.f32.xlu0 %v2977_v32 }
 0xf08   : > { %v5926_v33 = vpop.eup %5925 }
 0xf09   : > { %v5928_v35 = vpop.eup %5927  ;;  %v2980_v60 = vsel %vm1005_vm0, %v5926_v33, 0.0 }
 0xf0a   : > { %2981 = vadd.xlane.f32.xlu1 %v2980_v60  ;;  %v2983_v36 = vsel %vm1005_vm0, %v5928_v35, 0.0 }
 0xf0b   : > { %2984 = vadd.xlane.f32.xlu0 %v2983_v36  ;;  %v5147_v36 = vld [vmem:[%s7284_s12 + $0x5] ss:$0 sm:$0xff] }
 0xf0c   : > { %v5930_v62 = vpop.eup %5929 }
 0xf0d   : > { %v2986_v41 = vsel %vm1005_vm0, %v5930_v62, 0.0 }
 0xf0e   : > { %2987 = vadd.xlane.f32.xlu1 %v2986_v41 }
 0xf8f   : > { %v2979_v51 = vpop.xlane.xlu0 %2978 }
 0xf90   : > { %5931 = vrcp.f32 %v2979_v51 }
 0xf93   : > { %v2982_v40 = vpop.xlane.xlu1 %2981 }
 0xf94   : > { %5933 = vrcp.f32 %v2982_v40  ;;  %v2985_v47 = vpop.xlane.xlu0 %2984 }
 0xf95   : > { %5935 = vrcp.f32 %v2985_v47 }
 0xf97   : > { %v2988_v49 = vpop.xlane.xlu1 %2987 }
 0xf98   : > { %5937 = vrcp.f32 %v2988_v49 }
 0xf9d   : > { %v5932_v53 = vpop.eup %5931 }
 0xf9e   : > { %v2990_v57 = vmul.f32 %v5932_v53, %v5924_v2 }
 0xfa1   : > { %v5934_v56 = vpop.eup %5933 }
 0xfa2   : > { %v2992_v34 = vmul.f32 %v5934_v56, %v5926_v33  ;;  %v5936_v24 = vpop.eup %5935  ;;  %v5864_v33 = vld [vmem:[%s7283_s11 + $0x28] sm:$0xff]  }
 0xfa3   : > { %v2994_v63 = vmul.f32 %v5936_v24, %v5928_v35 }
 0xfa4   : > { %v2997_v37 = vpack.c.bf16 %v2992_v34, %v2990_v57 }
 0xfa5   : > { %v5938_v0 = vpop.eup %5937 }
 0xfa6   : > { %5587 = vmatprep.mubr.msk.bf16.mxu0 %vm1005_vm0, %v2997_v37  ;;  %v2996_v5 = vmul.f32 %v5938_v0, %v5930_v62 }
 0xfa8   : > { %v2998_v43 = vpack.c.bf16 %v2996_v5, %v2994_v63  ;;  %v5161_v5 = vld [vmem:[%s7286_s14 + $0x5] ss:$0 sm:$0xff] }
 0xfaa   : > { %5588 = vmatmul.mubr.msk.bf16.vlgmr.msra.gmra.mxu0 %vm1005_vm0, %v2998_v43 }
 0xfab   : > { %5592 = vmatpush3.bf16.msra.mxu0 %v3067_v8 }
 0xfac   : > { %5603 = vmatprep.subr.bf16.mxu0 %v5862_v11 }
0x106a   : > { %v5589_v58 = vpop.f32.mrf.mxu0 }
0x106c   : > { %v3041_v10 = vpop.f32.mrf.mxu0 }
0x106e   : > { %v5590_v6 = vpop.f32.mrf.mxu0 }
0x106f   : > { %v3057_v14 = vpack.c.bf16 %v5590_v6, %v5589_v58 }
0x1070   : > { %v3044_v27 = vpop.f32.mrf.mxu0 }
0x1071   : > { %v3056_v13 = vpack.c.bf16 %v3044_v27, %v3041_v10 }
0x1073   : > { %5593 = vmatprep.mubr.msk.bf16.mxu0 %vm7301_vm8, %v3056_v13 }
0x1074   : > { %5594 = vmatmul.mubr.msk.bf16.vlgmr.msra.gmra.mxu0 %vm7301_vm8, %v3057_v14 }
0x1075   : > { %5604 = vmatpush3.bf16.msra.mxu0 %v5862_v11  ;;  %5605 = vmatprep.mubr.msk.bf16.mxu0 %vm7300_vm7, %v6160_v42 }
0x107c   : > { %5606 = vmatmul.mubr.msk.bf16.vlgmr.msra.gmra.mxu0 %vm7300_vm7, %v6175_v46 }
0x107d   : > { %5619 = vmatprep.mubr.msk.bf16.mxu0 %vm7301_vm8, %v3332_v55 }
0x1134   : > { %v5595_v52 = vpop.f32.mrf.mxu0 }
0x1135   : > { %v6607_v54 = vadd.f32 %v5595_v52, %v6520_v12 }
0x1136   : > { %v3103_v1 = vpop.f32.mrf.mxu0 }
0x1137   : > { %v6610_v31 = vadd.f32 %v3103_v1, %v6523_v61 }
0x1138   : > { %v5596_v18 = vpop.f32.mrf.mxu0 }
0x1139   : > { %v6613_v3 = vadd.f32 %v5596_v18, %v6526_v50 }
0x113a   : > { %v3106_v16 = vpop.f32.mrf.mxu0 }
0x113b   : > { %v6616_v26 = vadd.f32 %v3106_v16, %v6529_v15  ;;  %v5863_v15 = vld [vmem:[%s7281_s9 + $0x28] sm:$0xff]  }
0x113c   : > { %v5607_v20 = vpop.f32.mrf.mxu0 }
0x113d   : > { %v3260_v55 = vadd.f32 %v5607_v20, %v5126_v17 }
0x113e   : > { %v3251_v9 = vpop.f32.mrf.mxu0 }
0x113f   : > { %v3252_v61 = vadd.f32 %v5126_v17, %v3251_v9 }
0x1140   : > { %v5608_v12 = vpop.f32.mrf.mxu0 }
0x1141   : > { %v3263_v21 = vadd.f32 %v5608_v12, %v5126_v17 }
0x1142   : > { %v3254_v7 = vpop.f32.mrf.mxu0 }
0x1143   : > { %v3335_v22 = vpack.c.bf16 %v3263_v21, %v3260_v55  ;;  %v3255_v29 = vadd.f32 %v5126_v17, %v3254_v7 }
0x1145   : > { %v3334_v2 = vpack.c.bf16 %v3255_v29, %v3252_v61  ;;  %5747 = vmatprep.subr.msk.bf16.mxu0 %vm7301_vm8, %v3335_v22  ;;  %v3346_v50 = vsel %vm7301_vm8, %v3335_v22, 0 }
0x1146   : > { %5616 = vmatpush3.bf16.xpose.msra.mxu0 %v3346_v50 }
0x1147   : > { %5748 = vmatprep.subr.msk.bf16.mxu0 %vm7301_vm8, %v3334_v2  ;;  %v3343_v32 = vsel %vm7301_vm8, %v3334_v2, 0 }
0x114e   : > { %5618 = vmatpush3.bf16.xpose.msra.mxu0 %v3343_v32 }
0x114f   : > { %5637 = vmatprep.subr.bf16.mxu0 %v5863_v15 }
0x1155   : > { %5620 = vmatmul.mubr.msk.bf16.vlgmr.msra.gmra.mxu0 %vm7301_vm8, %v3333_v19 }
0x1156   : > { %5639 = vmatprep.mubr.msk.bf16.mxu0 %vm7300_vm7, %v6160_v42  ;;  %5638 = vmatpush3.bf16.msra.mxu0 %v5863_v15 }
0x1157   : > { %5649 = vmatprep.subr.bf16.mxu0 %v5864_v33 }
0x115d   : > { %5640 = vmatmul.mubr.msk.bf16.vlgmr.msra.gmra.mxu0 %vm7300_vm7, %v6175_v46 }
0x115e   : > { %5651 = vmatprep.mubr.msk.bf16.mxu0 %vm7300_vm7, %v6160_v42  ;;  %5650 = vmatpush3.bf16.msra.mxu0 %v5864_v33 }
0x1165   : > { %5652 = vmatmul.mubr.msk.bf16.vlgmr.msra.gmra.mxu0 %vm7300_vm7, %v6175_v46 }
0x1215   : > { %v5621_v35 = vpop.f32.mrf.mxu0 }
0x1216   : > { %v3403_v62 = vsel %vm1005_vm0, %v5621_v35, -inf }
0x1217   : > { %v3382_v60 = vpop.f32.mrf.mxu0 }
0x1218   : > { %v3397_v59 = vsel %vm1005_vm0, %v3382_v60, -inf }
0x1219   : > { %3398 = vmax.xlane.f32.xlu0 %v3397_v59  ;;  %v5622_v4 = vpop.f32.mrf.mxu0 }
0x121a   : > { %v3406_v49 = vsel %vm1005_vm0, %v5622_v4, -inf }
0x121b   : > { %v3385_v19 = vpop.f32.mrf.mxu0 }
0x121c   : > { %v3400_v41 = vsel %vm1005_vm0, %v3385_v19, -inf }
0x121d   : > { %3404 = vmax.xlane.f32.xlu0 %v3403_v62  ;;  %v5641_v51 = vpop.f32.mrf.mxu0  ;;  %3401 = vmax.xlane.f32.xlu1 %v3400_v41 }
0x121e   : > { %v6649_v40 = vadd.f32 %v5641_v51, %v5147_v36 }
0x121f   : > { %v3617_v47 = vpop.f32.mrf.mxu0 }
0x1220   : > { %v6654_v34 = vadd.f32 %v5147_v36, %v3617_v47 }
0x1221   : > { %v5642_v53 = vpop.f32.mrf.mxu0  ;;  %3407 = vmax.xlane.f32.xlu1 %v3406_v49 }
0x1222   : > { %v6652_v56 = vadd.f32 %v5642_v53, %v5147_v36 }
0x1223   : > { %v3620_v57 = vpop.f32.mrf.mxu0 }
0x1224   : > { %v3765_v24 = vpack.c.bf16 %v6652_v56, %v6649_v40  ;;  %v6658_v37 = vadd.f32 %v5147_v36, %v3620_v57 }
0x1225   : > { %v5653_v0 = vpop.f32.mrf.mxu0 }
0x1226   : > { %v3764_v63 = vpack.c.bf16 %v6658_v37, %v6654_v34  ;;  %v3758_v8 = vadd.f32 %v5653_v0, %v5161_v5 }
0x1227   : > { %v3749_v43 = vpop.f32.mrf.mxu0 }
0x1228   : > { %v3750_v10 = vadd.f32 %v5161_v5, %v3749_v43 }
0x1229   : > { %v5654_v48 = vpop.f32.mrf.mxu0 }
0x122a   : > { %v3761_v11 = vadd.f32 %v5654_v48, %v5161_v5  ;;  %v5865_v48 = vld [vmem:[%s7282_s10 + $0x28] sm:$0xff]  }
0x122b   : > { %v3752_v58 = vpop.f32.mrf.mxu0 }
0x122c   : > { %v3876_v6 = vpack.c.bf16 %v3761_v11, %v3758_v8  ;;  %v3753_v27 = vadd.f32 %v5161_v5, %v3752_v58  ;;  %v5141_v5 = vld [vmem:[%s7287_s15 + $0x4] sm:$0x1] }
0x122d   : > { %5749 = vmatprep.subr.msk.bf16.mxu1 %vm1757_vm9, %v5141_v5  ;;  %v3511_v43 = vsel %vm1757_vm9, %v5141_v5, 0 }
0x122e   : > { %v3875_v13 = vpack.c.bf16 %v3753_v27, %v3750_v10  ;;  %5663 = vmatprep.subr.bf16.mxu0 %v3876_v6 }
0x122f   : > { %5664 = vmatpush3.bf16.msra.mxu0 %v3876_v6 }
0x1230   : > { %5665 = vmatprep.subr.bf16.mxu0 %v3875_v13 }
0x1233   : > { %5666 = vmatpush3.bf16.msra.mxu0 %v3875_v13  ;;  %v5115_v13 = vld [vmem:[%s7288_s16 + $0x2] ss:$0 sm:$0xff] }
0x1234   : > { %v3131_v37 = vadd.f32 %v5115_v13, %v6616_v26 }
0x12a2   : > { %v3399_v14 = vpop.xlane.xlu0 %3398 }
0x12a3   : > { %v3409_v52 = vsub.f32 %v3382_v60, %v3399_v14  ;;  %v3132_v14 = vadd.f32 %v5115_v13, %v6607_v54  ;;  %v5154_v54 = vld [vmem:[%s7285_s13 + $0x5] ss:$0 sm:$0xff] }
0x12a5   : > { %v3413_v1 = vmul.f32 1.442695, %v3409_v52 }
0x12a6   : > { %v3405_v18 = vpop.xlane.xlu0 %3404  ;;  %v3402_v16 = vpop.xlane.xlu1 %3401 }
0x12a7   : > { %5939 = vpow2.f32 %v3413_v1  ;;  %v3411_v20 = vsub.f32 %v5621_v35, %v3405_v18  ;;  %v3410_v17 = vsub.f32 %v3385_v19, %v3402_v16  ;;  %v3130_v18 = vadd.f32 %v5115_v13, %v6610_v31 }
0x12a9   : > { %v3417_v9 = vmul.f32 1.442695, %v3411_v20  ;;  %v3415_v12 = vmul.f32 1.442695, %v3410_v17 }
0x12aa   : > { %v3408_v55 = vpop.xlane.xlu1 %3407 }
0x12ab   : > { %5941 = vpow2.f32 %v3417_v9  ;;  %v3412_v21 = vsub.f32 %v5622_v4, %v3408_v55 }
0x12ac   : > { %5943 = vpow2.f32 %v3415_v12 }
0x12ad   : > { %v3419_v7 = vmul.f32 1.442695, %v3412_v21 }
0x12af   : > { %5945 = vpow2.f32 %v3419_v7 }
0x12b4   : > { %v5940_v61 = vpop.eup %5939 }
0x12b5   : > { %v3421_v22 = vsel %vm1005_vm0, %v5940_v61, 0.0 }
0x12b6   : > { %3422 = vadd.xlane.f32.xlu0 %v3421_v22 }
0x12b8   : > { %v5942_v29 = vpop.eup %5941 }
0x12b9   : > { %v5944_v2 = vpop.eup %5943  ;;  %v3427_v50 = vsel %vm1005_vm0, %v5942_v29, 0.0 }
0x12ba   : > { %3428 = vadd.xlane.f32.xlu0 %v3427_v50  ;;  %v3424_v15 = vsel %vm1005_vm0, %v5944_v2, 0.0 }
0x12bb   : > { %3425 = vadd.xlane.f32.xlu1 %v3424_v15 }
0x12bc   : > { %v5946_v32 = vpop.eup %5945 }
0x12bd   : > { %v3430_v33 = vsel %vm1005_vm0, %v5946_v32, 0.0 }
0x12bf   : > { %3431 = vadd.xlane.f32.xlu1 %v3430_v33 }
0x133f   : > { %v3423_v35 = vpop.xlane.xlu0 %3422 }
0x1340   : > { %5947 = vrcp.f32 %v3423_v35 }
0x1343   : > { %v3429_v60 = vpop.xlane.xlu0 %3428 }
0x1344   : > { %v3426_v59 = vpop.xlane.xlu1 %3425 }
0x1345   : > { %5949 = vrcp.f32 %v3426_v59 }
0x1346   : > { %5951 = vrcp.f32 %v3429_v60 }
0x1348   : > { %v3432_v4 = vpop.xlane.xlu1 %3431 }
0x1349   : > { %5953 = vrcp.f32 %v3432_v4 }
0x134d   : > { %v5948_v19 = vpop.eup %5947 }
0x134e   : > { %v3434_v62 = vmul.f32 %v5948_v19, %v5940_v61 }
0x1352   : > { %v5950_v36 = vpop.eup %5949 }
0x1353   : > { %v3436_v41 = vmul.f32 %v5950_v36, %v5944_v2  ;;  %v5952_v51 = vpop.eup %5951 }
0x1354   : > { %v3438_v53 = vmul.f32 %v5952_v51, %v5942_v29 }
0x1355   : > { %v3441_v47 = vpack.c.bf16 %v3436_v41, %v3434_v62 }
0x1356   : > { %v5954_v49 = vpop.eup %5953 }
0x1357   : > { %5627 = vmatprep.mubr.msk.bf16.mxu1 %vm1005_vm0, %v3441_v47  ;;  %v3440_v57 = vmul.f32 %v5954_v49, %v5946_v32 }
0x1359   : > { %v3442_v0 = vpack.c.bf16 %v3440_v57, %v3438_v53 }
0x135b   : > { %5628 = vmatmul.mubr.msk.bf16.vlgmr.msra.gmra.mxu1 %vm1005_vm0, %v3442_v0 }
0x135c   : > { %5632 = vmatpush3.bf16.msra.mxu1 %v3511_v43 }
0x135d   : > { %5643 = vmatprep.subr.bf16.mxu1 %v5865_v48 }
0x141b   : > { %v5629_v8 = vpop.f32.mrf.mxu1 }
0x141d   : > { %v3485_v11 = vpop.f32.mrf.mxu1 }
0x141f   : > { %v5630_v58 = vpop.f32.mrf.mxu1 }
0x1420   : > { %v3501_v27 = vpack.c.bf16 %v5630_v58, %v5629_v8 }
0x1421   : > { %v3488_v10 = vpop.f32.mrf.mxu1 }
0x1422   : > { %v3500_v6 = vpack.c.bf16 %v3488_v10, %v3485_v11 }
0x1424   : > { %5633 = vmatprep.mubr.msk.bf16.mxu1 %vm7301_vm8, %v3500_v6 }
0x1425   : > { %5634 = vmatmul.mubr.msk.bf16.vlgmr.msra.gmra.mxu1 %vm7301_vm8, %v3501_v27 }
0x1426   : > { %5644 = vmatpush3.bf16.msra.mxu1 %v5865_v48  ;;  %5645 = vmatprep.mubr.msk.bf16.mxu1 %vm7300_vm7, %v6160_v42 }
0x142d   : > { %5646 = vmatmul.mubr.msk.bf16.vlgmr.msra.gmra.mxu1 %vm7300_vm7, %v6175_v46  ;;  %v3133_v46 = vadd.f32 %v5115_v13, %v6613_v3 }
0x142e   : > { %5659 = vmatprep.mubr.msk.bf16.mxu1 %vm7301_vm8, %v3764_v63 }
0x14e5   : > { %v5635_v52 = vpop.f32.mrf.mxu1 }
0x14e6   : > { %v6693_v1 = vadd.f32 %v5635_v52, %v3132_v14 }
0x14e7   : > { %v3547_v42 = vpop.f32.mrf.mxu1 }
0x14e8   : > { %v6696_v16 = vadd.f32 %v3547_v42, %v3130_v18 }
0x14e9   : > { %v5636_v20 = vpop.f32.mrf.mxu1 }
0x14ea   : > { %v6699_v34 = vadd.f32 %v5636_v20, %v3133_v46 }
0x14eb   : > { %v3550_v63 = vpop.f32.mrf.mxu1 }
0x14ec   : > { %v6702_v17 = vadd.f32 %v3550_v63, %v3131_v37 }
0x14ed   : > { %v5647_v9 = vpop.f32.mrf.mxu1 }
0x14ee   : > { %v3692_v55 = vadd.f32 %v5647_v9, %v5154_v54 }
0x14ef   : > { %v3683_v12 = vpop.f32.mrf.mxu1 }
0x14f0   : > { %v3684_v61 = vadd.f32 %v5154_v54, %v3683_v12 }
0x14f1   : > { %v5648_v31 = vpop.f32.mrf.mxu1 }
0x14f2   : > { %v3695_v21 = vadd.f32 %v5648_v31, %v5154_v54  ;;  %v5169_v31 = vld [vmem:[%s7287_s15 + $0x5] sm:$0x1] }
0x14f3   : > { %v3686_v7 = vpop.f32.mrf.mxu1  ;;  %5752 = vmatprep.subr.msk.bf16.mxu0 %vm1757_vm9, %v5169_v31 }
0x14f4   : > { %v3767_v3 = vpack.c.bf16 %v3695_v21, %v3692_v55  ;;  %v3687_v22 = vadd.f32 %v5154_v54, %v3686_v7  ;;  %v3943_v55 = vsel %vm1757_vm9, %v5169_v31, 0  ;;  %v6733_v21 = vld [vmem:[%s7328_s23 + $0x10] sm:$0xff]  ;;  %v6738_v7 = vld [vmem:[%s7328_s23 + $0x18] sm:$0xff] }
0x14f6   : > { %v3766_v29 = vpack.c.bf16 %v3687_v22, %v3684_v61  ;;  %5750 = vmatprep.subr.msk.bf16.mxu1 %vm7301_vm8, %v3767_v3  ;;  %v3778_v26 = vsel %vm7301_vm8, %v3767_v3, 0  ;;  %v715_v61 = vld [vmem:[%s7329_s2 + $0x10] sm:$0xff]  ;;  %v5979_v3 = vmov 0   ;;  %v716_v22 = vld [vmem:[%s7329_s2 + $0x18] sm:$0xff] }
0x14f7   : > { %5656 = vmatpush3.bf16.xpose.msra.mxu1 %v3778_v26  ;;  %5769 = vset.pattern.permute.xlu1 %v5979_v3  ;;  %v720_v26 = vadd.s32 4294967295, %v6738_v7 }
0x14f8   : > { %5751 = vmatprep.subr.msk.bf16.mxu1 %vm7301_vm8, %v3766_v29  ;;  %v3775_v2 = vsel %vm7301_vm8, %v3766_v29, 0  ;;  %v719_v29 = vadd.s32 4294967295, %v6733_v21  ;;  %5763 = vset.pattern.permute.xlu0 %v5979_v3 }
0x14f9   : > { %vm724_vm11 = vcmp.ge.s32.totalorder %v720_v26, 0  ;;  %vm728_vm13 = vcmp.lt.s32.totalorder %v720_v26, 4 }
0x14fa   : > { %vm723_vm10 = vcmp.ge.s32.totalorder %v719_v29, 0  ;;  %vm727_vm12 = vcmp.lt.s32.totalorder %v719_v29, 4  ;;  %vm6764_vm3 = vmand %vm724_vm11, %vm728_vm13 }
0x14fb   : > { %vm6760_vm14 = vmand %vm723_vm10, %vm727_vm12 }
0x14ff   : > { %5658 = vmatpush3.bf16.xpose.msra.mxu1 %v3775_v2  ;;  %v735_v2 = vadd.s32 4294967295, %v715_v61 }
0x1501   : > { %vm739_vm15 = vcmp.ge.s32.totalorder %v735_v2, 0  ;;  %vm743_vm1 = vcmp.lt.s32.totalorder %v735_v2, 8 }
0x1502   : > { %vm6768_vm4 = vmand %vm739_vm15, %vm743_vm1 }
0x1503   : > { %vm751_vm10 = vmand %vm6760_vm14, %vm6768_vm4 }
0x1506   : > { %5660 = vmatmul.mubr.msk.bf16.vlgmr.msra.gmra.mxu1 %vm7301_vm8, %v3765_v24 }
0x15c6   : > { %v5661_v50 = vpop.f32.mrf.mxu1 }
0x15c7   : > { %v3835_v60 = vsel %vm1005_vm0, %v5661_v50, -inf }
0x15c8   : > { %v3814_v15 = vpop.f32.mrf.mxu1 }
0x15c9   : > { %v3829_v32 = vsel %vm1005_vm0, %v3814_v15, -inf }
0x15ca   : > { %3830 = vmax.xlane.f32.xlu0 %v3829_v32  ;;  %v5662_v33 = vpop.f32.mrf.mxu1  ;;  %v736_v32 = vadd.s32 4294967295, %v716_v22 }
0x15cb   : > { %v3838_v4 = vsel %vm1005_vm0, %v5662_v33, -inf }
0x15cc   : > { %v3817_v35 = vpop.f32.mrf.mxu1  ;;  %vm744_vm2 = vcmp.lt.s32.totalorder %v736_v32, 8 }
0x15cd   : > { %v3832_v59 = vsel %vm1005_vm0, %v3817_v35, -inf }
0x15ce   : > { %3836 = vmax.xlane.f32.xlu0 %v3835_v60  ;;  %3833 = vmax.xlane.f32.xlu1 %v3832_v59 }
0x15d2   : > { %3839 = vmax.xlane.f32.xlu1 %v3838_v4  ;;  %v7334_v4 = vmov 0 }
0x15d3   : > { %v7335_v4 = vsel %vm6768_vm4, 4294967295, %v7334_v4 }
0x1653   : > { %v3831_v19 = vpop.xlane.xlu0 %3830 }
0x1654   : > { %v3841_v40 = vsub.f32 %v3814_v15, %v3831_v19  ;;  %v6756_v15 = vld [vmem:[%s7328_s23 + $0x8] sm:$0xff]  ;;  %v713_v19 = vld [vmem:[%s7329_s2] sm:$0xff] }
0x1655   : > { %vm761_vm15 = vcmp.ge.s32.totalorder %v713_v19, 0  ;;  %v850_v60 = vadd.s32 1, %v6756_v15 }
0x1656   : > { %v3845_v56 = vmul.f32 1.442695, %v3841_v40  ;;  %v7336_v40 = vmov 0 }
0x1657   : > { %v3837_v24 = vpop.xlane.xlu0 %3836  ;;  %v3834_v36 = vpop.xlane.xlu1 %3833 }
0x1658   : > { %5955 = vpow2.f32 %v3845_v56  ;;  %v3843_v62 = vsub.f32 %v5661_v50, %v3837_v24  ;;  %v3842_v41 = vsub.f32 %v3817_v35, %v3834_v36  ;;  %v6751_v50 = vld [vmem:[%s7328_s23] sm:$0xff]  ;;  %v718_v35 = vadd.s32 4294967295, %v6756_v15  ;;  %v714_v56 = vld [vmem:[%s7329_s2 + $0x8] sm:$0xff] }
0x1659   : > { %v5980_v24 = vmov 0.0   ;;  %vm766_vm7 = vcmp.lt.s32.totalorder %v714_v56, 8 }
0x165a   : > { %v3849_v51 = vmul.f32 1.442695, %v3843_v62  ;;  %v3847_v47 = vmul.f32 1.442695, %v3842_v41  ;;  %vm722_vm11 = vcmp.ge.s32.totalorder %v718_v35, 0  ;;  %vm726_vm12 = vcmp.lt.s32.totalorder %v718_v35, 4 }
0x165b   : > { %v3840_v49 = vpop.xlane.xlu1 %3839  ;;  %v4958_v36 = vsel %vm751_vm10, 1.0, %v5980_v24  ;;  %v7338_v41 = vmov 0  ;;  %vm6796_vm8 = vmand %vm722_vm11, %vm726_vm12  ;;  %vm764_vm12 = vcmp.ge.s32.totalorder %v716_v22, 0  ;;  %v849_v35 = vadd.s32 1, %v6751_v50 }
0x165c   : > { %5957 = vpow2.f32 %v3849_v51  ;;  %v3844_v53 = vsub.f32 %v5662_v33, %v3840_v49  ;;  %v717_v33 = vadd.s32 4294967295, %v6751_v50  ;;  %v7342_v49 = vmov 0 }
0x165d   : > { %5959 = vpow2.f32 %v3847_v47  ;;  %v7340_v47 = vmov 0 }
0x165e   : > { %v3851_v57 = vmul.f32 1.442695, %v3844_v53  ;;  %vm721_vm6 = vcmp.ge.s32.totalorder %v717_v33, 0  ;;  %vm725_vm9 = vcmp.lt.s32.totalorder %v717_v33, 4  ;;  %v7341_v47 = vsel %vm6796_vm8, 4294967295, %v7340_v47 }
0x165f   : > { %vm6792_vm1 = vmand %vm721_vm6, %vm725_vm9  ;;  %v7344_v53 = vmov 0  ;;  %vm763_vm6 = vcmp.ge.s32.totalorder %v715_v61, 0  ;;  %vm767_vm9 = vcmp.lt.s32.totalorder %v715_v61, 8 }
0x1660   : > { %5961 = vpow2.f32 %v3851_v57  ;;  %v7339_v41 = vsel %vm6792_vm1, 4294967295, %v7338_v41  ;;  %v785_v57 = vadd.s32 1, %v713_v19 }
0x1665   : > { %v5956_v0 = vpop.eup %5955 }
0x1666   : > { %v3853_v5 = vsel %vm1005_vm0, %v5956_v0, 0.0 }
0x1667   : > { %3854 = vadd.xlane.f32.xlu0 %v3853_v5 }
0x1669   : > { %v5958_v43 = vpop.eup %5957 }
0x166a   : > { %v5960_v48 = vpop.eup %5959  ;;  %v3859_v8 = vsel %vm1005_vm0, %v5958_v43, 0.0 }
0x166b   : > { %3860 = vadd.xlane.f32.xlu0 %v3859_v8  ;;  %v3856_v11 = vsel %vm1005_vm0, %v5960_v48, 0.0 }
0x166c   : > { %3857 = vadd.xlane.f32.xlu1 %v3856_v11  ;;  %v7348_v11 = vmov 0 }
0x166d   : > { %v5962_v58 = vpop.eup %5961 }
0x166e   : > { %v3862_v10 = vsel %vm1005_vm0, %v5962_v58, 0.0 }
0x1670   : > { %3863 = vadd.xlane.f32.xlu1 %v3862_v10  ;;  %v788_v10 = vadd.s32 1, %v716_v22 }
0x16f0   : > { %v3855_v6 = vpop.xlane.xlu0 %3854 }
0x16f1   : > { %5963 = vrcp.f32 %v3855_v6 }
0x16f4   : > { %v3861_v27 = vpop.xlane.xlu0 %3860 }
0x16f5   : > { %v3858_v13 = vpop.xlane.xlu1 %3857 }
0x16f6   : > { %5965 = vrcp.f32 %v3858_v13 }
0x16f7   : > { %5967 = vrcp.f32 %v3861_v27 }
0x16f9   : > { %v3864_v14 = vpop.xlane.xlu1 %3863 }
0x16fa   : > { %5969 = vrcp.f32 %v3864_v14 }
0x16fe   : > { %v5964_v52 = vpop.eup %5963 }
0x16ff   : > { %v3866_v42 = vmul.f32 %v5964_v52, %v5956_v0  ;;  %v786_v0 = vadd.s32 1, %v714_v56 }
0x1703   : > { %v5966_v18 = vpop.eup %5965 }
0x1704   : > { %v3868_v46 = vmul.f32 %v5966_v18, %v5960_v48  ;;  %v5968_v20 = vpop.eup %5967  ;;  %v7346_v48 = vmov 0  ;;  %v733_v18 = vadd.s32 4294967295, %v713_v19 }
0x1705   : > { %v3870_v9 = vmul.f32 %v5968_v20, %v5958_v43 }
0x1706   : > { %v3873_v37 = vpack.c.bf16 %v3868_v46, %v3866_v42  ;;  %v734_v42 = vadd.s32 4294967295, %v714_v56 }
0x1707   : > { %v5970_v63 = vpop.eup %5969 }
0x1708   : > { %5667 = vmatprep.mubr.msk.bf16.mxu0 %vm1005_vm0, %v3873_v37  ;;  %v3872_v54 = vmul.f32 %v5970_v63, %v5962_v58  ;;  %v787_v58 = vadd.s32 1, %v715_v61  ;;  %v7354_v37 = vmov 0 }
0x170a   : > { %v3874_v12 = vpack.c.bf16 %v3872_v54, %v3870_v9  ;;  %v7356_v9 = vmov 0 }
0x170c   : > { %5668 = vmatmul.mubr.msk.bf16.vlgmr.msra.gmra.mxu0 %vm1005_vm0, %v3874_v12  ;;  %vm740_vm0 = vcmp.ge.s32.totalorder %v736_v32, 0 }
0x170d   : > { %5672 = vmatpush3.bf16.msra.mxu0 %v3943_v55  ;;  %vm6775_vm5 = vmand %vm740_vm0, %vm744_vm2  ;;  %vm765_vm0 = vcmp.lt.s32.totalorder %v713_v19, 8  ;;  %vm762_vm2 = vcmp.ge.s32.totalorder %v714_v56, 0 }
0x170e   : > { %v7337_v40 = vsel %vm6775_vm5, 4294967295, %v7336_v40  ;;  %vm752_vm13 = vmand %vm6764_vm3, %vm6775_vm5  ;;  %vm794_vm5 = vcmp.lt.s32.totalorder %v786_v0, 8 }
0x170f   : > { %v4959_v62 = vsel %vm752_vm13, 1.0, %v5980_v24  ;;  %vm6800_vm4 = vmand %vm761_vm15, %vm765_vm0  ;;  %vm768_vm13 = vcmp.lt.s32.totalorder %v716_v22, 8  ;;  %v7045_v22 = vld [vmem:[%s7290_s18 + $0x10] sm:$0xff]  }
0x1710   : > { %v5770_v51 = vpack.i.bf16 %v4959_v62, %v4958_v36  ;;  %v7343_v49 = vsel %vm6800_vm4, 4294967295, %v7342_v49  ;;  %vm6804_vm10 = vmand %vm762_vm2, %vm766_vm7  ;;  %vm789_vm2 = vcmp.ge.s32.totalorder %v785_v57, 0 }
0x1711   : > { %v7345_v53 = vsel %vm6804_vm10, 4294967295, %v7344_v53  ;;  %vm773_vm11 = vmand %vm6792_vm1, %vm6800_vm4  ;;  %vm793_vm4 = vcmp.lt.s32.totalorder %v785_v57, 8 }
0x1712   : > { %5771 = vperm.xlu1 %5769, %v5770_v51   ;;  %vm774_vm15 = vmand %vm6796_vm8, %vm6804_vm10  ;;  %v4960_v5 = vsel %vm773_vm11, 1.0, %v5980_v24  ;;  %vm790_vm11 = vcmp.ge.s32.totalorder %v786_v0, 0 }
0x1713   : > { %v4961_v43 = vsel %vm774_vm15, 1.0, %v5980_v24  ;;  %vm6818_vm7 = vmand %vm763_vm6, %vm767_vm9  ;;  %vm795_vm15 = vcmp.lt.s32.totalorder %v787_v58, 8 }
0x1714   : > { %v7347_v48 = vsel %vm6818_vm7, 4294967295, %v7346_v48  ;;  %v5775_v8 = vpack.i.bf16 %v4961_v43, %v4960_v5  ;;  %vm6822_vm0 = vmand %vm764_vm12, %vm768_vm13  ;;  %vm791_vm13 = vcmp.ge.s32.totalorder %v787_v58, 0  ;;  %v851_v5 = vadd.s32 1, %v6733_v21 }
0x1715   : > { %v7349_v11 = vsel %vm6822_vm0, 4294967295, %v7348_v11  ;;  %vm775_vm10 = vmand %vm6760_vm14, %vm6818_vm7  ;;  %vm796_vm7 = vcmp.lt.s32.totalorder %v788_v10, 8 }
0x1716   : > { %5776 = vperm.xlu1 %5769, %v5775_v8   ;;  %vm776_vm6 = vmand %vm6764_vm3, %vm6822_vm0  ;;  %v4962_v6 = vsel %vm775_vm10, 1.0, %v5980_v24  ;;  %vm792_vm10 = vcmp.ge.s32.totalorder %v788_v10, 0 }
0x1717   : > { %v4963_v27 = vsel %vm776_vm6, 1.0, %v5980_v24  ;;  %vm6836_vm9 = vmand %vm789_vm2, %vm793_vm4  ;;  %vm741_vm6 = vcmp.lt.s32.totalorder %v733_v18, 8 }
0x1718   : > { %v5780_v14 = vpack.i.bf16 %v4963_v27, %v4962_v6  ;;  %vm6840_vm12 = vmand %vm790_vm11, %vm794_vm5  ;;  %vm737_vm11 = vcmp.ge.s32.totalorder %v733_v18, 0 }
0x1719   : > { %vm801_vm0 = vmand %vm6792_vm1, %vm6836_vm9  ;;  %vm738_vm1 = vcmp.ge.s32.totalorder %v734_v42, 0 }
0x171a   : > { %5781 = vperm.xlu1 %5769, %v5780_v14   ;;  %vm802_vm4 = vmand %vm6796_vm8, %vm6840_vm12  ;;  %v4964_v46 = vsel %vm801_vm0, 1.0, %v5980_v24  ;;  %vm742_vm0 = vcmp.lt.s32.totalorder %v734_v42, 8 }
0x171b   : > { %v4965_v20 = vsel %vm802_vm4, 1.0, %v5980_v24  ;;  %vm6854_vm5 = vmand %vm791_vm13, %vm795_vm15  ;;  %vm817_vm15 = vcmp.lt.s32.totalorder %v6751_v50, 4  ;;  %vm818_vm4 = vcmp.lt.s32.totalorder %v6756_v15, 4 }
0x171c   : > { %v7355_v37 = vsel %vm6854_vm5, 4294967295, %v7354_v37  ;;  %v5785_v63 = vpack.i.bf16 %v4965_v20, %v4964_v46  ;;  %vm6858_vm2 = vmand %vm792_vm10, %vm796_vm7  ;;  %vm813_vm7 = vcmp.ge.s32.totalorder %v6751_v50, 0 }
0x171d   : > { %v7357_v9 = vsel %vm6858_vm2, 4294967295, %v7356_v9  ;;  %vm803_vm8 = vmand %vm6760_vm14, %vm6854_vm5  ;;  %vm814_vm14 = vcmp.ge.s32.totalorder %v6756_v15, 0 }
0x171e   : > { %5786 = vperm.xlu1 %5769, %v5785_v63   ;;  %vm804_vm13 = vmand %vm6764_vm3, %vm6858_vm2  ;;  %v4966_v54 = vsel %vm803_vm8, 1.0, %v5980_v24 }
0x171f   : > { %v4967_v12 = vsel %vm804_vm13, 1.0, %v5980_v24  ;;  %vm6874_vm10 = vmand %vm737_vm11, %vm741_vm6  ;;  %vm815_vm11 = vcmp.ge.s32.totalorder %v6733_v21, 0  ;;  %vm819_vm6 = vcmp.lt.s32.totalorder %v6733_v21, 4  ;;  %vm820_vm13 = vcmp.lt.s32.totalorder %v6738_v7, 4 }
0x1720   : > { %v5790_v55 = vpack.i.bf16 %v4967_v12, %v4966_v54  ;;  %vm6880_vm5 = vmand %vm738_vm1, %vm742_vm0  ;;  %vm816_vm0 = vcmp.ge.s32.totalorder %v6738_v7, 0 }
0x1721   : > { %vm6884_vm8 = vmand %vm813_vm7, %vm817_vm15 }
0x1722   : > { %5791 = vperm.xlu1 %5769, %v5790_v55   ;;  %vm6888_vm3 = vmand %vm814_vm14, %vm818_vm4  ;;  %vm7370_vm4 = vnez %v7335_v4 }
0x1723   : > { %vm825_vm1 = vmand %vm6884_vm8, %vm6874_vm10 }
0x1724   : > { %vm826_vm7 = vmand %vm6888_vm3, %vm6880_vm5  ;;  %v4968_v29 = vsel %vm825_vm1, 1.0, %v5980_v24 }
0x1725   : > { %v4969_v26 = vsel %vm826_vm7, 1.0, %v5980_v24  ;;  %vm6906_vm15 = vmand %vm815_vm11, %vm819_vm6  ;;  %vm7371_vm11 = vnez %v7337_v40  ;;  %vm857_vm7 = vcmp.lt.s32.totalorder %v849_v35, 4 }
0x1726   : > { %v5795_v32 = vpack.i.bf16 %v4969_v26, %v4968_v29  ;;  %vm6910_vm14 = vmand %vm816_vm0, %vm820_vm13  ;;  %vm853_vm13 = vcmp.ge.s32.totalorder %v849_v35, 0  ;;  %v7050_v29 = vld [vmem:[%s7290_s18 + $0x8] sm:$0xff]  }
0x1727   : > { %vm827_vm2 = vmand %vm6906_vm15, %vm7370_vm4  ;;  %vm858_vm4 = vcmp.lt.s32.totalorder %v850_v60, 4 }
0x1728   : > { %5796 = vperm.xlu1 %5769, %v5795_v32   ;;  %vm828_vm6 = vmand %vm6910_vm14, %vm7371_vm11  ;;  %v4970_v59 = vsel %vm827_vm2, 1.0, %v5980_v24  ;;  %vm7372_vm2 = vnez %v7339_v41  ;;  %vm854_vm11 = vcmp.ge.s32.totalorder %v850_v60, 0 }
0x1729   : > { %v4971_v19 = vsel %vm828_vm6, 1.0, %v5980_v24  ;;  %vm837_vm1 = vmand %vm6884_vm8, %vm6836_vm9  ;;  %vm7373_vm8 = vnez %v7341_v47  ;;  %v852_v47 = vadd.s32 1, %v6738_v7 }
0x172a   : > { %v5800_v50 = vpack.i.bf16 %v4971_v19, %v4970_v59  ;;  %vm838_vm0 = vmand %vm6888_vm3, %vm6840_vm12  ;;  %v4972_v15 = vsel %vm837_vm1, 1.0, %v5980_v24 }
0x172b   : > { %v4973_v56 = vsel %vm838_vm0, 1.0, %v5980_v24  ;;  %vm749_vm6 = vmand %vm7372_vm2, %vm6874_vm10 }
0x172c   : > { %5801 = vperm.xlu1 %5769, %v5800_v50   ;;  %v5805_v36 = vpack.i.bf16 %v4973_v56, %v4972_v15  ;;  %vm750_vm3 = vmand %vm7373_vm8, %vm6880_vm5  ;;  %v4956_v62 = vsel %vm749_vm6, 1.0, %v5980_v24  ;;  %vm855_vm6 = vcmp.ge.s32.totalorder %v851_v5, 0  ;;  %vm859_vm8 = vcmp.lt.s32.totalorder %v851_v5, 4 }
0x172d   : > { %v4957_v51 = vsel %vm750_vm3, 1.0, %v5980_v24  ;;  %vm6946_vm1 = vmand %vm853_vm13, %vm857_vm7 }
0x172e   : > { %v5764_v0 = vpack.i.bf16 %v4957_v51, %v4956_v62  ;;  %vm6950_vm0 = vmand %vm854_vm11, %vm858_vm4  ;;  %vm7378_vm4 = vnez %v7355_v37 }
0x172f   : > { %vm865_vm2 = vmand %vm6946_vm1, %vm6874_vm10  ;;  %vm7379_vm10 = vnez %v7357_v9 }
0x1730   : > { %5806 = vperm.xlu1 %5769, %v5805_v36   ;;  %5765 = vperm.xlu0 %5763, %v5764_v0   ;;  %vm866_vm13 = vmand %vm6950_vm0, %vm6880_vm5  ;;  %v4976_v43 = vsel %vm865_vm2, 1.0, %v5980_v24  ;;  %vm7380_vm5 = vnez %v7343_v49  ;;  %vm856_vm2 = vcmp.ge.s32.totalorder %v852_v47, 0 }
0x1731   : > { %v4977_v8 = vsel %vm866_vm13, 1.0, %v5980_v24  ;;  %vm839_vm11 = vmand %vm6906_vm15, %vm7378_vm4  ;;  %vm860_vm13 = vcmp.lt.s32.totalorder %v852_v47, 4  ;;  %vm7381_vm15 = vnez %v7345_v53 }
0x1732   : > { %v5815_v21 = vpack.i.bf16 %v4977_v8, %v4976_v43  ;;  %vm840_vm7 = vmand %vm6910_vm14, %vm7379_vm10  ;;  %v4974_v7 = vsel %vm839_vm11, 1.0, %v5980_v24  ;;  %v4019_v8 = vlaneseq }
0x1733   : > { %v4975_v58 = vsel %vm840_vm7, 1.0, %v5980_v24  ;;  %vm877_vm3 = vmand %vm6946_vm1, %vm7380_vm5  ;;  %vm7386_vm5 = vnez %v7335_v4 }
0x1734   : > { %5816 = vperm.xlu1 %5769, %v5815_v21   ;;  %v5810_v10 = vpack.i.bf16 %v4975_v58, %v4974_v7  ;;  %vm878_vm14 = vmand %vm6950_vm0, %vm7381_vm15  ;;  %v4980_v6 = vsel %vm877_vm3, 1.0, %v5980_v24  ;;  %vm7387_vm3 = vnez %v7337_v40  ;;  %vm7389_vm15 = vnez %v7349_v11 }
0x1735   : > { %v4981_v27 = vsel %vm878_vm14, 1.0, %v5980_v24  ;;  %vm6986_vm11 = vmand %vm855_vm6, %vm859_vm8 }
0x1736   : > { %5811 = vperm.xlu0 %5763, %v5810_v10   ;;  %v5825_v49 = vpack.i.bf16 %v4981_v27, %v4980_v6  ;;  %vm6990_vm7 = vmand %vm856_vm2, %vm860_vm13  ;;  %vm7388_vm13 = vnez %v7347_v48 }
0x1737   : > { %vm867_vm10 = vmand %vm6986_vm11, %vm7386_vm5 }
0x1738   : > { %5826 = vperm.xlu1 %5769, %v5825_v49   ;;  %vm868_vm6 = vmand %vm6990_vm7, %vm7387_vm3  ;;  %v4978_v53 = vsel %vm867_vm10, 1.0, %v5980_v24 }
0x1739   : > { %v4979_v42 = vsel %vm868_vm6, 1.0, %v5980_v24  ;;  %vm889_vm8 = vmand %vm6946_vm1, %vm6836_vm9  ;;  %vm7390_vm1 = vnez %v7357_v9  ;;  %v5867_v9 = vld [vmem:[%s7290_s18 + $0x20] sm:$0xff]  }
0x173a   : > { %v5820_v46 = vpack.i.bf16 %v4979_v42, %v4978_v53  ;;  %vm890_vm2 = vmand %vm6950_vm0, %vm6840_vm12  ;;  %v4984_v4 = vsel %vm889_vm8, 1.0, %v5980_v24  ;;  %5683 = vmatprep.subr.bf16.mxu0 %v5867_v9 }
0x173b   : > { %v4985_v40 = vsel %vm890_vm2, 1.0, %v5980_v24  ;;  %vm879_vm10 = vmand %vm6986_vm11, %vm7388_vm13  ;;  %vm7393_vm2 = vcmask 130048  }
0x173c   : > { %5821 = vperm.xlu0 %5763, %v5820_v46   ;;  %v5835_v13 = vpack.i.bf16 %v4985_v40, %v4984_v4  ;;  %vm880_vm9 = vmand %vm6990_vm7, %vm7389_vm15  ;;  %v4982_v52 = vsel %vm879_vm10, 1.0, %v5980_v24 }
0x173d   : > { %v4983_v20 = vsel %vm880_vm9, 1.0, %v5980_v24  ;;  %vm891_vm12 = vmand %vm6986_vm11, %vm7378_vm4  ;;  %vm7391_vm4 = vcmask 15360  }
0x173e   : > { %5836 = vperm.xlu1 %5769, %v5835_v13   ;;  %v5830_v48 = vpack.i.bf16 %v4983_v20, %v4982_v52  ;;  %vm892_vm0 = vmand %vm6990_vm7, %vm7390_vm1  ;;  %v4986_v11 = vsel %vm891_vm12, 1.0, %v5980_v24 }
0x173f   : > { %v4987_v63 = vsel %vm892_vm0, 1.0, %v5980_v24  ;;  %vm7392_vm14 = vmmov %vm7391_vm4  ;;  %v5866_v24 = vld [vmem:[%s7290_s18] sm:$0xff]  }
0x1740   : > { %5831 = vperm.xlu0 %5763, %v5830_v48   ;;  %v5840_v54 = vpack.i.bf16 %v4987_v63, %v4986_v11  ;;  %5677 = vmatprep.subr.bf16.mxu1 %v5866_v24  ;;  %v7104_v11 = vshrl.u32 %v4019_v8, 7  ;;  %vm7394_vm13 = vmmov %vm7393_vm2 }
0x1741   : > { %5678 = vmatpush3.bf16.msra.mxu1 %v5866_v24  ;;  %vm7400_vm10 = vmmov %vm7393_vm2 }
0x1742   : > { %5689 = vmatprep.subr.bf16.mxu1 %v7050_v29  ;;  %vm4021_vm5 = vcmp.lt.s32.totalorder %v7104_v11, 1  ;;  %vm4274_vm3 = vcmp.lt.s32.totalorder %v7104_v11, 7  ;;  %vm7403_vm15 = vmmov %vm7393_vm2 }
0x1743   : > { %vm7408_vm9 = vmmov %vm7393_vm2 }
0x1744   : > { %5841 = vperm.xlu0 %5763, %v5840_v54   ;;  %vm7411_vm12 = vmmov %vm7393_vm2 }
0x1745   : > { %vm7413_vm1 = vmmov %vm7393_vm2 }
0x1746   : > { %vm7414_vm0 = vmmov %vm7413_vm1 }
0x178d   : > { %v7054_v26 = vpop.permute.xlu1 %5771 }
0x178e   : > { %v5773_v57 = vunpack.i.l.bf16 %v7054_v26 }
0x1791   : > { %v7056_v2 = vpop.permute.xlu1 %5776 }
0x1792   : > { %v5779_v0 = vunpack.i.h.bf16 %v7056_v2  ;;  %v5778_v41 = vunpack.i.l.bf16 %v7056_v2 }
0x1795   : > { %v7058_v32 = vpop.permute.xlu1 %5781 }
0x1796   : > { %v5784_v5 = vunpack.i.h.bf16 %v7058_v32  ;;  %v5783_v47 = vunpack.i.l.bf16 %v7058_v32 }
0x1799   : > { %v7060_v33 = vpop.permute.xlu1 %5786 }
0x179a   : > { %v5789_v43 = vunpack.i.h.bf16 %v7060_v33  ;;  %v5788_v7 = vunpack.i.l.bf16 %v7060_v33 }
0x179d   : > { %v7062_v35 = vpop.permute.xlu1 %5791 }
0x179e   : > { %v5794_v58 = vunpack.i.h.bf16 %v7062_v35 }
0x17a3   : > { %v7064_v60 = vpop.permute.xlu1 %5796 }
0x17a7   : > { %v7066_v59 = vpop.permute.xlu1 %5801 }
0x17ab   : > { %v7068_v19 = vpop.permute.xlu0 %5765  ;;  %v7070_v50 = vpop.permute.xlu1 %5806 }
0x17ac   : > { %v5808_v42 = vunpack.i.l.bf16 %v7070_v50  ;;  %v5767_v4 = vunpack.i.l.bf16 %v7068_v19 }
0x17af   : > { %v7074_v56 = vpop.permute.xlu1 %5816 }
0x17b1   : > { %v7072_v15 = vpop.permute.xlu0 %5811 }
0x17b2   : > { %v5814_v20 = vunpack.i.h.bf16 %v7072_v15  ;;  %v5813_v63 = vunpack.i.l.bf16 %v7072_v15 }
0x17b3   : > { %v7078_v62 = vpop.permute.xlu1 %5826 }
0x17b4   : > { %v5829_v54 = vunpack.i.h.bf16 %v7078_v62 }
0x17b7   : > { %v7076_v36 = vpop.permute.xlu0 %5821 }
0x17b9   : > { %v7095_v53 = vpop.permute.xlu1 %5836 }
0x17bb   : > { %v5832_v21 = vpop.permute.xlu0 %5831 }
0x17bc   : > { %v5833_v40 = vunpack.i.l.bf16 %v5832_v21 }
0x17cc   : > { %v5669_v12 = vpop.f32.mrf.mxu0 }
0x17ce   : > { %v3917_v31 = vpop.f32.mrf.mxu0 }
0x17d0   : > { %v5670_v37 = vpop.f32.mrf.mxu0 }
0x17d1   : > { %v3933_v3 = vpack.c.bf16 %v5670_v37, %v5669_v12  ;;  %v5839_v37 = vunpack.i.h.bf16 %v7095_v53 }
0x17d2   : > { %v3920_v55 = vpop.f32.mrf.mxu0 }
0x17d3   : > { %v3932_v61 = vpack.c.bf16 %v3920_v55, %v3917_v31 }
0x17d5   : > { %5673 = vmatprep.mubr.msk.bf16.mxu0 %vm7391_vm4, %v3932_v61  ;;  %vm7415_vm4 = vmmov %vm7414_vm0 }
0x17d6   : > { %5674 = vmatmul.mubr.msk.bf16.vlgmr.msra.gmra.mxu0 %vm7392_vm14, %v3933_v3  ;;  %vm7416_vm14 = vmmov %vm7414_vm0 }
0x17d7   : > { %5684 = vmatpush3.bf16.msra.mxu0 %v5867_v9  ;;  %v5842_v9 = vpop.permute.xlu0 %5841 }
0x17d8   : > { %5695 = vmatprep.subr.bf16.mxu0 %v7045_v22  ;;  %v5843_v3 = vunpack.i.l.bf16 %v5842_v9 }
0x1896   : > { %v5675_v13 = vpop.f32.mrf.mxu0 }
0x1897   : > { %v3996_v48 = vadd.f32 %v5675_v13, %v6693_v1  ;;  %v5834_v13 = vunpack.i.h.bf16 %v5832_v21 }
0x1898   : > { %v3979_v31 = vpop.f32.mrf.mxu0 }
0x1899   : > { %vm4000_vm11 = vcmp.ge.f32.partialorder %v3996_v48, 0.0  ;;  %v4004_v55 = vmul.f32 0.2, %v3996_v48  ;;  %v3994_v61 = vadd.f32 %v3979_v31, %v6696_v16  ;;  %v5844_v31 = vunpack.i.h.bf16 %v5842_v9 }
0x189a   : > { %v5676_v8 = vpop.f32.mrf.mxu0 }
0x189b   : > { %v4008_v52 = vsel %vm4000_vm11, %v3996_v48, %v4004_v55  ;;  %vm3998_vm7 = vcmp.ge.f32.partialorder %v3994_v61, 0.0  ;;  %v4002_v14 = vmul.f32 0.2, %v3994_v61  ;;  %v3997_v49 = vadd.f32 %v5676_v8, %v6699_v34  ;;  %vm7417_vm11 = vmmov %vm7414_vm0 }
0x189c   : > { %v4017_v12 = vrot.slane %v4008_v52, 7  ;;  %v3982_v16 = vpop.f32.mrf.mxu0  ;;  %v7118_v27 = vmul.f32 %v5784_v5, %v4008_v52  ;;  %v7120_v21 = vmul.f32 %v5829_v54, %v4008_v52  ;;  %v4272_v55 = vrot.slane %v4008_v52, 1 }
0x189d   : > { %v4006_v6 = vsel %vm3998_vm7, %v3994_v61, %v4002_v14  ;;  %vm4001_vm6 = vcmp.ge.f32.partialorder %v3997_v49, 0.0  ;;  %v4005_v1 = vmul.f32 0.2, %v3997_v49  ;;  %v3995_v24 = vadd.f32 %v3982_v16, %v6702_v17  ;;  %v5871_v16 = vld [vmem:[%s7290_s18 + $0x28] sm:$0xff]   ;;  %vm7418_vm7 = vmmov %vm7414_vm0 }
0x189e   : > { %v4015_v48 = vrot.slane %v4006_v6, 7  ;;  %v7122_v8 = vmul.f32 %v5834_v13, %v4006_v6  ;;  %v4270_v14 = vrot.slane %v4006_v6, 1  ;;  %v4197_v5 = vmul.f32 %v5779_v0, %v4006_v6 }
0x189f   : > { %v4009_v34 = vsel %vm4001_vm6, %v3997_v49, %v4005_v1  ;;  %vm3999_vm8 = vcmp.ge.f32.partialorder %v3995_v24, 0.0  ;;  %v4003_v18 = vmul.f32 0.2, %v3995_v24  ;;  %vm7421_vm6 = vmmov %vm7414_vm0 }
0x18a0   : > { %v4011_v10 = vpack.c.bf16 %v4009_v34, %v4008_v52  ;;  %v4273_v51 = vrot.slane %v4009_v34, 1  ;;  %v7124_v46 = vmul.f32 %v5833_v40, %v4009_v34  ;;  %v4018_v61 = vrot.slane %v4009_v34, 7 }
0x18a1   : > { %v4007_v9 = vsel %vm3999_vm8, %v3995_v24, %v4003_v18  ;;  %v4196_v17 = vmul.f32 %v5778_v41, %v4009_v34  ;;  %vm7422_vm8 = vmmov %vm7414_vm0 }
0x18a2   : > { %v4275_v49 = vsel %vm4274_vm3, %v4272_v55, %v4273_v51  ;;  %v4680_v54 = vpack.c.bf16 %v7122_v8, %v7124_v46  ;;  %v4016_v1 = vrot.slane %v4007_v9, 7  ;;  %v7136_v40 = vmul.f32 %v5783_v47, %v4007_v9 }
0x18a3   : > { %v7138_v52 = vmul.f32 %v5813_v63, %v4275_v49  ;;  %v7140_v18 = vmul.f32 %v5839_v37, %v4275_v49  ;;  %v4302_v41 = vmul.f32 %v5794_v58, %v4275_v49  ;;  %v4271_v2 = vrot.slane %v4007_v9, 1 }
0x18a4   : > { %v4023_v0 = vsel %vm4021_vm5, %v4016_v1, %v4017_v12  ;;  %v4024_v24 = vsel %vm4021_vm5, %v4015_v48, %v4016_v1  ;;  %v4278_v13 = vsel %vm4274_vm3, %v4273_v51, %v4270_v14  ;;  %v4010_v32 = vpack.c.bf16 %v4007_v9, %v4006_v6 }
0x18a5   : > { %v4276_v47 = vsel %vm4274_vm3, %v4271_v2, %v4272_v55  ;;  %v4277_v63 = vsel %vm4274_vm3, %v4270_v14, %v4271_v2  ;;  %v4299_v58 = vmul.f32 %v5788_v7, %v4278_v13  ;;  %v4490_v37 = vmul.f32 %v5814_v20, %v4278_v13  ;;  %vm7420_vm3 = vmmov %vm7414_vm0 }
0x18a6   : > { %v4300_v51 = vmul.f32 %v5789_v43, %v4277_v63  ;;  %v4487_v6 = vmul.f32 %v5808_v42, %v4277_v63  ;;  %v7165_v55 = vmul.f32 %v5843_v3, %v4278_v13  ;;  %v7167_v34 = vmul.f32 %v5844_v31, %v4277_v63  ;;  %5685 = vmatprep.mubr.msk.bf16.mxu0 %vm7393_vm2, %v4010_v32  ;;  %vm7423_vm2 = vmmov %vm7414_vm0 }
0x18a7   : > { %v4492_v7 = vpack.c.bf16 %v4490_v37, %v7138_v52  ;;  %5686 = vmatmul.mubr.msk.bf16.vlgmr.msra.gmra.mxu0 %vm7394_vm13, %v4011_v10  ;;  %v4022_v15 = vsel %vm4021_vm5, %v4017_v12, %v4018_v61  ;;  %v4025_v33 = vsel %vm4021_vm5, %v4018_v61, %v4015_v48  ;;  %v4048_v43 = vmul.f32 %v5773_v57, %v4024_v24  ;;  %vm7419_vm5 = vmmov %vm7414_vm0 }
0x18a8   : > { %v4774_v42 = vpack.c.bf16 %v7167_v34, %v7165_v55  ;;  %v4046_v20 = vmul.f32 %v5767_v4, %v4022_v15  ;;  %v7395_v3 = vunpack.i.h.bf16 %v7068_v19  ;;  %v7396_v10 = vunpack.i.h.bf16 %v7054_v26  ;;  %5696 = vmatpush3.bf16.msra.mxu0 %v7045_v22  ;;  %vm7424_vm13 = vmmov %vm7414_vm0 }
0x18a9   : > { %v4303_v12 = vpack.c.bf16 %v4300_v51, %v4299_v58  ;;  %v4200_v11 = vpack.c.bf16 %v4197_v5, %v4196_v17  ;;  %v7397_v48 = vunpack.i.l.bf16 %v7062_v35  ;;  %v7398_v57 = vunpack.i.h.bf16 %v7070_v50  ;;  %5707 = vmatprep.subr.bf16.mxu0 %v5871_v16  ;;  %v5870_v35 = vld [vmem:[%s7290_s18 + $0x18] sm:$0xff]  }
0x18aa   : > { %v4047_v31 = vmul.f32 %v7395_v3, %v4025_v33  ;;  %v4049_v14 = vmul.f32 %v7396_v10, %v4023_v0  ;;  %v4201_v19 = vpack.c.bf16 %v7118_v27, %v7136_v40  ;;  %v7399_v4 = vunpack.i.l.bf16 %v7064_v60 }
0x18ab   : > { %v4301_v61 = vmul.f32 %v7397_v48, %v4276_v47  ;;  %v4488_v49 = vmul.f32 %v7398_v57, %v4276_v47  ;;  %5697 = vmatprep.mubr.msk.bf16.mxu0 %vm7400_vm10, %v4303_v12  ;;  %v7401_v50 = vunpack.i.h.bf16 %v7064_v60  ;;  %v7402_v5 = vunpack.i.l.bf16 %v7078_v62 }
0x18ac   : > { %v4050_v1 = vpack.c.bf16 %v4047_v31, %v4046_v20  ;;  %v4051_v52 = vpack.c.bf16 %v4049_v14, %v4048_v43  ;;  %v4393_v26 = vmul.f32 %v7399_v4, %v4025_v33  ;;  %v7404_v27 = vunpack.i.l.bf16 %v7066_v59 }
0x18ad   : > { %v4304_v22 = vpack.c.bf16 %v4302_v41, %v4301_v61  ;;  %v4491_v2 = vpack.c.bf16 %v4488_v49, %v4487_v6  ;;  %v4394_v17 = vmul.f32 %v7401_v50, %v4024_v24  ;;  %v4675_v13 = vmul.f32 %v7402_v5, %v4007_v9  ;;  %v5873_v9 = vld [vmem:[%s7290_s18 + $0x38] sm:$0xff]  }
0x18ae   : > { %5679 = vmatprep.mubr.msk.bf16.mxu1 %vm7403_vm15, %v4050_v1  ;;  %v4395_v40 = vmul.f32 %v7404_v27, %v4023_v0  ;;  %v7405_v32 = vunpack.i.h.bf16 %v7066_v59  ;;  %v7406_v41 = vunpack.i.l.bf16 %v7074_v56  ;;  %v7407_v37 = vunpack.i.h.bf16 %v7074_v56 }
0x18af   : > { %5680 = vmatmul.mubr.msk.bf16.vlgmr.msra.gmra.mxu1 %vm7408_vm9, %v4051_v52  ;;  %v4397_v60 = vpack.c.bf16 %v4394_v17, %v4393_v26  ;;  %v4679_v62 = vpack.c.bf16 %v7120_v21, %v4675_v13  ;;  %v7409_v6 = vunpack.i.l.bf16 %v7076_v36  ;;  %v7410_v59 = vunpack.i.h.bf16 %v7076_v36  ;;  %5698 = vmatmul.mubr.msk.bf16.vlgmr.msra.gmra.mxu0 %vm7413_vm1, %v4304_v22  ;;  %v5874_v36 = vld [vmem:[%s7290_s18 + $0x40] sm:$0xff]  }
0x18b0   : > { %v4396_v63 = vmul.f32 %v7405_v32, %v4022_v15  ;;  %v4581_v58 = vmul.f32 %v7406_v41, %v4024_v24  ;;  %v4582_v51 = vmul.f32 %v7407_v37, %v4023_v0  ;;  %5690 = vmatpush3.bf16.msra.mxu1 %v7050_v29  ;;  %5691 = vmatprep.mubr.msk.bf16.mxu1 %vm7411_vm12, %v4200_v11  ;;  %v7412_v24 = vunpack.i.l.bf16 %v7095_v53  ;;  %v5872_v29 = vld [vmem:[%s7290_s18 + $0x30] sm:$0xff]   ;;  %vm7425_vm12 = vmmov %vm7414_vm0 }
0x18b1   : > { %v4583_v55 = vmul.f32 %v7409_v6, %v4022_v15  ;;  %v4584_v34 = vmul.f32 %v7410_v59, %v4025_v33  ;;  %5701 = vmatprep.subr.bf16.mxu1 %v5870_v35  ;;  %5709 = vmatprep.mubr.msk.bf16.mxu0 %vm7414_vm0, %v4491_v2 }
0x18b2   : > { %v4398_v56 = vpack.c.bf16 %v4396_v63, %v4395_v40  ;;  %v4585_v0 = vpack.c.bf16 %v4582_v51, %v4581_v58  ;;  %v4769_v43 = vmul.f32 %v7412_v24, %v4276_v47  ;;  %5708 = vmatpush3.bf16.msra.mxu0 %v5871_v16 }
0x18b3   : > { %v4586_v21 = vpack.c.bf16 %v4584_v34, %v4583_v55  ;;  %5719 = vmatprep.subr.bf16.mxu0 %v5873_v9 }
0x18b4   : > { %v4773_v15 = vpack.c.bf16 %v7140_v18, %v4769_v43 }
0x18b7   : > { %5692 = vmatmul.mubr.msk.bf16.vlgmr.msra.gmra.mxu1 %vm7415_vm4, %v4201_v19  ;;  %5710 = vmatmul.mubr.msk.bf16.vlgmr.msra.gmra.mxu0 %vm7417_vm11, %v4492_v7  ;;  %vm7426_vm4 = vmmov %vm7414_vm0 }
0x18b8   : > { %5702 = vmatpush3.bf16.msra.mxu1 %v5870_v35  ;;  %5703 = vmatprep.mubr.msk.bf16.mxu1 %vm7416_vm14, %v4397_v60  ;;  %vm7427_vm14 = vmmov %vm7414_vm0 }
0x18b9   : > { %5713 = vmatprep.subr.bf16.mxu1 %v5872_v29  ;;  %5721 = vmatprep.mubr.msk.bf16.mxu0 %vm7418_vm7, %v4679_v62 }
0x18ba   : > { %5720 = vmatpush3.bf16.msra.mxu0 %v5873_v9 }
0x18bf   : > { %5704 = vmatmul.mubr.msk.bf16.vlgmr.msra.gmra.mxu1 %vm7419_vm5, %v4398_v56  ;;  %5722 = vmatmul.mubr.msk.bf16.vlgmr.msra.gmra.mxu0 %vm7421_vm6, %v4680_v54 }
0x18c0   : > { %5714 = vmatpush3.bf16.msra.mxu1 %v5872_v29  ;;  %5715 = vmatprep.mubr.msk.bf16.mxu1 %vm7420_vm3, %v4585_v0 }
0x18c1   : > { %5725 = vmatprep.subr.bf16.mxu1 %v5874_v36 }
0x18c7   : > { %5716 = vmatmul.mubr.msk.bf16.vlgmr.msra.gmra.mxu1 %vm7422_vm8, %v4586_v21 }
0x18c8   : > { %5726 = vmatpush3.bf16.msra.mxu1 %v5874_v36  ;;  %5727 = vmatprep.mubr.msk.bf16.mxu1 %vm7423_vm2, %v4773_v15  ;;  %v5215_v36 = vld [vmem:[%s7291_s19] ss:$0 sm:$0xff] }
0x18cf   : > { %5728 = vmatmul.mubr.msk.bf16.vlgmr.msra.gmra.mxu1 %vm7424_vm13, %v4774_v42 }
0x1967   : > { %v5687_v53 = vpop.f32.mrf.mxu0 }
0x1969   : > { %v4161_v18 = vpop.f32.mrf.mxu0 }
0x196b   : > { %v5688_v47 = vpop.f32.mrf.mxu0 }
0x196d   : > { %v4164_v7 = vpop.f32.mrf.mxu0 }
0x196f   : > { %v5681_v16 = vpop.f32.mrf.mxu1  ;;  %v5699_v20 = vpop.f32.mrf.mxu0 }
0x1970   : > { %v4170_v48 = vadd.f32 %v5687_v53, %v5681_v16 }
0x1971   : > { %v4100_v33 = vpop.f32.mrf.mxu1  ;;  %v4354_v31 = vpop.f32.mrf.mxu0 }
0x1972   : > { %v4162_v42 = vadd.f32 %v4161_v18, %v4100_v33  ;;  %v5005_v33 = vld [vmem:[%s7293_s21] ss:$0 sm:$0xff] }
0x1973   : > { %v5682_v3 = vpop.f32.mrf.mxu1  ;;  %v5700_v8 = vpop.f32.mrf.mxu0 }
0x1974   : > { %v4173_v52 = vadd.f32 %v5688_v47, %v5682_v3 }
0x1975   : > { %v4103_v46 = vpop.f32.mrf.mxu1  ;;  %v4357_v10 = vpop.f32.mrf.mxu0 }
0x1976   : > { %v4165_v35 = vadd.f32 %v4164_v7, %v4103_v46 }
0x1977   : > { %v5693_v54 = vpop.f32.mrf.mxu1  ;;  %v5711_v12 = vpop.f32.mrf.mxu0 }
0x1978   : > { %v4268_v49 = vadd.f32 %v5693_v54, %v4170_v48 }
0x1979   : > { %v4251_v14 = vpop.f32.mrf.mxu1  ;;  %v4542_v61 = vpop.f32.mrf.mxu0 }
0x197a   : > { %v4266_v19 = vadd.f32 %v4251_v14, %v4162_v42  ;;  %v4371_v2 = vadd.f32 %v5699_v20, %v4268_v49  ;;  %v1304_v49 = vadd.f32 %v5005_v33, %v6224_v25 }
0x197b   : > { %v5694_v11 = vpop.f32.mrf.mxu1  ;;  %v5712_v4 = vpop.f32.mrf.mxu0 }
0x197c   : > { %v4269_v22 = vadd.f32 %v5694_v11, %v4173_v52  ;;  %v4369_v5 = vadd.f32 %v4354_v31, %v4266_v19 }
0x197d   : > { %v4254_v57 = vpop.f32.mrf.mxu1  ;;  %v4545_v13 = vpop.f32.mrf.mxu0 }
0x197e   : > { %v4267_v27 = vadd.f32 %v4254_v57, %v4165_v35  ;;  %v4372_v63 = vadd.f32 %v5700_v8, %v4269_v22 }
0x197f   : > { %v5705_v1 = vpop.f32.mrf.mxu1  ;;  %v5723_v37 = vpop.f32.mrf.mxu0 }
0x1980   : > { %v4465_v17 = vadd.f32 %v5705_v1, %v4371_v2  ;;  %v4370_v60 = vadd.f32 %v4357_v10, %v4267_v27 }
0x1981   : > { %v4448_v26 = vpop.f32.mrf.mxu1  ;;  %v4730_v34 = vpop.f32.mrf.mxu0 }
0x1982   : > { %v4463_v32 = vadd.f32 %v4448_v26, %v4369_v5  ;;  %v4559_v51 = vadd.f32 %v5711_v12, %v4465_v17  ;;  %v1306_v12 = vadd.f32 %v5005_v33, %v6222_v23  ;;  %v1307_v26 = vadd.f32 %v5005_v33, %v6226_v28 }
0x1983   : > { %v5706_v50 = vpop.f32.mrf.mxu1  ;;  %v5724_v53 = vpop.f32.mrf.mxu0  ;;  %v1305_v5 = vadd.f32 %v5005_v33, %v6228_v30 }
0x1984   : > { %v4466_v58 = vadd.f32 %v5706_v50, %v4372_v63  ;;  %v4557_v6 = vadd.f32 %v4542_v61, %v4463_v32 }
0x1985   : > { %v4451_v40 = vpop.f32.mrf.mxu1  ;;  %v4733_v8 = vpop.f32.mrf.mxu0 }
0x1986   : > { %v4464_v55 = vadd.f32 %v4451_v40, %v4370_v60  ;;  %v4560_v0 = vadd.f32 %v5712_v4, %v4466_v58 }
0x1987   : > { %v5717_v41 = vpop.f32.mrf.mxu1 }
0x1988   : > { %v4653_v9 = vadd.f32 %v5717_v41, %v4559_v51  ;;  %v4558_v15 = vadd.f32 %v4545_v13, %v4464_v55 }
0x1989   : > { %v4636_v62 = vpop.f32.mrf.mxu1 }
0x198a   : > { %v4651_v56 = vadd.f32 %v4636_v62, %v4557_v6  ;;  %v4747_v21 = vadd.f32 %v5723_v37, %v4653_v9 }
0x198b   : > { %v5718_v59 = vpop.f32.mrf.mxu1 }
0x198c   : > { %v4654_v43 = vadd.f32 %v5718_v59, %v4560_v0  ;;  %v4745_v47 = vadd.f32 %v4730_v34, %v4651_v56 }
0x198d   : > { %v4639_v24 = vpop.f32.mrf.mxu1 }
0x198e   : > { %v4652_v16 = vadd.f32 %v4639_v24, %v4558_v15  ;;  %v4748_v31 = vadd.f32 %v5724_v53, %v4654_v43 }
0x198f   : > { %v5729_v29 = vpop.f32.mrf.mxu1 }
0x1990   : > { %v4841_v18 = vadd.f32 %v5729_v29, %v4747_v21  ;;  %v4746_v11 = vadd.f32 %v4733_v8, %v4652_v16 }
0x1991   : > { %v4824_v7 = vpop.f32.mrf.mxu1 }
0x1992   : > { %v4852_v20 = vadd.f32 %v5215_v36, %v4841_v18  ;;  %v4839_v3 = vadd.f32 %v4824_v7, %v4745_v47 }
0x1993   : > { %v5730_v46 = vpop.f32.mrf.mxu1 }
0x1994   : > { %vm4856_vm10 = vcmp.ge.f32.partialorder %v4852_v20, 0.0  ;;  %v4860_v54 = vmul.f32 0.2, %v4852_v20  ;;  %v4850_v10 = vadd.f32 %v5215_v36, %v4839_v3  ;;  %v4842_v14 = vadd.f32 %v5730_v46, %v4748_v31 }
0x1995   : > { %v4827_v48 = vpop.f32.mrf.mxu1 }
0x1996   : > { %v4864_v61 = vsel %vm4856_vm10, %v4852_v20, %v4860_v54  ;;  %vm4854_vm15 = vcmp.ge.f32.partialorder %v4850_v10, 0.0  ;;  %v4858_v57 = vmul.f32 0.2, %v4850_v10  ;;  %v4853_v42 = vadd.f32 %v5215_v36, %v4842_v14 }
0x1997   : > { %v4868_v1 = vadd.f32 %v4864_v61, %v1306_v12  ;;  %v4840_v52 = vadd.f32 %v4827_v48, %v4746_v11 }
0x1998   : > { %v4862_v19 = vsel %vm4854_vm15, %v4850_v10, %v4858_v57  ;;  %vm4857_vm9 = vcmp.ge.f32.partialorder %v4853_v42, 0.0  ;;  %v4861_v4 = vmul.f32 0.2, %v4853_v42 }
0x1999   : > { %v4872_v23 = vadd.f32 %v4868_v1, %v6167_v44  ;;  %v4866_v22 = vadd.f32 %v4862_v19, %v1304_v49  ;;  %v4851_v2 = vadd.f32 %v5215_v36, %v4840_v52 }
0x199a   : > { %v4865_v35 = vsel %vm4857_vm9, %v4853_v42, %v4861_v4 }
0x199b   : > { %4876 = vst.msk [vmem:[%s703_s30 + $0x10] sm:$0xff] %vm7425_vm12, %v4872_v23  ;;  %v4870_v25 = vadd.f32 %v4866_v22, %v6154_v38  ;;  %v4869_v50 = vadd.f32 %v4865_v35, %v1307_v26  ;;  %vm4855_vm1 = vcmp.ge.f32.partialorder %v4851_v2, 0.0  ;;  %v4859_v17 = vmul.f32 0.2, %v4851_v2 }
0x199d   : > { %4874 = vst.msk [vmem:[%s703_s30] sm:$0xff] %vm7414_vm0, %v4870_v25  ;;  %v4873_v13 = vadd.f32 %v4869_v50, %v6169_v45  ;;  %v4863_v27 = vsel %vm4855_vm1, %v4851_v2, %v4859_v17 }
0x199e   : > { %v4867_v28 = vadd.f32 %v4863_v27, %v1305_v5 }
0x199f   : > { %4877 = vst.msk [vmem:[%s703_s30 + $0x18] sm:$0xff] %vm7426_vm4, %v4873_v13 }
0x19a0   : > { %v4871_v44 = vadd.f32 %v4867_v28, %v6156_v39 }
0x19a2   : > { %4875 = vst.msk [vmem:[%s703_s30 + $0x8] sm:$0xff] %vm7427_vm14, %v4871_v44 }
0x19a3 PF: > { %s32_s3 = sadd.s32 1, %s5977_s3  }
0x19a4   : > { %p29_p4 = scmp.ge.s32.totalorder %s32_s3, 4  }
0x19a6   :  { %31 = sbr.rel (!%p29_p4) target bundleno = 8 (0x8), region = 188 }

</bundles_post_ra>
